<compile_context>
chip_gen: v7x
topology: tpu7x:2x2x1
jax: 0.10.0
libtpu: 0.0.40
codegen_flags: <defaults>
</compile_context>

<pallas_src>
import jax
import jax.numpy as jnp
from jax.experimental import pallas as pl
from jax.experimental.pallas import tpu as pltpu

LANE = 128


# ------------------------------ fused kernel -----------------------------------
def make_fused_kernel(num_layers, T, Hp, mxu_dtype):
    """Fused GRU-encoder + MLP-decoder kernel.

    Ref layout (all VMEM):
      x_ref                      (T, BT, F)      time-major batch tile
      per layer (x num_layers):
        wi_cat                   (Din, 3*Hp)     input->gates weight  [r|z|n], lane-padded
        bi_cat                   (1, 3*Hp)       gate bias (b_ih+b_hh for r/z, b_ih for n)
        wh_cat                   (Hp, 3*Hp)      hidden->gates weight [r|z|n], lane-padded
        b_hn                     (1, Hp)         hidden bias of n gate (kept inside r*(...))
      w1 (Hp,128), b1 (1,128), w2 (128,256), b2 (1,256), w3 (256,F*T), b3 (1,F*T)
      out_ref                    (BT, F*T)
      seq_ref (scratch, if num_layers>1)  (T, BT, Hp)
    """

    def kernel(*refs):
        x_ref = refs[0]
        off = 1
        layers = []
        for _ in range(num_layers):
            layers.append(refs[off:off + 4])
            off += 4
        w1_ref, b1_ref, w2_ref, b2_ref, w3_ref, b3_ref = refs[off:off + 6]
        out_ref = refs[off + 6]
        seq_ref = refs[off + 7] if num_layers > 1 else None

        BT = x_ref.shape[1]
        # Flatten (T, BT, Din) -> (T*BT, Din): the input projection is one big matmul
        # per layer, off the recurrent critical path.
        x2d = x_ref[...].reshape(T * BT, x_ref.shape[2])

        h = None
        for li, (wi_ref, bi_ref, wh_ref, bhn_ref) in enumerate(layers):
            # Hoisted input->gates projection for all timesteps (biases folded in).
            gi = (jnp.dot(x2d.astype(mxu_dtype), wi_ref[...],
                          preferred_element_type=jnp.float32)
                  + bi_ref[...]).reshape(T, BT, 3 * Hp)

            # Hoist weight load and the b_hn broadcast out of the time loop.
            wh = wh_ref[...]                                   # (Hp, 3*Hp)
            bhn = jnp.broadcast_to(bhn_ref[...], (BT, Hp))

            h = jnp.zeros((BT, Hp), jnp.float32)
            last = (li == num_layers - 1)
            # T is small and static: fully unroll so h stays in vregs and the LLO
            # scheduler sees across iterations.
            for t in range(T):
                # ONE fused recurrent matmul per step (r|z|n in one 3*Hp-wide tile).
                gh = jnp.dot(h.astype(mxu_dtype), wh,
                             preferred_element_type=jnp.float32)
                gi_t = gi[t]
                # One sigmoid on the joint r|z slice; all splits are vreg-aligned.
                rz = jax.nn.sigmoid(gi_t[:, :2 * Hp] + gh[:, :2 * Hp])
                r = rz[:, :Hp]
                z = rz[:, Hp:]
                n = jnp.tanh(gi_t[:, 2 * Hp:] + r * (gh[:, 2 * Hp:] + bhn))
                h = (1.0 - z) * n + z * h
                if not last:
                    seq_ref[t] = h          # per-step VMEM store bounds live ranges
            if not last:
                x2d = seq_ref[...].reshape(T * BT, Hp)

        # Decoder MLP on the last layer's final hidden state (dropout = identity).
        y = jnp.maximum(
            jnp.dot(h.astype(mxu_dtype), w1_ref[...],
                    preferred_element_type=jnp.float32) + b1_ref[...], 0.0)
        y = jnp.maximum(
            jnp.dot(y.astype(mxu_dtype), w2_ref[...],
                    preferred_element_type=jnp.float32) + b2_ref[...], 0.0)
        out_ref[...] = (jnp.dot(y.astype(mxu_dtype), w3_ref[...],
                                preferred_element_type=jnp.float32) + b3_ref[...])

    return kernel


# --------------------------- parameter preparation ------------------------------
def _prep_gru_layer(w_ih_t, w_hh_t, b_ih, b_hh, Hp, k_pad, mxu_dtype):
    """Split PyTorch-style combined (Din,3H)/(H,3H) weights into lane-padded,
    concatenated per-gate pieces [r|z|n] with each gate occupying a full Hp block."""
    H = w_hh_t.shape[0]

    def pad_cols(w):                       # (K, H) -> (K, Hp)
        return jnp.pad(w, ((0, 0), (0, Hp - H)))

    def padb(b):                           # (H,) -> (1, Hp)
        return jnp.pad(b, (0, Hp - H)).reshape(1, Hp)

    wi_cat = jnp.concatenate(
        [pad_cols(w_ih_t[:, :H]), pad_cols(w_ih_t[:, H:2 * H]),
         pad_cols(w_ih_t[:, 2 * H:])], axis=1)
    if k_pad:                              # layers > 0: input is the Hp-padded hidden
        wi_cat = jnp.pad(wi_cat, ((0, k_pad), (0, 0)))

    wh_cat = jnp.concatenate(
        [pad_cols(w_hh_t[:, :H]), pad_cols(w_hh_t[:, H:2 * H]),
         pad_cols(w_hh_t[:, 2 * H:])], axis=1)
    wh_cat = jnp.pad(wh_cat, ((0, Hp - H), (0, 0)))

    b_r = padb(b_ih[:H] + b_hh[:H])
    b_z = padb(b_ih[H:2 * H] + b_hh[H:2 * H])
    b_in = padb(b_ih[2 * H:])
    bi_cat = jnp.concatenate([b_r, b_z, b_in], axis=1)        # (1, 3*Hp)
    b_hn = padb(b_hh[2 * H:])                                  # stays inside r*(...)

    return [wi_cat.astype(mxu_dtype), bi_cat, wh_cat.astype(mxu_dtype), b_hn]


def _pick_bt(B):
    """Batch-tile rows: >=8 sublanes, <=128 rows; >=2 grid steps when B >= 16 so the
    parallel grid axis shards across v7x's two TensorCores (no effect on v5e/v6e)."""
    if B <= 8:
        return 8
    bt = (B + 1) // 2                       # ceil(B/2) -> at least 2 grid steps
    bt = ((bt + 7) // 8) * 8
    return min(bt, 128)


def _vmem_limit_bytes(T, BT, F, Hp, out_dim, weight_args):
    """Explicit VMEM budget with generous headroom, clamped to a value that is safe
    on v7x's 64 MiB part (32 MiB scoped default) while raising v5e's 16 MiB default."""
    need = 0
    need += 2 * 4 * T * BT * F              # double-buffered input tile
    need += 2 * 4 * BT * out_dim            # double-buffered output tile
    for a in weight_args:                   # grid-invariant weights (double-buffered)
        need += 2 * int(a.size) * a.dtype.itemsize
    need += 4 * T * BT * Hp                 # inter-layer sequence scratch
    need += 2 * 4 * T * BT * 3 * Hp         # hoisted gate projections + headroom
    return int(min(max(2 * need, 8 << 20), 48 << 20))


def _cost_estimate(T, Bp, F, Hp, num_layers, dec_args):
    flops, trans = 0, 0
    din = F
    for _ in range(num_layers):
        flops += 2 * T * Bp * din * 3 * Hp      # hoisted input projection
        flops += 2 * T * Bp * Hp * 3 * Hp       # fused recurrent matmul
        flops += 10 * T * Bp * Hp               # gate elementwise (approx)
        trans += 3 * T * Bp * Hp                # sigmoid (r|z) + tanh
        din = Hp
    for w in (dec_args[0], dec_args[2], dec_args[4]):
        flops += 2 * Bp * w.shape[0] * w.shape[1]
    bytes_accessed = 4 * (T * Bp * F + Bp * dec_args[4].shape[1])
    for a in dec_args:
        bytes_accessed += 4 * int(a.size)
    return pl.CostEstimate(flops=int(flops), transcendentals=int(trans),
                           bytes_accessed=int(bytes_accessed))


# ------------------------------- host wrapper -----------------------------------
def recurrent_autoencoder_forward(batch, gru_params, dec_params, seq_len, spatial_size,
                                  mxu_dtype=jnp.float32):
    """batch: (B, T, F) with F = spatial_size**2. Returns (B, seq_len, spatial_size**2).

    mxu_dtype=jnp.bfloat16 enables bf16 MXU operands (f32 accumulation) on v6e/v7x /
    MXU-only bf16 on v5e; default f32 for exact parity with the reference.
    """
    B, T, F = batch.shape
    num_layers = len(gru_params)
    H = gru_params[0][1].shape[0]
    Hp = ((H + LANE - 1) // LANE) * LANE    # pad gate width to the 128-lane tile

    BT = _pick_bt(B)
    Bp = ((B + BT - 1) // BT) * BT
    grid = (Bp // BT,)

    x = jnp.transpose(batch.astype(jnp.float32), (1, 0, 2))    # (T, B, F) time-major
    if Bp != B:
        x = jnp.pad(x, ((0, 0), (0, Bp - B), (0, 0)))

    layer_args = []
    for li, p in enumerate(gru_params):
        layer_args.extend(_prep_gru_layer(*p, Hp=Hp,
                                          k_pad=(0 if li == 0 else Hp - H),
                                          mxu_dtype=mxu_dtype))

    w1, b1, w2, b2, w3, b3 = dec_params
    w1p = jnp.pad(w1, ((0, Hp - H), (0, 0)))                    # K-dim pad to match Hp
    dec_args = [w1p.astype(mxu_dtype), b1.reshape(1, -1),
                w2.astype(mxu_dtype), b2.reshape(1, -1),
                w3.astype(mxu_dtype), b3.reshape(1, -1)]
    out_dim = w3.shape[1]

    # BlockSpecs: batch-tiled input/output, weights fully resident (constant block).
    in_specs = [pl.BlockSpec((T, BT, F), lambda b: (0, b, 0))]
    for a in layer_args + dec_args:
        in_specs.append(pl.BlockSpec(a.shape, lambda b, nd=a.ndim: (0,) * nd))
    out_spec = pl.BlockSpec((BT, out_dim), lambda b: (b, 0))

    scratch_shapes = []
    if num_layers > 1:
        scratch_shapes.append(pltpu.VMEM((T, BT, Hp), jnp.float32))

    kernel = make_fused_kernel(num_layers, T, Hp, mxu_dtype)
    out = pl.pallas_call(
        kernel,
        grid=grid,
        out_shape=jax.ShapeDtypeStruct((Bp, out_dim), jnp.float32),
        in_specs=in_specs,
        out_specs=out_spec,
        scratch_shapes=scratch_shapes,
        compiler_params=pltpu.CompilerParams(
            dimension_semantics=("parallel",),
            vmem_limit_bytes=_vmem_limit_bytes(T, BT, F, Hp, out_dim,
                                               layer_args + dec_args)),
        cost_estimate=_cost_estimate(T, Bp, F, Hp, num_layers, dec_args),
    )(x, *layer_args, *dec_args)

    return out[:B].reshape(B, seq_len, spatial_size * spatial_size)


# ------------------------------ pure-JAX reference ------------------------------
def _reference_forward(batch, gru_params, dec_params, seq_len, spatial_size):
    B, T, _ = batch.shape
    layer_in = batch.astype(jnp.float32)
    h = None
    for (w_ih_t, w_hh_t, b_ih, b_hh) in gru_params:
        H = w_hh_t.shape[0]
        h = jnp.zeros((B, H), jnp.float32)
        outs = []
        for t in range(T):
            x_t = layer_in[:, t, :]
            gi = x_t @ w_ih_t + b_ih
            gh = h @ w_hh_t + b_hh
            r = jax.nn.sigmoid(gi[:, :H] + gh[:, :H])
            z = jax.nn.sigmoid(gi[:, H:2 * H] + gh[:, H:2 * H])
            n = jnp.tanh(gi[:, 2 * H:] + r * gh[:, 2 * H:])
            h = (1.0 - z) * n + z * h
            outs.append(h)
        layer_in = jnp.stack(outs, axis=1)
    w1, b1, w2, b2, w3, b3 = dec_params
    y = jnp.maximum(h @ w1 + b1, 0.0)
    y = jnp.maximum(y @ w2 + b2, 0.0)
    y = y @ w3 + b3
    return y.reshape(B, seq_len, spatial_size * spatial_size)


# ---------------------------------- main ---------------------------------------
if __name__ == "__main__":
    B = 2
    spatial_size = 4           # input_size = spatial_size**2 = 16
    seq_len = 8
    hidden_size = 32
    num_layers = 2
    F = spatial_size * spatial_size

    key = jax.random.PRNGKey(0)

    def uniform(key, shape, bound):
        return jax.random.uniform(key, shape, jnp.float32, -bound, bound)

    # GRU params (PyTorch stores weight_ih (3H, in); pre-transposed to (in, 3H)).
    gru_params = []
    bound_h = 1.0 / jnp.sqrt(hidden_size)
    in_dim = F
    for _ in range(num_layers):
        key, k1, k2, k3, k4 = jax.random.split(key, 5)
        w_ih_t = uniform(k1, (in_dim, 3 * hidden_size), bound_h)
        w_hh_t = uniform(k2, (hidden_size, 3 * hidden_size), bound_h)
        b_ih = uniform(k3, (3 * hidden_size,), bound_h)
        b_hh = uniform(k4, (3 * hidden_size,), bound_h)
        gru_params.append((w_ih_t, w_hh_t, b_ih, b_hh))
        in_dim = hidden_size

    # Decoder params (PyTorch Linear weight (out, in); pre-transposed to (in, out)).
    key, k1, k2, k3, k4, k5, k6 = jax.random.split(key, 7)
    w1 = uniform(k1, (hidden_size, 128), 1.0 / jnp.sqrt(hidden_size))
    b1 = uniform(k2, (128,), 1.0 / jnp.sqrt(hidden_size))
    w2 = uniform(k3, (128, 256), 1.0 / jnp.sqrt(128))
    b2 = uniform(k4, (256,), 1.0 / jnp.sqrt(128))
    w3 = uniform(k5, (256, F * seq_len), 1.0 / jnp.sqrt(256))
    b3 = uniform(k6, (F * seq_len,), 1.0 / jnp.sqrt(256))
    dec_params = (w1, b1, w2, b2, w3, b3)

    # Deterministic input: (B, seq_len, spatial_size**2), already flattened frames.
    key, kx = jax.random.split(key)
    batch = jax.random.normal(kx, (B, seq_len, F), jnp.float32)

    out = recurrent_autoencoder_forward(batch, gru_params, dec_params,
                                        seq_len, spatial_size)
    out = jax.block_until_ready(out)

    assert out.shape == (B, seq_len, spatial_size * spatial_size), out.shape

    ref = _reference_forward(batch, gru_params, dec_params, seq_len, spatial_size)
    assert jnp.allclose(out, ref, atol=2e-3, rtol=2e-3), \
        float(jnp.max(jnp.abs(out - ref)))

    print("KERNEL_OK")
</pallas_src>

<mosaic_0001>
module attributes {stable_mosaic.version = 11 : i64} {
  func.func @kernel(%arg0: i32, %arg1: memref<8x8x16xf32, #tpu.memory_space<vmem>>, %arg2: memref<16x384xf32, #tpu.memory_space<vmem>>, %arg3: memref<1x384xf32, #tpu.memory_space<vmem>>, %arg4: memref<128x384xf32, #tpu.memory_space<vmem>>, %arg5: memref<1x128xf32, #tpu.memory_space<vmem>>, %arg6: memref<128x384xf32, #tpu.memory_space<vmem>>, %arg7: memref<1x384xf32, #tpu.memory_space<vmem>>, %arg8: memref<128x384xf32, #tpu.memory_space<vmem>>, %arg9: memref<1x128xf32, #tpu.memory_space<vmem>>, %arg10: memref<128x128xf32, #tpu.memory_space<vmem>>, %arg11: memref<1x128xf32, #tpu.memory_space<vmem>>, %arg12: memref<128x256xf32, #tpu.memory_space<vmem>>, %arg13: memref<1x256xf32, #tpu.memory_space<vmem>>, %arg14: memref<256x128xf32, #tpu.memory_space<vmem>>, %arg15: memref<1x128xf32, #tpu.memory_space<vmem>>, %arg16: memref<8x128xf32, #tpu.memory_space<vmem>>, %arg17: memref<8x8x128xf32, #tpu.memory_space<vmem>>) attributes {dimension_semantics = [#tpu.dimension_semantics<parallel>], iteration_bounds = array<i64: 1>, scalar_prefetch = 0 : i64, scratch_operands = 1 : i64, tpu.core_type = #tpu.core_type<tc>, window_params = [{transform_indices = @transform_0, window_bounds = array<i64: 8, 8, 16>}, {pipeline_mode = #tpu.pipeline_mode<synchronous>, transform_indices = @transform_1, window_bounds = array<i64: 16, 384>}, {pipeline_mode = #tpu.pipeline_mode<synchronous>, transform_indices = @transform_2, window_bounds = array<i64: 1, 384>}, {pipeline_mode = #tpu.pipeline_mode<synchronous>, transform_indices = @transform_3, window_bounds = array<i64: 128, 384>}, {pipeline_mode = #tpu.pipeline_mode<synchronous>, transform_indices = @transform_4, window_bounds = array<i64: 1, 128>}, {pipeline_mode = #tpu.pipeline_mode<synchronous>, transform_indices = @transform_5, window_bounds = array<i64: 128, 384>}, {pipeline_mode = #tpu.pipeline_mode<synchronous>, transform_indices = @transform_6, window_bounds = array<i64: 1, 384>}, {pipeline_mode = #tpu.pipeline_mode<synchronous>, transform_indices = @transform_7, window_bounds = array<i64: 128, 384>}, {pipeline_mode = #tpu.pipeline_mode<synchronous>, transform_indices = @transform_8, window_bounds = array<i64: 1, 128>}, {pipeline_mode = #tpu.pipeline_mode<synchronous>, transform_indices = @transform_9, window_bounds = array<i64: 128, 128>}, {pipeline_mode = #tpu.pipeline_mode<synchronous>, transform_indices = @transform_10, window_bounds = array<i64: 1, 128>}, {pipeline_mode = #tpu.pipeline_mode<synchronous>, transform_indices = @transform_11, window_bounds = array<i64: 128, 256>}, {pipeline_mode = #tpu.pipeline_mode<synchronous>, transform_indices = @transform_12, window_bounds = array<i64: 1, 256>}, {pipeline_mode = #tpu.pipeline_mode<synchronous>, transform_indices = @transform_13, window_bounds = array<i64: 256, 128>}, {pipeline_mode = #tpu.pipeline_mode<synchronous>, transform_indices = @transform_14, window_bounds = array<i64: 1, 128>}, {transform_indices = @transform_15, window_bounds = array<i64: 8, 128>}]} {
    %c0 = arith.constant 0 : index
    %c0_0 = arith.constant 0 : index
    %c0_1 = arith.constant 0 : index
    %0 = vector.load %arg1[%c0, %c0_0, %c0_1] : memref<8x8x16xf32, #tpu.memory_space<vmem>>, vector<8x8x16xf32>
    %1 = vector.shape_cast %0 : vector<8x8x16xf32> to vector<64x16xf32>
    %c0_2 = arith.constant 0 : index
    %c0_3 = arith.constant 0 : index
    %2 = vector.load %arg2[%c0_2, %c0_3] : memref<16x384xf32, #tpu.memory_space<vmem>>, vector<16x384xf32>
    %cst = arith.constant dense<0.000000e+00> : vector<64x384xf32>
    %3 = tpu.matmul %1, %2, %cst {dimension_numbers = #tpu.dot_dimension_numbers<[1], [0], [0], [1], [0, 0, 1, 1], [], []>} : vector<64x16xf32>, vector<16x384xf32>, vector<64x384xf32> -> vector<64x384xf32>
    %c0_4 = arith.constant 0 : index
    %c0_5 = arith.constant 0 : index
    %4 = vector.load %arg3[%c0_4, %c0_5] : memref<1x384xf32, #tpu.memory_space<vmem>>, vector<1x384xf32>
    %5 = vector.broadcast %4 : vector<1x384xf32> to vector<64x384xf32>
    %6 = arith.addf %3, %5 : vector<64x384xf32>
    %7 = vector.shape_cast %6 : vector<64x384xf32> to vector<8x8x384xf32>
    %c0_6 = arith.constant 0 : index
    %c0_7 = arith.constant 0 : index
    %8 = vector.load %arg4[%c0_6, %c0_7] : memref<128x384xf32, #tpu.memory_space<vmem>>, vector<128x384xf32>
    %c0_8 = arith.constant 0 : index
    %c0_9 = arith.constant 0 : index
    %9 = vector.load %arg5[%c0_8, %c0_9] : memref<1x128xf32, #tpu.memory_space<vmem>>, vector<1x128xf32>
    %10 = vector.shape_cast %9 : vector<1x128xf32> to vector<1x128xf32>
    %11 = vector.broadcast %10 : vector<1x128xf32> to vector<8x128xf32>
    %cst_10 = arith.constant 0.000000e+00 : f32
    %12 = vector.broadcast %cst_10 : f32 to vector<8x128xf32>
    %cst_11 = arith.constant dense<0.000000e+00> : vector<8x384xf32>
    %13 = tpu.matmul %12, %8, %cst_11 {dimension_numbers = #tpu.dot_dimension_numbers<[1], [0], [0], [1], [0, 0, 1, 1], [], []>} : vector<8x128xf32>, vector<128x384xf32>, vector<8x384xf32> -> vector<8x384xf32>
    %14 = vector.extract_strided_slice %7 {offsets = [0, 0, 0], sizes = [1, 8, 384], strides = [1, 1, 1]} : vector<8x8x384xf32> to vector<1x8x384xf32>
    %15 = vector.shape_cast %14 : vector<1x8x384xf32> to vector<8x384xf32>
    %16 = vector.extract_strided_slice %15 {offsets = [0, 0], sizes = [8, 256], strides = [1, 1]} : vector<8x384xf32> to vector<8x256xf32>
    %17 = vector.extract_strided_slice %13 {offsets = [0, 0], sizes = [8, 256], strides = [1, 1]} : vector<8x384xf32> to vector<8x256xf32>
    %18 = arith.addf %16, %17 : vector<8x256xf32>
    %19 = arith.negf %18 : vector<8x256xf32>
    %20 = math.exp %19 : vector<8x256xf32>
    %cst_12 = arith.constant 1.000000e+00 : f32
    %21 = vector.broadcast %cst_12 : f32 to vector<8x256xf32>
    %22 = arith.addf %21, %20 : vector<8x256xf32>
    %23 = arith.divf %21, %22 : vector<8x256xf32>
    %24 = vector.extract_strided_slice %23 {offsets = [0, 0], sizes = [8, 128], strides = [1, 1]} : vector<8x256xf32> to vector<8x128xf32>
    %25 = vector.extract_strided_slice %23 {offsets = [0, 128], sizes = [8, 128], strides = [1, 1]} : vector<8x256xf32> to vector<8x128xf32>
    %26 = vector.extract_strided_slice %15 {offsets = [0, 256], sizes = [8, 128], strides = [1, 1]} : vector<8x384xf32> to vector<8x128xf32>
    %27 = vector.extract_strided_slice %13 {offsets = [0, 256], sizes = [8, 128], strides = [1, 1]} : vector<8x384xf32> to vector<8x128xf32>
    %28 = arith.addf %27, %11 : vector<8x128xf32>
    %29 = arith.mulf %24, %28 : vector<8x128xf32>
    %30 = arith.addf %26, %29 : vector<8x128xf32>
    %31 = math.tanh %30 : vector<8x128xf32>
    %cst_13 = arith.constant 1.000000e+00 : f32
    %32 = vector.broadcast %cst_13 : f32 to vector<8x128xf32>
    %33 = arith.subf %32, %25 : vector<8x128xf32>
    %34 = arith.mulf %33, %31 : vector<8x128xf32>
    %35 = arith.mulf %25, %12 : vector<8x128xf32>
    %36 = arith.addf %34, %35 : vector<8x128xf32>
    %c0_14 = arith.constant 0 : index
    %c0_15 = arith.constant 0 : index
    %c0_16 = arith.constant 0 : index
    %37 = vector.load %arg17[%c0_14, %c0_15, %c0_16] : memref<8x8x128xf32, #tpu.memory_space<vmem>>, vector<1x8x128xf32>
    %38 = vector.shape_cast %37 : vector<1x8x128xf32> to vector<8x128xf32>
    %39 = vector.shape_cast %36 : vector<8x128xf32> to vector<1x8x128xf32>
    tpu.vector_store %arg17[%c0_14, %c0_15, %c0_16], %39 {strides = array<i32>} : memref<8x8x128xf32, #tpu.memory_space<vmem>>, vector<1x8x128xf32>,
    %cst_17 = arith.constant dense<0.000000e+00> : vector<8x384xf32>
    %40 = tpu.matmul %36, %8, %cst_17 {dimension_numbers = #tpu.dot_dimension_numbers<[1], [0], [0], [1], [0, 0, 1, 1], [], []>} : vector<8x128xf32>, vector<128x384xf32>, vector<8x384xf32> -> vector<8x384xf32>
    %41 = vector.extract_strided_slice %7 {offsets = [1, 0, 0], sizes = [1, 8, 384], strides = [1, 1, 1]} : vector<8x8x384xf32> to vector<1x8x384xf32>
    %42 = vector.shape_cast %41 : vector<1x8x384xf32> to vector<8x384xf32>
    %43 = vector.extract_strided_slice %42 {offsets = [0, 0], sizes = [8, 256], strides = [1, 1]} : vector<8x384xf32> to vector<8x256xf32>
    %44 = vector.extract_strided_slice %40 {offsets = [0, 0], sizes = [8, 256], strides = [1, 1]} : vector<8x384xf32> to vector<8x256xf32>
    %45 = arith.addf %43, %44 : vector<8x256xf32>
    %46 = arith.negf %45 : vector<8x256xf32>
    %47 = math.exp %46 : vector<8x256xf32>
    %cst_18 = arith.constant 1.000000e+00 : f32
    %48 = vector.broadcast %cst_18 : f32 to vector<8x256xf32>
    %49 = arith.addf %48, %47 : vector<8x256xf32>
    %50 = arith.divf %48, %49 : vector<8x256xf32>
    %51 = vector.extract_strided_slice %50 {offsets = [0, 0], sizes = [8, 128], strides = [1, 1]} : vector<8x256xf32> to vector<8x128xf32>
    %52 = vector.extract_strided_slice %50 {offsets = [0, 128], sizes = [8, 128], strides = [1, 1]} : vector<8x256xf32> to vector<8x128xf32>
    %53 = vector.extract_strided_slice %42 {offsets = [0, 256], sizes = [8, 128], strides = [1, 1]} : vector<8x384xf32> to vector<8x128xf32>
    %54 = vector.extract_strided_slice %40 {offsets = [0, 256], sizes = [8, 128], strides = [1, 1]} : vector<8x384xf32> to vector<8x128xf32>
    %55 = arith.addf %54, %11 : vector<8x128xf32>
    %56 = arith.mulf %51, %55 : vector<8x128xf32>
    %57 = arith.addf %53, %56 : vector<8x128xf32>
    %58 = math.tanh %57 : vector<8x128xf32>
    %cst_19 = arith.constant 1.000000e+00 : f32
    %59 = vector.broadcast %cst_19 : f32 to vector<8x128xf32>
    %60 = arith.subf %59, %52 : vector<8x128xf32>
    %61 = arith.mulf %60, %58 : vector<8x128xf32>
    %62 = arith.mulf %52, %36 : vector<8x128xf32>
    %63 = arith.addf %61, %62 : vector<8x128xf32>
    %c1 = arith.constant 1 : index
    %c0_20 = arith.constant 0 : index
    %c0_21 = arith.constant 0 : index
    %64 = vector.load %arg17[%c1, %c0_20, %c0_21] : memref<8x8x128xf32, #tpu.memory_space<vmem>>, vector<1x8x128xf32>
    %65 = vector.shape_cast %64 : vector<1x8x128xf32> to vector<8x128xf32>
    %66 = vector.shape_cast %63 : vector<8x128xf32> to vector<1x8x128xf32>
    tpu.vector_store %arg17[%c1, %c0_20, %c0_21], %66 {strides = array<i32>} : memref<8x8x128xf32, #tpu.memory_space<vmem>>, vector<1x8x128xf32>,
    %cst_22 = arith.constant dense<0.000000e+00> : vector<8x384xf32>
    %67 = tpu.matmul %63, %8, %cst_22 {dimension_numbers = #tpu.dot_dimension_numbers<[1], [0], [0], [1], [0, 0, 1, 1], [], []>} : vector<8x128xf32>, vector<128x384xf32>, vector<8x384xf32> -> vector<8x384xf32>
    %68 = vector.extract_strided_slice %7 {offsets = [2, 0, 0], sizes = [1, 8, 384], strides = [1, 1, 1]} : vector<8x8x384xf32> to vector<1x8x384xf32>
    %69 = vector.shape_cast %68 : vector<1x8x384xf32> to vector<8x384xf32>
    %70 = vector.extract_strided_slice %69 {offsets = [0, 0], sizes = [8, 256], strides = [1, 1]} : vector<8x384xf32> to vector<8x256xf32>
    %71 = vector.extract_strided_slice %67 {offsets = [0, 0], sizes = [8, 256], strides = [1, 1]} : vector<8x384xf32> to vector<8x256xf32>
    %72 = arith.addf %70, %71 : vector<8x256xf32>
    %73 = arith.negf %72 : vector<8x256xf32>
    %74 = math.exp %73 : vector<8x256xf32>
    %cst_23 = arith.constant 1.000000e+00 : f32
    %75 = vector.broadcast %cst_23 : f32 to vector<8x256xf32>
    %76 = arith.addf %75, %74 : vector<8x256xf32>
    %77 = arith.divf %75, %76 : vector<8x256xf32>
    %78 = vector.extract_strided_slice %77 {offsets = [0, 0], sizes = [8, 128], strides = [1, 1]} : vector<8x256xf32> to vector<8x128xf32>
    %79 = vector.extract_strided_slice %77 {offsets = [0, 128], sizes = [8, 128], strides = [1, 1]} : vector<8x256xf32> to vector<8x128xf32>
    %80 = vector.extract_strided_slice %69 {offsets = [0, 256], sizes = [8, 128], strides = [1, 1]} : vector<8x384xf32> to vector<8x128xf32>
    %81 = vector.extract_strided_slice %67 {offsets = [0, 256], sizes = [8, 128], strides = [1, 1]} : vector<8x384xf32> to vector<8x128xf32>
    %82 = arith.addf %81, %11 : vector<8x128xf32>
    %83 = arith.mulf %78, %82 : vector<8x128xf32>
    %84 = arith.addf %80, %83 : vector<8x128xf32>
    %85 = math.tanh %84 : vector<8x128xf32>
    %cst_24 = arith.constant 1.000000e+00 : f32
    %86 = vector.broadcast %cst_24 : f32 to vector<8x128xf32>
    %87 = arith.subf %86, %79 : vector<8x128xf32>
    %88 = arith.mulf %87, %85 : vector<8x128xf32>
    %89 = arith.mulf %79, %63 : vector<8x128xf32>
    %90 = arith.addf %88, %89 : vector<8x128xf32>
    %c2 = arith.constant 2 : index
    %c0_25 = arith.constant 0 : index
    %c0_26 = arith.constant 0 : index
    %91 = vector.load %arg17[%c2, %c0_25, %c0_26] : memref<8x8x128xf32, #tpu.memory_space<vmem>>, vector<1x8x128xf32>
    %92 = vector.shape_cast %91 : vector<1x8x128xf32> to vector<8x128xf32>
    %93 = vector.shape_cast %90 : vector<8x128xf32> to vector<1x8x128xf32>
    tpu.vector_store %arg17[%c2, %c0_25, %c0_26], %93 {strides = array<i32>} : memref<8x8x128xf32, #tpu.memory_space<vmem>>, vector<1x8x128xf32>,
    %cst_27 = arith.constant dense<0.000000e+00> : vector<8x384xf32>
    %94 = tpu.matmul %90, %8, %cst_27 {dimension_numbers = #tpu.dot_dimension_numbers<[1], [0], [0], [1], [0, 0, 1, 1], [], []>} : vector<8x128xf32>, vector<128x384xf32>, vector<8x384xf32> -> vector<8x384xf32>
    %95 = vector.extract_strided_slice %7 {offsets = [3, 0, 0], sizes = [1, 8, 384], strides = [1, 1, 1]} : vector<8x8x384xf32> to vector<1x8x384xf32>
    %96 = vector.shape_cast %95 : vector<1x8x384xf32> to vector<8x384xf32>
    %97 = vector.extract_strided_slice %96 {offsets = [0, 0], sizes = [8, 256], strides = [1, 1]} : vector<8x384xf32> to vector<8x256xf32>
    %98 = vector.extract_strided_slice %94 {offsets = [0, 0], sizes = [8, 256], strides = [1, 1]} : vector<8x384xf32> to vector<8x256xf32>
    %99 = arith.addf %97, %98 : vector<8x256xf32>
    %100 = arith.negf %99 : vector<8x256xf32>
    %101 = math.exp %100 : vector<8x256xf32>
    %cst_28 = arith.constant 1.000000e+00 : f32
    %102 = vector.broadcast %cst_28 : f32 to vector<8x256xf32>
    %103 = arith.addf %102, %101 : vector<8x256xf32>
    %104 = arith.divf %102, %103 : vector<8x256xf32>
    %105 = vector.extract_strided_slice %104 {offsets = [0, 0], sizes = [8, 128], strides = [1, 1]} : vector<8x256xf32> to vector<8x128xf32>
    %106 = vector.extract_strided_slice %104 {offsets = [0, 128], sizes = [8, 128], strides = [1, 1]} : vector<8x256xf32> to vector<8x128xf32>
    %107 = vector.extract_strided_slice %96 {offsets = [0, 256], sizes = [8, 128], strides = [1, 1]} : vector<8x384xf32> to vector<8x128xf32>
    %108 = vector.extract_strided_slice %94 {offsets = [0, 256], sizes = [8, 128], strides = [1, 1]} : vector<8x384xf32> to vector<8x128xf32>
    %109 = arith.addf %108, %11 : vector<8x128xf32>
    %110 = arith.mulf %105, %109 : vector<8x128xf32>
    %111 = arith.addf %107, %110 : vector<8x128xf32>
    %112 = math.tanh %111 : vector<8x128xf32>
    %cst_29 = arith.constant 1.000000e+00 : f32
    %113 = vector.broadcast %cst_29 : f32 to vector<8x128xf32>
    %114 = arith.subf %113, %106 : vector<8x128xf32>
    %115 = arith.mulf %114, %112 : vector<8x128xf32>
    %116 = arith.mulf %106, %90 : vector<8x128xf32>
    %117 = arith.addf %115, %116 : vector<8x128xf32>
    %c3 = arith.constant 3 : index
    %c0_30 = arith.constant 0 : index
    %c0_31 = arith.constant 0 : index
    %118 = vector.load %arg17[%c3, %c0_30, %c0_31] : memref<8x8x128xf32, #tpu.memory_space<vmem>>, vector<1x8x128xf32>
    %119 = vector.shape_cast %118 : vector<1x8x128xf32> to vector<8x128xf32>
    %120 = vector.shape_cast %117 : vector<8x128xf32> to vector<1x8x128xf32>
    tpu.vector_store %arg17[%c3, %c0_30, %c0_31], %120 {strides = array<i32>} : memref<8x8x128xf32, #tpu.memory_space<vmem>>, vector<1x8x128xf32>,
    %cst_32 = arith.constant dense<0.000000e+00> : vector<8x384xf32>
    %121 = tpu.matmul %117, %8, %cst_32 {dimension_numbers = #tpu.dot_dimension_numbers<[1], [0], [0], [1], [0, 0, 1, 1], [], []>} : vector<8x128xf32>, vector<128x384xf32>, vector<8x384xf32> -> vector<8x384xf32>
    %122 = vector.extract_strided_slice %7 {offsets = [4, 0, 0], sizes = [1, 8, 384], strides = [1, 1, 1]} : vector<8x8x384xf32> to vector<1x8x384xf32>
    %123 = vector.shape_cast %122 : vector<1x8x384xf32> to vector<8x384xf32>
    %124 = vector.extract_strided_slice %123 {offsets = [0, 0], sizes = [8, 256], strides = [1, 1]} : vector<8x384xf32> to vector<8x256xf32>
    %125 = vector.extract_strided_slice %121 {offsets = [0, 0], sizes = [8, 256], strides = [1, 1]} : vector<8x384xf32> to vector<8x256xf32>
    %126 = arith.addf %124, %125 : vector<8x256xf32>
    %127 = arith.negf %126 : vector<8x256xf32>
    %128 = math.exp %127 : vector<8x256xf32>
    %cst_33 = arith.constant 1.000000e+00 : f32
    %129 = vector.broadcast %cst_33 : f32 to vector<8x256xf32>
    %130 = arith.addf %129, %128 : vector<8x256xf32>
    %131 = arith.divf %129, %130 : vector<8x256xf32>
    %132 = vector.extract_strided_slice %131 {offsets = [0, 0], sizes = [8, 128], strides = [1, 1]} : vector<8x256xf32> to vector<8x128xf32>
    %133 = vector.extract_strided_slice %131 {offsets = [0, 128], sizes = [8, 128], strides = [1, 1]} : vector<8x256xf32> to vector<8x128xf32>
    %134 = vector.extract_strided_slice %123 {offsets = [0, 256], sizes = [8, 128], strides = [1, 1]} : vector<8x384xf32> to vector<8x128xf32>
    %135 = vector.extract_strided_slice %121 {offsets = [0, 256], sizes = [8, 128], strides = [1, 1]} : vector<8x384xf32> to vector<8x128xf32>
    %136 = arith.addf %135, %11 : vector<8x128xf32>
    %137 = arith.mulf %132, %136 : vector<8x128xf32>
    %138 = arith.addf %134, %137 : vector<8x128xf32>
    %139 = math.tanh %138 : vector<8x128xf32>
    %cst_34 = arith.constant 1.000000e+00 : f32
    %140 = vector.broadcast %cst_34 : f32 to vector<8x128xf32>
    %141 = arith.subf %140, %133 : vector<8x128xf32>
    %142 = arith.mulf %141, %139 : vector<8x128xf32>
    %143 = arith.mulf %133, %117 : vector<8x128xf32>
    %144 = arith.addf %142, %143 : vector<8x128xf32>
    %c4 = arith.constant 4 : index
    %c0_35 = arith.constant 0 : index
    %c0_36 = arith.constant 0 : index
    %145 = vector.load %arg17[%c4, %c0_35, %c0_36] : memref<8x8x128xf32, #tpu.memory_space<vmem>>, vector<1x8x128xf32>
    %146 = vector.shape_cast %145 : vector<1x8x128xf32> to vector<8x128xf32>
    %147 = vector.shape_cast %144 : vector<8x128xf32> to vector<1x8x128xf32>
    tpu.vector_store %arg17[%c4, %c0_35, %c0_36], %147 {strides = array<i32>} : memref<8x8x128xf32, #tpu.memory_space<vmem>>, vector<1x8x128xf32>,
    %cst_37 = arith.constant dense<0.000000e+00> : vector<8x384xf32>
    %148 = tpu.matmul %144, %8, %cst_37 {dimension_numbers = #tpu.dot_dimension_numbers<[1], [0], [0], [1], [0, 0, 1, 1], [], []>} : vector<8x128xf32>, vector<128x384xf32>, vector<8x384xf32> -> vector<8x384xf32>
    %149 = vector.extract_strided_slice %7 {offsets = [5, 0, 0], sizes = [1, 8, 384], strides = [1, 1, 1]} : vector<8x8x384xf32> to vector<1x8x384xf32>
    %150 = vector.shape_cast %149 : vector<1x8x384xf32> to vector<8x384xf32>
    %151 = vector.extract_strided_slice %150 {offsets = [0, 0], sizes = [8, 256], strides = [1, 1]} : vector<8x384xf32> to vector<8x256xf32>
    %152 = vector.extract_strided_slice %148 {offsets = [0, 0], sizes = [8, 256], strides = [1, 1]} : vector<8x384xf32> to vector<8x256xf32>
    %153 = arith.addf %151, %152 : vector<8x256xf32>
    %154 = arith.negf %153 : vector<8x256xf32>
    %155 = math.exp %154 : vector<8x256xf32>
    %cst_38 = arith.constant 1.000000e+00 : f32
    %156 = vector.broadcast %cst_38 : f32 to vector<8x256xf32>
    %157 = arith.addf %156, %155 : vector<8x256xf32>
    %158 = arith.divf %156, %157 : vector<8x256xf32>
    %159 = vector.extract_strided_slice %158 {offsets = [0, 0], sizes = [8, 128], strides = [1, 1]} : vector<8x256xf32> to vector<8x128xf32>
    %160 = vector.extract_strided_slice %158 {offsets = [0, 128], sizes = [8, 128], strides = [1, 1]} : vector<8x256xf32> to vector<8x128xf32>
    %161 = vector.extract_strided_slice %150 {offsets = [0, 256], sizes = [8, 128], strides = [1, 1]} : vector<8x384xf32> to vector<8x128xf32>
    %162 = vector.extract_strided_slice %148 {offsets = [0, 256], sizes = [8, 128], strides = [1, 1]} : vector<8x384xf32> to vector<8x128xf32>
    %163 = arith.addf %162, %11 : vector<8x128xf32>
    %164 = arith.mulf %159, %163 : vector<8x128xf32>
    %165 = arith.addf %161, %164 : vector<8x128xf32>
    %166 = math.tanh %165 : vector<8x128xf32>
    %cst_39 = arith.constant 1.000000e+00 : f32
    %167 = vector.broadcast %cst_39 : f32 to vector<8x128xf32>
    %168 = arith.subf %167, %160 : vector<8x128xf32>
    %169 = arith.mulf %168, %166 : vector<8x128xf32>
    %170 = arith.mulf %160, %144 : vector<8x128xf32>
    %171 = arith.addf %169, %170 : vector<8x128xf32>
    %c5 = arith.constant 5 : index
    %c0_40 = arith.constant 0 : index
    %c0_41 = arith.constant 0 : index
    %172 = vector.load %arg17[%c5, %c0_40, %c0_41] : memref<8x8x128xf32, #tpu.memory_space<vmem>>, vector<1x8x128xf32>
    %173 = vector.shape_cast %172 : vector<1x8x128xf32> to vector<8x128xf32>
    %174 = vector.shape_cast %171 : vector<8x128xf32> to vector<1x8x128xf32>
    tpu.vector_store %arg17[%c5, %c0_40, %c0_41], %174 {strides = array<i32>} : memref<8x8x128xf32, #tpu.memory_space<vmem>>, vector<1x8x128xf32>,
    %cst_42 = arith.constant dense<0.000000e+00> : vector<8x384xf32>
    %175 = tpu.matmul %171, %8, %cst_42 {dimension_numbers = #tpu.dot_dimension_numbers<[1], [0], [0], [1], [0, 0, 1, 1], [], []>} : vector<8x128xf32>, vector<128x384xf32>, vector<8x384xf32> -> vector<8x384xf32>
    %176 = vector.extract_strided_slice %7 {offsets = [6, 0, 0], sizes = [1, 8, 384], strides = [1, 1, 1]} : vector<8x8x384xf32> to vector<1x8x384xf32>
    %177 = vector.shape_cast %176 : vector<1x8x384xf32> to vector<8x384xf32>
    %178 = vector.extract_strided_slice %177 {offsets = [0, 0], sizes = [8, 256], strides = [1, 1]} : vector<8x384xf32> to vector<8x256xf32>
    %179 = vector.extract_strided_slice %175 {offsets = [0, 0], sizes = [8, 256], strides = [1, 1]} : vector<8x384xf32> to vector<8x256xf32>
    %180 = arith.addf %178, %179 : vector<8x256xf32>
    %181 = arith.negf %180 : vector<8x256xf32>
    %182 = math.exp %181 : vector<8x256xf32>
    %cst_43 = arith.constant 1.000000e+00 : f32
    %183 = vector.broadcast %cst_43 : f32 to vector<8x256xf32>
    %184 = arith.addf %183, %182 : vector<8x256xf32>
    %185 = arith.divf %183, %184 : vector<8x256xf32>
    %186 = vector.extract_strided_slice %185 {offsets = [0, 0], sizes = [8, 128], strides = [1, 1]} : vector<8x256xf32> to vector<8x128xf32>
    %187 = vector.extract_strided_slice %185 {offsets = [0, 128], sizes = [8, 128], strides = [1, 1]} : vector<8x256xf32> to vector<8x128xf32>
    %188 = vector.extract_strided_slice %177 {offsets = [0, 256], sizes = [8, 128], strides = [1, 1]} : vector<8x384xf32> to vector<8x128xf32>
    %189 = vector.extract_strided_slice %175 {offsets = [0, 256], sizes = [8, 128], strides = [1, 1]} : vector<8x384xf32> to vector<8x128xf32>
    %190 = arith.addf %189, %11 : vector<8x128xf32>
    %191 = arith.mulf %186, %190 : vector<8x128xf32>
    %192 = arith.addf %188, %191 : vector<8x128xf32>
    %193 = math.tanh %192 : vector<8x128xf32>
    %cst_44 = arith.constant 1.000000e+00 : f32
    %194 = vector.broadcast %cst_44 : f32 to vector<8x128xf32>
    %195 = arith.subf %194, %187 : vector<8x128xf32>
    %196 = arith.mulf %195, %193 : vector<8x128xf32>
    %197 = arith.mulf %187, %171 : vector<8x128xf32>
    %198 = arith.addf %196, %197 : vector<8x128xf32>
    %c6 = arith.constant 6 : index
    %c0_45 = arith.constant 0 : index
    %c0_46 = arith.constant 0 : index
    %199 = vector.load %arg17[%c6, %c0_45, %c0_46] : memref<8x8x128xf32, #tpu.memory_space<vmem>>, vector<1x8x128xf32>
    %200 = vector.shape_cast %199 : vector<1x8x128xf32> to vector<8x128xf32>
    %201 = vector.shape_cast %198 : vector<8x128xf32> to vector<1x8x128xf32>
    tpu.vector_store %arg17[%c6, %c0_45, %c0_46], %201 {strides = array<i32>} : memref<8x8x128xf32, #tpu.memory_space<vmem>>, vector<1x8x128xf32>,
    %cst_47 = arith.constant dense<0.000000e+00> : vector<8x384xf32>
    %202 = tpu.matmul %198, %8, %cst_47 {dimension_numbers = #tpu.dot_dimension_numbers<[1], [0], [0], [1], [0, 0, 1, 1], [], []>} : vector<8x128xf32>, vector<128x384xf32>, vector<8x384xf32> -> vector<8x384xf32>
    %203 = vector.extract_strided_slice %7 {offsets = [7, 0, 0], sizes = [1, 8, 384], strides = [1, 1, 1]} : vector<8x8x384xf32> to vector<1x8x384xf32>
    %204 = vector.shape_cast %203 : vector<1x8x384xf32> to vector<8x384xf32>
    %205 = vector.extract_strided_slice %204 {offsets = [0, 0], sizes = [8, 256], strides = [1, 1]} : vector<8x384xf32> to vector<8x256xf32>
    %206 = vector.extract_strided_slice %202 {offsets = [0, 0], sizes = [8, 256], strides = [1, 1]} : vector<8x384xf32> to vector<8x256xf32>
    %207 = arith.addf %205, %206 : vector<8x256xf32>
    %208 = arith.negf %207 : vector<8x256xf32>
    %209 = math.exp %208 : vector<8x256xf32>
    %cst_48 = arith.constant 1.000000e+00 : f32
    %210 = vector.broadcast %cst_48 : f32 to vector<8x256xf32>
    %211 = arith.addf %210, %209 : vector<8x256xf32>
    %212 = arith.divf %210, %211 : vector<8x256xf32>
    %213 = vector.extract_strided_slice %212 {offsets = [0, 0], sizes = [8, 128], strides = [1, 1]} : vector<8x256xf32> to vector<8x128xf32>
    %214 = vector.extract_strided_slice %212 {offsets = [0, 128], sizes = [8, 128], strides = [1, 1]} : vector<8x256xf32> to vector<8x128xf32>
    %215 = vector.extract_strided_slice %204 {offsets = [0, 256], sizes = [8, 128], strides = [1, 1]} : vector<8x384xf32> to vector<8x128xf32>
    %216 = vector.extract_strided_slice %202 {offsets = [0, 256], sizes = [8, 128], strides = [1, 1]} : vector<8x384xf32> to vector<8x128xf32>
    %217 = arith.addf %216, %11 : vector<8x128xf32>
    %218 = arith.mulf %213, %217 : vector<8x128xf32>
    %219 = arith.addf %215, %218 : vector<8x128xf32>
    %220 = math.tanh %219 : vector<8x128xf32>
    %cst_49 = arith.constant 1.000000e+00 : f32
    %221 = vector.broadcast %cst_49 : f32 to vector<8x128xf32>
    %222 = arith.subf %221, %214 : vector<8x128xf32>
    %223 = arith.mulf %222, %220 : vector<8x128xf32>
    %224 = arith.mulf %214, %198 : vector<8x128xf32>
    %225 = arith.addf %223, %224 : vector<8x128xf32>
    %c7 = arith.constant 7 : index
    %c0_50 = arith.constant 0 : index
    %c0_51 = arith.constant 0 : index
    %226 = vector.load %arg17[%c7, %c0_50, %c0_51] : memref<8x8x128xf32, #tpu.memory_space<vmem>>, vector<1x8x128xf32>
    %227 = vector.shape_cast %226 : vector<1x8x128xf32> to vector<8x128xf32>
    %228 = vector.shape_cast %225 : vector<8x128xf32> to vector<1x8x128xf32>
    tpu.vector_store %arg17[%c7, %c0_50, %c0_51], %228 {strides = array<i32>} : memref<8x8x128xf32, #tpu.memory_space<vmem>>, vector<1x8x128xf32>,
    %c0_52 = arith.constant 0 : index
    %c0_53 = arith.constant 0 : index
    %c0_54 = arith.constant 0 : index
    %229 = vector.load %arg17[%c0_52, %c0_53, %c0_54] : memref<8x8x128xf32, #tpu.memory_space<vmem>>, vector<8x8x128xf32>
    %230 = vector.shape_cast %229 : vector<8x8x128xf32> to vector<64x128xf32>
    %c0_55 = arith.constant 0 : index
    %c0_56 = arith.constant 0 : index
    %231 = vector.load %arg6[%c0_55, %c0_56] : memref<128x384xf32, #tpu.memory_space<vmem>>, vector<128x384xf32>
    %cst_57 = arith.constant dense<0.000000e+00> : vector<64x384xf32>
    %232 = tpu.matmul %230, %231, %cst_57 {dimension_numbers = #tpu.dot_dimension_numbers<[1], [0], [0], [1], [0, 0, 1, 1], [], []>} : vector<64x128xf32>, vector<128x384xf32>, vector<64x384xf32> -> vector<64x384xf32>
    %c0_58 = arith.constant 0 : index
    %c0_59 = arith.constant 0 : index
    %233 = vector.load %arg7[%c0_58, %c0_59] : memref<1x384xf32, #tpu.memory_space<vmem>>, vector<1x384xf32>
    %234 = vector.broadcast %233 : vector<1x384xf32> to vector<64x384xf32>
    %235 = arith.addf %232, %234 : vector<64x384xf32>
    %236 = vector.shape_cast %235 : vector<64x384xf32> to vector<8x8x384xf32>
    %c0_60 = arith.constant 0 : index
    %c0_61 = arith.constant 0 : index
    %237 = vector.load %arg8[%c0_60, %c0_61] : memref<128x384xf32, #tpu.memory_space<vmem>>, vector<128x384xf32>
    %c0_62 = arith.constant 0 : index
    %c0_63 = arith.constant 0 : index
    %238 = vector.load %arg9[%c0_62, %c0_63] : memref<1x128xf32, #tpu.memory_space<vmem>>, vector<1x128xf32>
    %239 = vector.shape_cast %238 : vector<1x128xf32> to vector<1x128xf32>
    %240 = vector.broadcast %239 : vector<1x128xf32> to vector<8x128xf32>
    %cst_64 = arith.constant 0.000000e+00 : f32
    %241 = vector.broadcast %cst_64 : f32 to vector<8x128xf32>
    %cst_65 = arith.constant dense<0.000000e+00> : vector<8x384xf32>
    %242 = tpu.matmul %241, %237, %cst_65 {dimension_numbers = #tpu.dot_dimension_numbers<[1], [0], [0], [1], [0, 0, 1, 1], [], []>} : vector<8x128xf32>, vector<128x384xf32>, vector<8x384xf32> -> vector<8x384xf32>
    %243 = vector.extract_strided_slice %236 {offsets = [0, 0, 0], sizes = [1, 8, 384], strides = [1, 1, 1]} : vector<8x8x384xf32> to vector<1x8x384xf32>
    %244 = vector.shape_cast %243 : vector<1x8x384xf32> to vector<8x384xf32>
    %245 = vector.extract_strided_slice %244 {offsets = [0, 0], sizes = [8, 256], strides = [1, 1]} : vector<8x384xf32> to vector<8x256xf32>
    %246 = vector.extract_strided_slice %242 {offsets = [0, 0], sizes = [8, 256], strides = [1, 1]} : vector<8x384xf32> to vector<8x256xf32>
    %247 = arith.addf %245, %246 : vector<8x256xf32>
    %248 = arith.negf %247 : vector<8x256xf32>
    %249 = math.exp %248 : vector<8x256xf32>
    %cst_66 = arith.constant 1.000000e+00 : f32
    %250 = vector.broadcast %cst_66 : f32 to vector<8x256xf32>
    %251 = arith.addf %250, %249 : vector<8x256xf32>
    %252 = arith.divf %250, %251 : vector<8x256xf32>
    %253 = vector.extract_strided_slice %252 {offsets = [0, 0], sizes = [8, 128], strides = [1, 1]} : vector<8x256xf32> to vector<8x128xf32>
    %254 = vector.extract_strided_slice %252 {offsets = [0, 128], sizes = [8, 128], strides = [1, 1]} : vector<8x256xf32> to vector<8x128xf32>
    %255 = vector.extract_strided_slice %244 {offsets = [0, 256], sizes = [8, 128], strides = [1, 1]} : vector<8x384xf32> to vector<8x128xf32>
    %256 = vector.extract_strided_slice %242 {offsets = [0, 256], sizes = [8, 128], strides = [1, 1]} : vector<8x384xf32> to vector<8x128xf32>
    %257 = arith.addf %256, %240 : vector<8x128xf32>
    %258 = arith.mulf %253, %257 : vector<8x128xf32>
    %259 = arith.addf %255, %258 : vector<8x128xf32>
    %260 = math.tanh %259 : vector<8x128xf32>
    %cst_67 = arith.constant 1.000000e+00 : f32
    %261 = vector.broadcast %cst_67 : f32 to vector<8x128xf32>
    %262 = arith.subf %261, %254 : vector<8x128xf32>
    %263 = arith.mulf %262, %260 : vector<8x128xf32>
    %264 = arith.mulf %254, %241 : vector<8x128xf32>
    %265 = arith.addf %263, %264 : vector<8x128xf32>
    %cst_68 = arith.constant dense<0.000000e+00> : vector<8x384xf32>
    %266 = tpu.matmul %265, %237, %cst_68 {dimension_numbers = #tpu.dot_dimension_numbers<[1], [0], [0], [1], [0, 0, 1, 1], [], []>} : vector<8x128xf32>, vector<128x384xf32>, vector<8x384xf32> -> vector<8x384xf32>
    %267 = vector.extract_strided_slice %236 {offsets = [1, 0, 0], sizes = [1, 8, 384], strides = [1, 1, 1]} : vector<8x8x384xf32> to vector<1x8x384xf32>
    %268 = vector.shape_cast %267 : vector<1x8x384xf32> to vector<8x384xf32>
    %269 = vector.extract_strided_slice %268 {offsets = [0, 0], sizes = [8, 256], strides = [1, 1]} : vector<8x384xf32> to vector<8x256xf32>
    %270 = vector.extract_strided_slice %266 {offsets = [0, 0], sizes = [8, 256], strides = [1, 1]} : vector<8x384xf32> to vector<8x256xf32>
    %271 = arith.addf %269, %270 : vector<8x256xf32>
    %272 = arith.negf %271 : vector<8x256xf32>
    %273 = math.exp %272 : vector<8x256xf32>
    %cst_69 = arith.constant 1.000000e+00 : f32
    %274 = vector.broadcast %cst_69 : f32 to vector<8x256xf32>
    %275 = arith.addf %274, %273 : vector<8x256xf32>
    %276 = arith.divf %274, %275 : vector<8x256xf32>
    %277 = vector.extract_strided_slice %276 {offsets = [0, 0], sizes = [8, 128], strides = [1, 1]} : vector<8x256xf32> to vector<8x128xf32>
    %278 = vector.extract_strided_slice %276 {offsets = [0, 128], sizes = [8, 128], strides = [1, 1]} : vector<8x256xf32> to vector<8x128xf32>
    %279 = vector.extract_strided_slice %268 {offsets = [0, 256], sizes = [8, 128], strides = [1, 1]} : vector<8x384xf32> to vector<8x128xf32>
    %280 = vector.extract_strided_slice %266 {offsets = [0, 256], sizes = [8, 128], strides = [1, 1]} : vector<8x384xf32> to vector<8x128xf32>
    %281 = arith.addf %280, %240 : vector<8x128xf32>
    %282 = arith.mulf %277, %281 : vector<8x128xf32>
    %283 = arith.addf %279, %282 : vector<8x128xf32>
    %284 = math.tanh %283 : vector<8x128xf32>
    %cst_70 = arith.constant 1.000000e+00 : f32
    %285 = vector.broadcast %cst_70 : f32 to vector<8x128xf32>
    %286 = arith.subf %285, %278 : vector<8x128xf32>
    %287 = arith.mulf %286, %284 : vector<8x128xf32>
    %288 = arith.mulf %278, %265 : vector<8x128xf32>
    %289 = arith.addf %287, %288 : vector<8x128xf32>
    %cst_71 = arith.constant dense<0.000000e+00> : vector<8x384xf32>
    %290 = tpu.matmul %289, %237, %cst_71 {dimension_numbers = #tpu.dot_dimension_numbers<[1], [0], [0], [1], [0, 0, 1, 1], [], []>} : vector<8x128xf32>, vector<128x384xf32>, vector<8x384xf32> -> vector<8x384xf32>
    %291 = vector.extract_strided_slice %236 {offsets = [2, 0, 0], sizes = [1, 8, 384], strides = [1, 1, 1]} : vector<8x8x384xf32> to vector<1x8x384xf32>
    %292 = vector.shape_cast %291 : vector<1x8x384xf32> to vector<8x384xf32>
    %293 = vector.extract_strided_slice %292 {offsets = [0, 0], sizes = [8, 256], strides = [1, 1]} : vector<8x384xf32> to vector<8x256xf32>
    %294 = vector.extract_strided_slice %290 {offsets = [0, 0], sizes = [8, 256], strides = [1, 1]} : vector<8x384xf32> to vector<8x256xf32>
    %295 = arith.addf %293, %294 : vector<8x256xf32>
    %296 = arith.negf %295 : vector<8x256xf32>
    %297 = math.exp %296 : vector<8x256xf32>
    %cst_72 = arith.constant 1.000000e+00 : f32
    %298 = vector.broadcast %cst_72 : f32 to vector<8x256xf32>
    %299 = arith.addf %298, %297 : vector<8x256xf32>
    %300 = arith.divf %298, %299 : vector<8x256xf32>
    %301 = vector.extract_strided_slice %300 {offsets = [0, 0], sizes = [8, 128], strides = [1, 1]} : vector<8x256xf32> to vector<8x128xf32>
    %302 = vector.extract_strided_slice %300 {offsets = [0, 128], sizes = [8, 128], strides = [1, 1]} : vector<8x256xf32> to vector<8x128xf32>
    %303 = vector.extract_strided_slice %292 {offsets = [0, 256], sizes = [8, 128], strides = [1, 1]} : vector<8x384xf32> to vector<8x128xf32>
    %304 = vector.extract_strided_slice %290 {offsets = [0, 256], sizes = [8, 128], strides = [1, 1]} : vector<8x384xf32> to vector<8x128xf32>
    %305 = arith.addf %304, %240 : vector<8x128xf32>
    %306 = arith.mulf %301, %305 : vector<8x128xf32>
    %307 = arith.addf %303, %306 : vector<8x128xf32>
    %308 = math.tanh %307 : vector<8x128xf32>
    %cst_73 = arith.constant 1.000000e+00 : f32
    %309 = vector.broadcast %cst_73 : f32 to vector<8x128xf32>
    %310 = arith.subf %309, %302 : vector<8x128xf32>
    %311 = arith.mulf %310, %308 : vector<8x128xf32>
    %312 = arith.mulf %302, %289 : vector<8x128xf32>
    %313 = arith.addf %311, %312 : vector<8x128xf32>
    %cst_74 = arith.constant dense<0.000000e+00> : vector<8x384xf32>
    %314 = tpu.matmul %313, %237, %cst_74 {dimension_numbers = #tpu.dot_dimension_numbers<[1], [0], [0], [1], [0, 0, 1, 1], [], []>} : vector<8x128xf32>, vector<128x384xf32>, vector<8x384xf32> -> vector<8x384xf32>
    %315 = vector.extract_strided_slice %236 {offsets = [3, 0, 0], sizes = [1, 8, 384], strides = [1, 1, 1]} : vector<8x8x384xf32> to vector<1x8x384xf32>
    %316 = vector.shape_cast %315 : vector<1x8x384xf32> to vector<8x384xf32>
    %317 = vector.extract_strided_slice %316 {offsets = [0, 0], sizes = [8, 256], strides = [1, 1]} : vector<8x384xf32> to vector<8x256xf32>
    %318 = vector.extract_strided_slice %314 {offsets = [0, 0], sizes = [8, 256], strides = [1, 1]} : vector<8x384xf32> to vector<8x256xf32>
    %319 = arith.addf %317, %318 : vector<8x256xf32>
    %320 = arith.negf %319 : vector<8x256xf32>
    %321 = math.exp %320 : vector<8x256xf32>
    %cst_75 = arith.constant 1.000000e+00 : f32
    %322 = vector.broadcast %cst_75 : f32 to vector<8x256xf32>
    %323 = arith.addf %322, %321 : vector<8x256xf32>
    %324 = arith.divf %322, %323 : vector<8x256xf32>
    %325 = vector.extract_strided_slice %324 {offsets = [0, 0], sizes = [8, 128], strides = [1, 1]} : vector<8x256xf32> to vector<8x128xf32>
    %326 = vector.extract_strided_slice %324 {offsets = [0, 128], sizes = [8, 128], strides = [1, 1]} : vector<8x256xf32> to vector<8x128xf32>
    %327 = vector.extract_strided_slice %316 {offsets = [0, 256], sizes = [8, 128], strides = [1, 1]} : vector<8x384xf32> to vector<8x128xf32>
    %328 = vector.extract_strided_slice %314 {offsets = [0, 256], sizes = [8, 128], strides = [1, 1]} : vector<8x384xf32> to vector<8x128xf32>
    %329 = arith.addf %328, %240 : vector<8x128xf32>
    %330 = arith.mulf %325, %329 : vector<8x128xf32>
    %331 = arith.addf %327, %330 : vector<8x128xf32>
    %332 = math.tanh %331 : vector<8x128xf32>
    %cst_76 = arith.constant 1.000000e+00 : f32
    %333 = vector.broadcast %cst_76 : f32 to vector<8x128xf32>
    %334 = arith.subf %333, %326 : vector<8x128xf32>
    %335 = arith.mulf %334, %332 : vector<8x128xf32>
    %336 = arith.mulf %326, %313 : vector<8x128xf32>
    %337 = arith.addf %335, %336 : vector<8x128xf32>
    %cst_77 = arith.constant dense<0.000000e+00> : vector<8x384xf32>
    %338 = tpu.matmul %337, %237, %cst_77 {dimension_numbers = #tpu.dot_dimension_numbers<[1], [0], [0], [1], [0, 0, 1, 1], [], []>} : vector<8x128xf32>, vector<128x384xf32>, vector<8x384xf32> -> vector<8x384xf32>
    %339 = vector.extract_strided_slice %236 {offsets = [4, 0, 0], sizes = [1, 8, 384], strides = [1, 1, 1]} : vector<8x8x384xf32> to vector<1x8x384xf32>
    %340 = vector.shape_cast %339 : vector<1x8x384xf32> to vector<8x384xf32>
    %341 = vector.extract_strided_slice %340 {offsets = [0, 0], sizes = [8, 256], strides = [1, 1]} : vector<8x384xf32> to vector<8x256xf32>
    %342 = vector.extract_strided_slice %338 {offsets = [0, 0], sizes = [8, 256], strides = [1, 1]} : vector<8x384xf32> to vector<8x256xf32>
    %343 = arith.addf %341, %342 : vector<8x256xf32>
    %344 = arith.negf %343 : vector<8x256xf32>
    %345 = math.exp %344 : vector<8x256xf32>
    %cst_78 = arith.constant 1.000000e+00 : f32
    %346 = vector.broadcast %cst_78 : f32 to vector<8x256xf32>
    %347 = arith.addf %346, %345 : vector<8x256xf32>
    %348 = arith.divf %346, %347 : vector<8x256xf32>
    %349 = vector.extract_strided_slice %348 {offsets = [0, 0], sizes = [8, 128], strides = [1, 1]} : vector<8x256xf32> to vector<8x128xf32>
    %350 = vector.extract_strided_slice %348 {offsets = [0, 128], sizes = [8, 128], strides = [1, 1]} : vector<8x256xf32> to vector<8x128xf32>
    %351 = vector.extract_strided_slice %340 {offsets = [0, 256], sizes = [8, 128], strides = [1, 1]} : vector<8x384xf32> to vector<8x128xf32>
    %352 = vector.extract_strided_slice %338 {offsets = [0, 256], sizes = [8, 128], strides = [1, 1]} : vector<8x384xf32> to vector<8x128xf32>
    %353 = arith.addf %352, %240 : vector<8x128xf32>
    %354 = arith.mulf %349, %353 : vector<8x128xf32>
    %355 = arith.addf %351, %354 : vector<8x128xf32>
    %356 = math.tanh %355 : vector<8x128xf32>
    %cst_79 = arith.constant 1.000000e+00 : f32
    %357 = vector.broadcast %cst_79 : f32 to vector<8x128xf32>
    %358 = arith.subf %357, %350 : vector<8x128xf32>
    %359 = arith.mulf %358, %356 : vector<8x128xf32>
    %360 = arith.mulf %350, %337 : vector<8x128xf32>
    %361 = arith.addf %359, %360 : vector<8x128xf32>
    %cst_80 = arith.constant dense<0.000000e+00> : vector<8x384xf32>
    %362 = tpu.matmul %361, %237, %cst_80 {dimension_numbers = #tpu.dot_dimension_numbers<[1], [0], [0], [1], [0, 0, 1, 1], [], []>} : vector<8x128xf32>, vector<128x384xf32>, vector<8x384xf32> -> vector<8x384xf32>
    %363 = vector.extract_strided_slice %236 {offsets = [5, 0, 0], sizes = [1, 8, 384], strides = [1, 1, 1]} : vector<8x8x384xf32> to vector<1x8x384xf32>
    %364 = vector.shape_cast %363 : vector<1x8x384xf32> to vector<8x384xf32>
    %365 = vector.extract_strided_slice %364 {offsets = [0, 0], sizes = [8, 256], strides = [1, 1]} : vector<8x384xf32> to vector<8x256xf32>
    %366 = vector.extract_strided_slice %362 {offsets = [0, 0], sizes = [8, 256], strides = [1, 1]} : vector<8x384xf32> to vector<8x256xf32>
    %367 = arith.addf %365, %366 : vector<8x256xf32>
    %368 = arith.negf %367 : vector<8x256xf32>
    %369 = math.exp %368 : vector<8x256xf32>
    %cst_81 = arith.constant 1.000000e+00 : f32
    %370 = vector.broadcast %cst_81 : f32 to vector<8x256xf32>
    %371 = arith.addf %370, %369 : vector<8x256xf32>
    %372 = arith.divf %370, %371 : vector<8x256xf32>
    %373 = vector.extract_strided_slice %372 {offsets = [0, 0], sizes = [8, 128], strides = [1, 1]} : vector<8x256xf32> to vector<8x128xf32>
    %374 = vector.extract_strided_slice %372 {offsets = [0, 128], sizes = [8, 128], strides = [1, 1]} : vector<8x256xf32> to vector<8x128xf32>
    %375 = vector.extract_strided_slice %364 {offsets = [0, 256], sizes = [8, 128], strides = [1, 1]} : vector<8x384xf32> to vector<8x128xf32>
    %376 = vector.extract_strided_slice %362 {offsets = [0, 256], sizes = [8, 128], strides = [1, 1]} : vector<8x384xf32> to vector<8x128xf32>
    %377 = arith.addf %376, %240 : vector<8x128xf32>
    %378 = arith.mulf %373, %377 : vector<8x128xf32>
    %379 = arith.addf %375, %378 : vector<8x128xf32>
    %380 = math.tanh %379 : vector<8x128xf32>
    %cst_82 = arith.constant 1.000000e+00 : f32
    %381 = vector.broadcast %cst_82 : f32 to vector<8x128xf32>
    %382 = arith.subf %381, %374 : vector<8x128xf32>
    %383 = arith.mulf %382, %380 : vector<8x128xf32>
    %384 = arith.mulf %374, %361 : vector<8x128xf32>
    %385 = arith.addf %383, %384 : vector<8x128xf32>
    %cst_83 = arith.constant dense<0.000000e+00> : vector<8x384xf32>
    %386 = tpu.matmul %385, %237, %cst_83 {dimension_numbers = #tpu.dot_dimension_numbers<[1], [0], [0], [1], [0, 0, 1, 1], [], []>} : vector<8x128xf32>, vector<128x384xf32>, vector<8x384xf32> -> vector<8x384xf32>
    %387 = vector.extract_strided_slice %236 {offsets = [6, 0, 0], sizes = [1, 8, 384], strides = [1, 1, 1]} : vector<8x8x384xf32> to vector<1x8x384xf32>
    %388 = vector.shape_cast %387 : vector<1x8x384xf32> to vector<8x384xf32>
    %389 = vector.extract_strided_slice %388 {offsets = [0, 0], sizes = [8, 256], strides = [1, 1]} : vector<8x384xf32> to vector<8x256xf32>
    %390 = vector.extract_strided_slice %386 {offsets = [0, 0], sizes = [8, 256], strides = [1, 1]} : vector<8x384xf32> to vector<8x256xf32>
    %391 = arith.addf %389, %390 : vector<8x256xf32>
    %392 = arith.negf %391 : vector<8x256xf32>
    %393 = math.exp %392 : vector<8x256xf32>
    %cst_84 = arith.constant 1.000000e+00 : f32
    %394 = vector.broadcast %cst_84 : f32 to vector<8x256xf32>
    %395 = arith.addf %394, %393 : vector<8x256xf32>
    %396 = arith.divf %394, %395 : vector<8x256xf32>
    %397 = vector.extract_strided_slice %396 {offsets = [0, 0], sizes = [8, 128], strides = [1, 1]} : vector<8x256xf32> to vector<8x128xf32>
    %398 = vector.extract_strided_slice %396 {offsets = [0, 128], sizes = [8, 128], strides = [1, 1]} : vector<8x256xf32> to vector<8x128xf32>
    %399 = vector.extract_strided_slice %388 {offsets = [0, 256], sizes = [8, 128], strides = [1, 1]} : vector<8x384xf32> to vector<8x128xf32>
    %400 = vector.extract_strided_slice %386 {offsets = [0, 256], sizes = [8, 128], strides = [1, 1]} : vector<8x384xf32> to vector<8x128xf32>
    %401 = arith.addf %400, %240 : vector<8x128xf32>
    %402 = arith.mulf %397, %401 : vector<8x128xf32>
    %403 = arith.addf %399, %402 : vector<8x128xf32>
    %404 = math.tanh %403 : vector<8x128xf32>
    %cst_85 = arith.constant 1.000000e+00 : f32
    %405 = vector.broadcast %cst_85 : f32 to vector<8x128xf32>
    %406 = arith.subf %405, %398 : vector<8x128xf32>
    %407 = arith.mulf %406, %404 : vector<8x128xf32>
    %408 = arith.mulf %398, %385 : vector<8x128xf32>
    %409 = arith.addf %407, %408 : vector<8x128xf32>
    %cst_86 = arith.constant dense<0.000000e+00> : vector<8x384xf32>
    %410 = tpu.matmul %409, %237, %cst_86 {dimension_numbers = #tpu.dot_dimension_numbers<[1], [0], [0], [1], [0, 0, 1, 1], [], []>} : vector<8x128xf32>, vector<128x384xf32>, vector<8x384xf32> -> vector<8x384xf32>
    %411 = vector.extract_strided_slice %236 {offsets = [7, 0, 0], sizes = [1, 8, 384], strides = [1, 1, 1]} : vector<8x8x384xf32> to vector<1x8x384xf32>
    %412 = vector.shape_cast %411 : vector<1x8x384xf32> to vector<8x384xf32>
    %413 = vector.extract_strided_slice %412 {offsets = [0, 0], sizes = [8, 256], strides = [1, 1]} : vector<8x384xf32> to vector<8x256xf32>
    %414 = vector.extract_strided_slice %410 {offsets = [0, 0], sizes = [8, 256], strides = [1, 1]} : vector<8x384xf32> to vector<8x256xf32>
    %415 = arith.addf %413, %414 : vector<8x256xf32>
    %416 = arith.negf %415 : vector<8x256xf32>
    %417 = math.exp %416 : vector<8x256xf32>
    %cst_87 = arith.constant 1.000000e+00 : f32
    %418 = vector.broadcast %cst_87 : f32 to vector<8x256xf32>
    %419 = arith.addf %418, %417 : vector<8x256xf32>
    %420 = arith.divf %418, %419 : vector<8x256xf32>
    %421 = vector.extract_strided_slice %420 {offsets = [0, 0], sizes = [8, 128], strides = [1, 1]} : vector<8x256xf32> to vector<8x128xf32>
    %422 = vector.extract_strided_slice %420 {offsets = [0, 128], sizes = [8, 128], strides = [1, 1]} : vector<8x256xf32> to vector<8x128xf32>
    %423 = vector.extract_strided_slice %412 {offsets = [0, 256], sizes = [8, 128], strides = [1, 1]} : vector<8x384xf32> to vector<8x128xf32>
    %424 = vector.extract_strided_slice %410 {offsets = [0, 256], sizes = [8, 128], strides = [1, 1]} : vector<8x384xf32> to vector<8x128xf32>
    %425 = arith.addf %424, %240 : vector<8x128xf32>
    %426 = arith.mulf %421, %425 : vector<8x128xf32>
    %427 = arith.addf %423, %426 : vector<8x128xf32>
    %428 = math.tanh %427 : vector<8x128xf32>
    %cst_88 = arith.constant 1.000000e+00 : f32
    %429 = vector.broadcast %cst_88 : f32 to vector<8x128xf32>
    %430 = arith.subf %429, %422 : vector<8x128xf32>
    %431 = arith.mulf %430, %428 : vector<8x128xf32>
    %432 = arith.mulf %422, %409 : vector<8x128xf32>
    %433 = arith.addf %431, %432 : vector<8x128xf32>
    %c0_89 = arith.constant 0 : index
    %c0_90 = arith.constant 0 : index
    %434 = vector.load %arg10[%c0_89, %c0_90] : memref<128x128xf32, #tpu.memory_space<vmem>>, vector<128x128xf32>
    %cst_91 = arith.constant dense<0.000000e+00> : vector<8x128xf32>
    %435 = tpu.matmul %433, %434, %cst_91 {dimension_numbers = #tpu.dot_dimension_numbers<[1], [0], [0], [1], [0, 0, 1, 1], [], []>} : vector<8x128xf32>, vector<128x128xf32>, vector<8x128xf32> -> vector<8x128xf32>
    %c0_92 = arith.constant 0 : index
    %c0_93 = arith.constant 0 : index
    %436 = vector.load %arg11[%c0_92, %c0_93] : memref<1x128xf32, #tpu.memory_space<vmem>>, vector<1x128xf32>
    %437 = vector.broadcast %436 : vector<1x128xf32> to vector<8x128xf32>
    %438 = arith.addf %435, %437 : vector<8x128xf32>
    %cst_94 = arith.constant 0.000000e+00 : f32
    %439 = vector.broadcast %cst_94 : f32 to vector<8x128xf32>
    %440 = arith.maximumf %438, %439 : vector<8x128xf32>
    %c0_95 = arith.constant 0 : index
    %c0_96 = arith.constant 0 : index
    %441 = vector.load %arg12[%c0_95, %c0_96] : memref<128x256xf32, #tpu.memory_space<vmem>>, vector<128x256xf32>
    %cst_97 = arith.constant dense<0.000000e+00> : vector<8x256xf32>
    %442 = tpu.matmul %440, %441, %cst_97 {dimension_numbers = #tpu.dot_dimension_numbers<[1], [0], [0], [1], [0, 0, 1, 1], [], []>} : vector<8x128xf32>, vector<128x256xf32>, vector<8x256xf32> -> vector<8x256xf32>
    %c0_98 = arith.constant 0 : index
    %c0_99 = arith.constant 0 : index
    %443 = vector.load %arg13[%c0_98, %c0_99] : memref<1x256xf32, #tpu.memory_space<vmem>>, vector<1x256xf32>
    %444 = vector.broadcast %443 : vector<1x256xf32> to vector<8x256xf32>
    %445 = arith.addf %442, %444 : vector<8x256xf32>
    %cst_100 = arith.constant 0.000000e+00 : f32
    %446 = vector.broadcast %cst_100 : f32 to vector<8x256xf32>
    %447 = arith.maximumf %445, %446 : vector<8x256xf32>
    %c0_101 = arith.constant 0 : index
    %c0_102 = arith.constant 0 : index
    %448 = vector.load %arg14[%c0_101, %c0_102] : memref<256x128xf32, #tpu.memory_space<vmem>>, vector<256x128xf32>
    %cst_103 = arith.constant dense<0.000000e+00> : vector<8x128xf32>
    %449 = tpu.matmul %447, %448, %cst_103 {dimension_numbers = #tpu.dot_dimension_numbers<[1], [0], [0], [1], [0, 0, 1, 1], [], []>} : vector<8x256xf32>, vector<256x128xf32>, vector<8x128xf32> -> vector<8x128xf32>
    %c0_104 = arith.constant 0 : index
    %c0_105 = arith.constant 0 : index
    %450 = vector.load %arg15[%c0_104, %c0_105] : memref<1x128xf32, #tpu.memory_space<vmem>>, vector<1x128xf32>
    %451 = vector.broadcast %450 : vector<1x128xf32> to vector<8x128xf32>
    %452 = arith.addf %449, %451 : vector<8x128xf32>
    %c0_106 = arith.constant 0 : index
    %c0_107 = arith.constant 0 : index
    %453 = vector.load %arg16[%c0_106, %c0_107] : memref<8x128xf32, #tpu.memory_space<vmem>>, vector<8x128xf32>
    tpu.vector_store %arg16[%c0_106, %c0_107], %452 {strides = array<i32>} : memref<8x128xf32, #tpu.memory_space<vmem>>, vector<8x128xf32>,
    return
  }
  func.func @transform_0(%arg0: i32) -> (i32, i32, i32) {
    %c0_i32 = arith.constant 0 : i32
    %c0_i32_0 = arith.constant 0 : i32
    %c0_i32_1 = arith.constant 0 : i32
    return %c0_i32, %arg0, %c0_i32_0 : i32, i32, i32
  }
  func.func @transform_1(%arg0: i32) -> (i32, i32) {
    %c0_i32 = arith.constant 0 : i32
    %c0_i32_0 = arith.constant 0 : i32
    %c0_i32_1 = arith.constant 0 : i32
    return %c0_i32, %c0_i32_0 : i32, i32
  }
  func.func @transform_2(%arg0: i32) -> (i32, i32) {
    %c0_i32 = arith.constant 0 : i32
    %c0_i32_0 = arith.constant 0 : i32
    %c0_i32_1 = arith.constant 0 : i32
    return %c0_i32, %c0_i32_0 : i32, i32
  }
  func.func @transform_3(%arg0: i32) -> (i32, i32) {
    %c0_i32 = arith.constant 0 : i32
    %c0_i32_0 = arith.constant 0 : i32
    %c0_i32_1 = arith.constant 0 : i32
    return %c0_i32, %c0_i32_0 : i32, i32
  }
  func.func @transform_4(%arg0: i32) -> (i32, i32) {
    %c0_i32 = arith.constant 0 : i32
    %c0_i32_0 = arith.constant 0 : i32
    %c0_i32_1 = arith.constant 0 : i32
    return %c0_i32, %c0_i32_0 : i32, i32
  }
  func.func @transform_5(%arg0: i32) -> (i32, i32) {
    %c0_i32 = arith.constant 0 : i32
    %c0_i32_0 = arith.constant 0 : i32
    %c0_i32_1 = arith.constant 0 : i32
    return %c0_i32, %c0_i32_0 : i32, i32
  }
  func.func @transform_6(%arg0: i32) -> (i32, i32) {
    %c0_i32 = arith.constant 0 : i32
    %c0_i32_0 = arith.constant 0 : i32
    %c0_i32_1 = arith.constant 0 : i32
    return %c0_i32, %c0_i32_0 : i32, i32
  }
  func.func @transform_7(%arg0: i32) -> (i32, i32) {
    %c0_i32 = arith.constant 0 : i32
    %c0_i32_0 = arith.constant 0 : i32
    %c0_i32_1 = arith.constant 0 : i32
    return %c0_i32, %c0_i32_0 : i32, i32
  }
  func.func @transform_8(%arg0: i32) -> (i32, i32) {
    %c0_i32 = arith.constant 0 : i32
    %c0_i32_0 = arith.constant 0 : i32
    %c0_i32_1 = arith.constant 0 : i32
    return %c0_i32, %c0_i32_0 : i32, i32
  }
  func.func @transform_9(%arg0: i32) -> (i32, i32) {
    %c0_i32 = arith.constant 0 : i32
    %c0_i32_0 = arith.constant 0 : i32
    %c0_i32_1 = arith.constant 0 : i32
    return %c0_i32, %c0_i32_0 : i32, i32
  }
  func.func @transform_10(%arg0: i32) -> (i32, i32) {
    %c0_i32 = arith.constant 0 : i32
    %c0_i32_0 = arith.constant 0 : i32
    %c0_i32_1 = arith.constant 0 : i32
    return %c0_i32, %c0_i32_0 : i32, i32
  }
  func.func @transform_11(%arg0: i32) -> (i32, i32) {
    %c0_i32 = arith.constant 0 : i32
    %c0_i32_0 = arith.constant 0 : i32
    %c0_i32_1 = arith.constant 0 : i32
    return %c0_i32, %c0_i32_0 : i32, i32
  }
  func.func @transform_12(%arg0: i32) -> (i32, i32) {
    %c0_i32 = arith.constant 0 : i32
    %c0_i32_0 = arith.constant 0 : i32
    %c0_i32_1 = arith.constant 0 : i32
    return %c0_i32, %c0_i32_0 : i32, i32
  }
  func.func @transform_13(%arg0: i32) -> (i32, i32) {
    %c0_i32 = arith.constant 0 : i32
    %c0_i32_0 = arith.constant 0 : i32
    %c0_i32_1 = arith.constant 0 : i32
    return %c0_i32, %c0_i32_0 : i32, i32
  }
  func.func @transform_14(%arg0: i32) -> (i32, i32) {
    %c0_i32 = arith.constant 0 : i32
    %c0_i32_0 = arith.constant 0 : i32
    %c0_i32_1 = arith.constant 0 : i32
    return %c0_i32, %c0_i32_0 : i32, i32
  }
  func.func @transform_15(%arg0: i32) -> (i32, i32) {
    %c0_i32 = arith.constant 0 : i32
    %c0_i32_0 = arith.constant 0 : i32
    return %arg0, %c0_i32 : i32, i32
  }
}

</mosaic_0001>

<bundles_post_ra>
// kernel: tpu_custom_call.1
= control target key start
LH: loop header
LB: loop body
LE: loop exit
PB: predicated region body
PF: predicated region fallthrough
CT: control target
= control target key end

     0   :  { %20 = vsyncpa [#allocation4], 0  ;;  %s7555_s0 = inlined_call_operand.hbm [shape: f32[8,8,16], index: 0, kind: input, shape index: {}]   ;;  %s7556_s1 = inlined_call_operand.hbm [shape: f32[16,384], index: 1, kind: input, shape index: {}]   ;;  %s7557_s2 = inlined_call_operand.vmem [shape: f32[1,384], index: 2, kind: input, shape index: {}]   ;;  %s7558_s3 = inlined_call_operand.hbm [shape: f32[128,384], index: 3, kind: input, shape index: {}]   ;;  %s7559_s4 = inlined_call_operand.vmem [shape: f32[1,128], index: 4, kind: input, shape index: {}]   ;;  %s7560_s5 = inlined_call_operand.hbm [shape: f32[128,384], index: 5, kind: input, shape index: {}]   ;;  %s7561_s6 = inlined_call_operand.vmem [shape: f32[1,384], index: 6, kind: input, shape index: {}]   ;;  %s7562_s7 = inlined_call_operand.hbm [shape: f32[128,384], index: 7, kind: input, shape index: {}]   ;;  %s7563_s8 = inlined_call_operand.vmem [shape: f32[1,128], index: 8, kind: input, shape index: {}]   ;;  %s7564_s9 = inlined_call_operand.hbm [shape: f32[128,128], index: 9, kind: input, shape index: {}]   ;;  %s7565_s10 = inlined_call_operand.vmem [shape: f32[1,128], index: 10, kind: input, shape index: {}]   ;;  %s7566_s11 = inlined_call_operand.hbm [shape: f32[128,256], index: 11, kind: input, shape index: {}]   ;;  %s7567_s12 = inlined_call_operand.vmem [shape: f32[1,256], index: 12, kind: input, shape index: {}]   ;;  %s7568_s13 = inlined_call_operand.hbm [shape: f32[256,128], index: 13, kind: input, shape index: {}]   ;;  %s7569_s14 = inlined_call_operand.vmem [shape: f32[1,128], index: 14, kind: input, shape index: {}]   ;;  %s7570_s15 = inlined_call_operand.hbm [shape: f32[8,128], index: 15, kind: output, shape index: {}]  }
   0x1   :  { %21 = vsyncpa [#allocation7], 0 }
   0x2   :  { %22 = vsyncpa [#allocation10], 0 }
   0x3   :  { %23 = vsyncpa [#allocation13], 0 }
   0x4   :  { %24 = vsyncpa [#allocation16], 0 }
   0x5   :  { %25 = vsyncpa [#allocation5], 0  ;;  %s6373_s18 = smov [#allocation6]   ;;  %s6163_s22 = scalar_lea.hbm %s7556_s1, 768 }
   0x6   :  { %s43_s19 = sshll.u32 %s6373_s18, 4  ;;  %p6164_p0 = scmp.ne.s32.totalorder %s7556_s1, %s6163_s22  ;;  %s44_s19 = int_to_ptr.vmem [resolvable:$true] %s43_s19 }
   0x7   :  { %p6167_p1 = scmp.lt.u32.totalorder %s6163_s22, %s7556_s1 }
   0x9   :  { %p6169_p2 = pnand %p6167_p1, %p6164_p0 }
   0xb   :  { %6172 = shalt.err (!%p6169_p2)
}
   0xc   :  { %s6173_s27 = scalar_lea.vmem %s44_s19, 768  ;;  %p6178_p4 = scmp.lt.s32.totalorder %s44_s19, %s44_s19 }
   0xd   :  { %p6174_p3 = scmp.ne.s32.totalorder %s44_s19, %s6173_s27  ;;  %p6179_p5 = scmp.lt.s32.totalorder %s6173_s27, %s6173_s27 }
   0xf   :  { %p6180_p6 = por %p6179_p5, %p6178_p4 }
  0x11   :  { %p6181_p7 = pnand %p6180_p6, %p6174_p3 }
  0x13   :  { %6184 = shalt.err (!%p6181_p7)
}
  0x14   :  { %s6374_s28 = smov 384   ;;  %s6375_s29 = smov 24  }
  0x15   :  { %49 = dma.hbm_to_vmem [thread:$0]  %s7556_s1, 768, %s44_s19, [#allocation7], %s6374_s28, %s6374_s28, %s6375_s29  }
  0x16   :  { %s6376_s17 = smov [#allocation9]   ;;  %s6185_s22 = scalar_lea.hbm %s7560_s5, 6144 }
  0x17   :  { %s71_s18 = sshll.u32 %s6376_s17, 4  ;;  %p6186_p8 = scmp.ne.s32.totalorder %s7560_s5, %s6185_s22  ;;  %s72_s18 = int_to_ptr.vmem [resolvable:$true] %s71_s18 }
  0x18   :  { %p6189_p9 = scmp.lt.u32.totalorder %s6185_s22, %s7560_s5 }
  0x1a   :  { %p6191_p10 = pnand %p6189_p9, %p6186_p8 }
  0x1c   :  { %6194 = shalt.err (!%p6191_p10)
}
  0x1d   :  { %s6195_s27 = scalar_lea.vmem %s72_s18, 6144  ;;  %p6200_p12 = scmp.lt.s32.totalorder %s72_s18, %s72_s18 }
  0x1e   :  { %p6196_p11 = scmp.ne.s32.totalorder %s72_s18, %s6195_s27  ;;  %p6201_p13 = scmp.lt.s32.totalorder %s6195_s27, %s6195_s27 }
  0x20   :  { %p6202_p0 = por %p6201_p13, %p6200_p12 }
  0x22   :  { %p6203_p1 = pnand %p6202_p0, %p6196_p11 }
  0x24   :  { %6206 = shalt.err (!%p6203_p1)
}
  0x25   :  { %77 = dma.hbm_to_vmem [thread:$0]  %s7560_s5, 6144, %s72_s18, [#allocation10], %s6374_s28, %s6374_s28, %s6375_s29  }
  0x26   :  { %s6377_s30 = smov [#allocation12]   ;;  %s6378_s17 = smov [#allocation3]  }
  0x27   :  { %s99_s16 = sshll.u32 %s6377_s30, 4  ;;  %s31_s20 = sshll.u32 %s6378_s17, 4  ;;  %s100_s16 = int_to_ptr.vmem [resolvable:$true] %s99_s16  ;;  %s6501_s20 = int_to_ptr.vmem [resolvable:$true] %s31_s20 }
  0x28   :  { %s6207_s23 = scalar_lea.hbm %s7564_s9, 2048 }
  0x29   :  { %p6208_p2 = scmp.ne.s32.totalorder %s7564_s9, %s6207_s23  ;;  %p6211_p3 = scmp.lt.u32.totalorder %s6207_s23, %s7564_s9 }
  0x2b   :  { %p6213_p4 = pnand %p6211_p3, %p6208_p2 }
  0x2d   :  { %6216 = shalt.err (!%p6213_p4)
}
  0x2e   :  { %s6217_s5 = scalar_lea.vmem %s100_s16, 2048  ;;  %p6222_p6 = scmp.lt.s32.totalorder %s100_s16, %s100_s16 }
  0x2f   :  { %p6218_p5 = scmp.ne.s32.totalorder %s100_s16, %s6217_s5  ;;  %p6223_p7 = scmp.lt.s32.totalorder %s6217_s5, %s6217_s5 }
  0x31   :  { %p6224_p8 = por %p6223_p7, %p6222_p6 }
  0x33   :  { %p6225_p9 = pnand %p6224_p8, %p6218_p5 }
  0x35   :  { %6228 = shalt.err (!%p6225_p9)
}
  0x36   :  { %s6379_s18 = smov 128   ;;  %s6380_s1 = smov 8  }
  0x37   :  { %105 = dma.hbm_to_vmem [thread:$0]  %s7564_s9, 2048, %s100_s16, [#allocation13], %s6379_s18, %s6379_s18, %s6380_s1  }
  0x38   :  { %s6229_s22 = scalar_lea.hbm %s7555_s0, 1024 }
  0x39   :  { %p6230_p10 = scmp.ne.s32.totalorder %s7555_s0, %s6229_s22  ;;  %p6233_p11 = scmp.lt.u32.totalorder %s6229_s22, %s7555_s0 }
  0x3b   :  { %p6235_p12 = pnand %p6233_p11, %p6230_p10 }
  0x3d   :  { %6238 = shalt.err (!%p6235_p12)
}
  0x3e   :  { %s6239_s27 = scalar_lea.vmem %s6501_s20, 1024  ;;  %p6244_p0 = scmp.lt.s32.totalorder %s6501_s20, %s6501_s20 }
  0x3f   :  { %p6240_p13 = scmp.ne.s32.totalorder %s6501_s20, %s6239_s27  ;;  %p6245_p1 = scmp.lt.s32.totalorder %s6239_s27, %s6239_s27 }
  0x41   :  { %p6246_p2 = por %p6245_p1, %p6244_p0 }
  0x43   :  { %p6247_p3 = pnand %p6246_p2, %p6240_p13 }
  0x45   :  { %6250 = shalt.err (!%p6247_p3)
}
  0x46   :  { %37 = dma.hbm_to_vmem [thread:$0]  %s7555_s0, 1024, %s6501_s20, [#allocation4], %s6379_s18, %s6379_s18, %s6380_s1  }
  0x47   :  { %s6381_s5 = smov [#allocation8]   ;;  %s6382_s30 = smov [#allocation11]  }
  0x48   :  { %s57_s19 = sshll.u32 %s6381_s5, 4  ;;  %s85_s17 = sshll.u32 %s6382_s30, 4  ;;  %s58_s19 = int_to_ptr.vmem [resolvable:$true] %s57_s19  ;;  %s6538_s17 = int_to_ptr.vmem [resolvable:$true] %s85_s17 }
  0x49   :  { %s6251_s23 = scalar_lea.hbm %s7558_s3, 6144 }
  0x4a   :  { %p6252_p4 = scmp.ne.s32.totalorder %s7558_s3, %s6251_s23  ;;  %p6255_p5 = scmp.lt.u32.totalorder %s6251_s23, %s7558_s3 }
  0x4c   :  { %p6257_p6 = pnand %p6255_p5, %p6252_p4 }
  0x4e   :  { %6260 = shalt.err (!%p6257_p6)
}
  0x4f   :  { %s6261_s0 = scalar_lea.vmem %s58_s19, 6144  ;;  %p6266_p8 = scmp.lt.s32.totalorder %s58_s19, %s58_s19 }
  0x50   :  { %p6262_p7 = scmp.ne.s32.totalorder %s58_s19, %s6261_s0  ;;  %p6267_p9 = scmp.lt.s32.totalorder %s6261_s0, %s6261_s0 }
  0x52   :  { %p6268_p10 = por %p6267_p9, %p6266_p8 }
  0x54   :  { %p6269_p11 = pnand %p6268_p10, %p6262_p7 }
  0x56   :  { %6272 = shalt.err (!%p6269_p11)
}
  0x57   :  { %63 = dma.hbm_to_vmem [thread:$0]  %s7558_s3, 6144, %s58_s19, [#allocation7], %s6374_s28, %s6374_s28, %s6375_s29  }
  0x58   :  { %s6273_s30 = scalar_lea.hbm %s7562_s7, 6144 }
  0x59   :  { %p6274_p12 = scmp.ne.s32.totalorder %s7562_s7, %s6273_s30  ;;  %p6277_p13 = scmp.lt.u32.totalorder %s6273_s30, %s7562_s7 }
  0x5b   :  { %p6279_p0 = pnand %p6277_p13, %p6274_p12 }
  0x5d   :  { %6282 = shalt.err (!%p6279_p0)
}
  0x5e   :  { %s6283_s25 = scalar_lea.vmem %s6538_s17, 6144  ;;  %p6288_p2 = scmp.lt.s32.totalorder %s6538_s17, %s6538_s17 }
  0x5f   :  { %p6284_p1 = scmp.ne.s32.totalorder %s6538_s17, %s6283_s25  ;;  %p6289_p3 = scmp.lt.s32.totalorder %s6283_s25, %s6283_s25 }
  0x61   :  { %p6290_p4 = por %p6289_p3, %p6288_p2 }
  0x63   :  { %p6291_p5 = pnand %p6290_p4, %p6284_p1 }
  0x65   :  { %6294 = shalt.err (!%p6291_p5)
}
  0x66   :  { %91 = dma.hbm_to_vmem [thread:$0]  %s7562_s7, 6144, %s6538_s17, [#allocation10], %s6374_s28, %s6374_s28, %s6375_s29  }
  0x67   :  { %s6383_s26 = smov [#allocation14]   ;;  %s6295_s9 = scalar_lea.hbm %s7566_s11, 4096 }
  0x68   :  { %s113_s27 = sshll.u32 %s6383_s26, 4  ;;  %p6296_p6 = scmp.ne.s32.totalorder %s7566_s11, %s6295_s9  ;;  %s114_s27 = int_to_ptr.vmem [resolvable:$true] %s113_s27 }
  0x69   :  { %p6299_p7 = scmp.lt.u32.totalorder %s6295_s9, %s7566_s11 }
  0x6b   :  { %p6301_p8 = pnand %p6299_p7, %p6296_p6 }
  0x6d   :  { %6304 = shalt.err (!%p6301_p8)
}
  0x6e   :  { %s6305_s22 = scalar_lea.vmem %s114_s27, 4096  ;;  %p6310_p10 = scmp.lt.s32.totalorder %s114_s27, %s114_s27 }
  0x6f   :  { %p6306_p9 = scmp.ne.s32.totalorder %s114_s27, %s6305_s22  ;;  %p6311_p11 = scmp.lt.s32.totalorder %s6305_s22, %s6305_s22 }
  0x71   :  { %p6312_p12 = por %p6311_p11, %p6310_p10 }
  0x73   :  { %p6313_p13 = pnand %p6312_p12, %p6306_p9 }
  0x75   :  { %6316 = shalt.err (!%p6313_p13)
}
  0x76   :  { %s6384_s7 = smov 256   ;;  %s6385_s28 = smov 16  }
  0x77   :  { %119 = dma.hbm_to_vmem [thread:$0]  %s7566_s11, 4096, %s114_s27, [#allocation13], %s6384_s7, %s6384_s7, %s6385_s28  }
  0x78   :  { %s6386_s23 = smov [#allocation15]   ;;  %s6317_s19 = scalar_lea.hbm %s7568_s13, 4096 }
  0x79   :  { %s127_s24 = sshll.u32 %s6386_s23, 4  ;;  %p6318_p0 = scmp.ne.s32.totalorder %s7568_s13, %s6317_s19  ;;  %s128_s24 = int_to_ptr.vmem [resolvable:$true] %s127_s24 }
  0x7a   :  { %p6321_p1 = scmp.lt.u32.totalorder %s6317_s19, %s7568_s13 }
  0x7c   :  { %p6323_p2 = pnand %p6321_p1, %p6318_p0 }
  0x7e   :  { %6326 = shalt.err (!%p6323_p2)
}
  0x7f   :  { %s6327_s16 = scalar_lea.vmem %s128_s24, 4096  ;;  %p6332_p4 = scmp.lt.s32.totalorder %s128_s24, %s128_s24 }
  0x80   :  { %p6328_p3 = scmp.ne.s32.totalorder %s128_s24, %s6327_s16  ;;  %p6333_p5 = scmp.lt.s32.totalorder %s6327_s16, %s6327_s16 }
  0x82   :  { %p6334_p6 = por %p6333_p5, %p6332_p4 }
  0x84   :  { %p6335_p7 = pnand %p6334_p6, %p6328_p3 }
  0x86   :  { %6338 = shalt.err (!%p6335_p7)
}
  0x87   :  { %133 = dma.hbm_to_vmem [thread:$0]  %s7568_s13, 4096, %s128_s24, [#allocation16], %s6379_s18, %s6379_s18, %s6380_s1  }
  0x88   :  { %6361 = dma.done.wait [#allocation4], 1024  }
  0x89   :  { %6362 = vsyncadd [#allocation4], 4294966272 }
  0x8a   :  { %6363 = dma.done.wait [#allocation7], 6912  }
  0x8b   :  { %6364 = vsyncadd [#allocation7], 4294960384 }
  0x8c   :  { %6365 = dma.done.wait [#allocation10], 12288  }
  0x8d   :  { %6366 = vsyncadd [#allocation10], 4294955008 }
  0x8e   :  { %6367 = dma.done.wait [#allocation13], 6144  }
  0x8f   :  { %6368 = vsyncadd [#allocation13], 4294961152 }
  0x90   :  { %6369 = dma.done.wait [#allocation16], 4096  }
  0x91   :  { %6370 = vsyncadd [#allocation16], 4294963200  ;;  %v6387_v0 = vmov 0.0   ;;  %v169_v1 = vld [vmem:[#allocation6 + $0x8] sm:$0xff]  ;;  %v172_v2 = vld [vmem:[#allocation6 + $0x20] sm:$0xff]  ;;  %vm191_vm0 = vcmask 130048  }
  0x92   :  { %280 = vmatprep.mubr.f32.mxu0 %v6387_v0  ;;  %v168_v3 = vld [vmem:[#allocation6] sm:$0xff]  ;;  %v4863_v4 = vpack.c.bf16 %v172_v2, %v169_v1  ;;  %v171_v5 = vld [vmem:[#allocation6 + $0x18] sm:$0xff]  ;;  %v438_v9 = vld [vmem:[#allocation8 + $0x20] sm:$0xff]  ;;  %v6388_v48 = vmov 0.0|0.0   ;;  %vm6389_vm1 = vmmov 0   ;;  %s6390_s25 = smov [#allocation17]  }
  0x93   :  { %v160_v6 = vld [vmem:[#allocation3] sm:$0xff]  ;;  %v435_v7 = vld [vmem:[#allocation8 + $0x8] sm:$0xff]  ;;  %v4865_v8 = vpack.c.bf16 %v171_v5, %v168_v3  ;;  %v434_v10 = vld [vmem:[#allocation8] sm:$0xff] }
  0x94   :  { %v437_v11 = vld [vmem:[#allocation8 + $0x18] sm:$0xff]  ;;  %4212 = vmatprep.mubr.msk.f32.mxu1 %vm191_vm0, %v160_v6  ;;  %4864 = vmatprep.subr.bf16.mxu0 %v4863_v4  ;;  %v6604_v12 = vpack.c.bf16 %v438_v9, %v435_v7  ;;  %v444_v14 = vld [vmem:[#allocation8 + $0x50] sm:$0xff]  ;;  %v443_v18 = vld [vmem:[#allocation8 + $0x48] sm:$0xff] }
  0x95   :  { %v441_v13 = vld [vmem:[#allocation8 + $0x38] sm:$0xff]  ;;  %4866 = vmatpush1.bf16.msra.mxu0 %v4865_v8  ;;  %v6606_v15 = vpack.c.bf16 %v437_v11, %v434_v10  ;;  %v440_v17 = vld [vmem:[#allocation8 + $0x30] sm:$0xff]  ;;  %v447_v19 = vld [vmem:[#allocation8 + $0x68] sm:$0xff] }
  0x96   :  { %4872 = vmatprep.subr.bf16.mxu0 %v6604_v12  ;;  %v6609_v16 = vpack.c.bf16 %v444_v14, %v441_v13  ;;  %v450_v20 = vld [vmem:[#allocation8 + $0x80] sm:$0xff]  ;;  %v161_v21 = vld [vmem:[#allocation3 + $0x8] sm:$0xff]  ;;  %v6614_v22 = vpack.c.bf16 %v443_v18, %v440_v17  ;;  %v456_v27 = vld [vmem:[#allocation8 + $0xb0] sm:$0xff] }
  0x97   :  { %v6617_v23 = vpack.c.bf16 %v450_v20, %v447_v19  ;;  %v446_v24 = vld [vmem:[#allocation8 + $0x60] sm:$0xff]  ;;  %v449_v25 = vld [vmem:[#allocation8 + $0x78] sm:$0xff]  ;;  %v452_v34 = vld [vmem:[#allocation8 + $0x90] sm:$0xff] }
  0x98   :  { %3798 = vmatmul.mubr.msk.f32.vlgmr.msra.gmra.mrb[0].mxu0 %vm191_vm0, %v160_v6  ;;  %v453_v26 = vld [vmem:[#allocation8 + $0x98] sm:$0xff]  ;;  %v170_v28 = vld [vmem:[#allocation6 + $0x10] sm:$0xff]  ;;  %v6622_v31 = vpack.c.bf16 %v449_v25, %v446_v24  ;;  %v455_v35 = vld [vmem:[#allocation8 + $0xa8] sm:$0xff] }
  0x99   :  { %4874 = vmatpush1.bf16.msra.mxu0 %v6606_v15  ;;  %286 = vmatprep.mubr.f32.mxu0 %v6387_v0  ;;  %v173_v29 = vld [vmem:[#allocation6 + $0x28] sm:$0xff]  ;;  %v162_v30 = vld [vmem:[#allocation3 + $0x10] sm:$0xff]  ;;  %v6625_v33 = vpack.c.bf16 %v456_v27, %v453_v26  ;;  %v436_v36 = vld [vmem:[#allocation8 + $0x10] sm:$0xff]  ;;  %v6632_v42 = vpack.c.bf16 %v455_v35, %v452_v34  ;;  %v176_v35 = vlaneseq }
  0x9a   :  { %4876 = vmatprep.subr.bf16.mxu0 %v6609_v16  ;;  %v4867_v32 = vpack.c.bf16 %v173_v29, %v170_v28  ;;  %v459_v37 = vld [vmem:[#allocation8 + $0xc8] sm:$0xff]  ;;  %v462_v38 = vld [vmem:[#allocation8 + $0xe0] sm:$0xff]  ;;  %v445_v44 = vld [vmem:[#allocation8 + $0x58] sm:$0xff] }
  0x9b   :  { %v439_v39 = vld [vmem:[#allocation8 + $0x28] sm:$0xff]  ;;  %v442_v43 = vld [vmem:[#allocation8 + $0x40] sm:$0xff]  ;;  %v6635_v45 = vpack.c.bf16 %v462_v38, %v459_v37  ;;  %v461_v47 = vld [vmem:[#allocation8 + $0xd8] sm:$0xff] }
  0x9c   :  { %3799 = vmatmul.mubr.msk.f32.gmra.mrb[2].mxu0 %vm191_vm0, %v161_v21  ;;  %4868 = vmatprep.subr.bf16.mxu1 %v4867_v32  ;;  %v6628_v40 = vpack.c.bf16 %v439_v39, %v436_v36  ;;  %v163_v41 = vld [vmem:[#allocation3 + $0x18] sm:$0xff]  ;;  %v458_v46 = vld [vmem:[#allocation8 + $0xc0] sm:$0xff]  ;;  %v465_v49 = vld [vmem:[#allocation8 + $0xf8] sm:$0xff]  ;;  %v6641_v51 = vpack.c.bf16 %v445_v44, %v442_v43  ;;  %v6748_v36 = vshrl.u32 %v176_v35, 7 }
  0x9d   :  { %4878 = vmatpush1.bf16.msra.mxu0 %v6614_v22  ;;  %292 = vmatprep.mubr.f32.mxu0 %v6387_v0  ;;  %v468_v50 = vld [vmem:[#allocation8 + $0x110] sm:$0xff]  ;;  %v6645_v53 = vpack.c.bf16 %v461_v47, %v458_v46  ;;  %v451_v55 = vld [vmem:[#allocation8 + $0x88] sm:$0xff]  ;;  %v474_v60 = vld [vmem:[#allocation8 + $0x140] sm:$0xff] }
  0x9e   :  { %4880 = vmatprep.subr.bf16.mxu0 %v6617_v23  ;;  %4870 = vmatpush3.bf16.msra.mxu1 %v4867_v32  ;;  %v164_v52 = vld [vmem:[#allocation3 + $0x20] sm:$0xff]  ;;  %v6648_v56 = vpack.c.bf16 %v468_v50, %v465_v49  ;;  %v467_v58 = vld [vmem:[#allocation8 + $0x108] sm:$0xff]  ;;  %v165_v62 = vld [vmem:[#allocation3 + $0x28] sm:$0xff]  ;;  %v186_v37 = vsub.s32 2, %v6748_v36 }
  0x9f   :  { %4903 = vmatprep.subr.bf16.mxu1 %v6388_v48  ;;  %v448_v54 = vld [vmem:[#allocation8 + $0x70] sm:$0xff]  ;;  %v471_v59 = vld [vmem:[#allocation8 + $0x128] sm:$0xff]  ;;  %v454_v1 = vld [vmem:[#allocation8 + $0xa0] sm:$0xff] }
  0xa0   :  { %3800 = vmatmul.mubr.msk.f32.gmra.mrb[4].mxu0 %vm191_vm0, %v162_v30  ;;  %v464_v57 = vld [vmem:[#allocation8 + $0xf0] sm:$0xff]  ;;  %v6654_v61 = vpack.c.bf16 %v451_v55, %v448_v54  ;;  %v457_v2 = vld [vmem:[#allocation8 + $0xb8] sm:$0xff]  ;;  %v6661_v3 = vpack.c.bf16 %v474_v60, %v471_v59  ;;  %v470_v4 = vld [vmem:[#allocation8 + $0x120] sm:$0xff]  ;;  %v6766_v55 = vsub.s32 1, %v6748_v36 }
  0xa1   :  { %4882 = vmatpush1.bf16.msra.mxu0 %v6622_v31  ;;  %298 = vmatprep.mubr.f32.mxu0 %v6387_v0  ;;  %v6658_v63 = vpack.c.bf16 %v467_v58, %v464_v57  ;;  %v473_v5 = vld [vmem:[#allocation8 + $0x138] sm:$0xff]  ;;  %v480_v7 = vld [vmem:[#allocation8 + $0x170] sm:$0xff]  ;;  %v6667_v8 = vpack.c.bf16 %v457_v2, %v454_v1  ;;  %v166_v9 = vld [vmem:[#allocation3 + $0x30] sm:$0xff] }
  0xa2   :  { %4884 = vmatprep.subr.bf16.mxu0 %v6625_v33  ;;  %4213 = vmatmul.mubr.msk.f32.vlgmr.msra.gmra.mrb[0].mxu1 %vm191_vm0, %v161_v21  ;;  %v477_v6 = vld [vmem:[#allocation8 + $0x158] sm:$0xff]  ;;  %v6671_v10 = vpack.c.bf16 %v473_v5, %v470_v4  ;;  %v460_v11 = vld [vmem:[#allocation8 + $0xd0] sm:$0xff]  ;;  %v463_v13 = vld [vmem:[#allocation8 + $0xe8] sm:$0xff] }
  0xa3   :  { %4905 = vmatpush3.bf16.msra.mxu1 %v6628_v40  ;;  %4215 = vmatprep.mubr.msk.f32.mxu1 %vm191_vm0, %v162_v30  ;;  %v6674_v14 = vpack.c.bf16 %v480_v7, %v477_v6  ;;  %v476_v17 = vld [vmem:[#allocation8 + $0x150] sm:$0xff]  ;;  %v479_v18 = vld [vmem:[#allocation8 + $0x168] sm:$0xff]  ;;  %v6680_v19 = vpack.c.bf16 %v463_v13, %v460_v11  ;;  %v466_v24 = vld [vmem:[#allocation8 + $0x100] sm:$0xff] }
  0xa4   :  { %3801 = vmatmul.mubr.msk.f32.gmra.mrb[6].mxu0 %vm191_vm0, %v163_v41  ;;  %4906 = vmatprep.subr.bf16.mxu1 %v6388_v48  ;;  %v167_v20 = vld [vmem:[#allocation3 + $0x38] sm:$0xff]  ;;  %v6684_v21 = vpack.c.bf16 %v479_v18, %v476_v17  ;;  %v469_v25 = vld [vmem:[#allocation8 + $0x118] sm:$0xff]  ;;  %v472_v27 = vld [vmem:[#allocation8 + $0x130] sm:$0xff] }
  0xa5   :  { %4886 = vmatpush1.bf16.msra.mxu0 %v6632_v42  ;;  %304 = vmatprep.mubr.f32.mxu0 %v6387_v0  ;;  %v6691_v26 = vpack.c.bf16 %v469_v25, %v466_v24  ;;  %v475_v28 = vld [vmem:[#allocation8 + $0x148] sm:$0xff]  ;;  %v478_v30 = vld [vmem:[#allocation8 + $0x160] sm:$0xff]  ;;  %v481_v32 = vld [vmem:[#allocation8 + $0x178] sm:$0xff] }
  0xa6   :  { %4888 = vmatprep.subr.bf16.mxu0 %v6635_v45  ;;  %4216 = vmatmul.mubr.msk.f32.gmra.mrb[2].mxu1 %vm191_vm0, %v163_v41  ;;  %v6701_v29 = vpack.c.bf16 %v475_v28, %v472_v27  ;;  %v6710_v34 = vpack.c.bf16 %v481_v32, %v478_v30  ;;  %v174_v38 = vld [vmem:[%s7557_s2] sm:$0x7] }
  0xa7   :  { %4908 = vmatpush3.bf16.msra.mxu1 %v6641_v51  ;;  %4218 = vmatprep.mubr.msk.f32.mxu1 %vm191_vm0, %v164_v52  ;;  %v187_v39 = vrot.slane %v174_v38, %v186_v37  ;;  %v6776_v2 = vrot.slane %v174_v38, %v6766_v55  ;;  %v6787_v28 = vld [vmem:[%s7559_s4] ss:$0 sm:$0xff] }
  0xa8   :  { %3802 = vmatmul.mubr.msk.f32.gmra.mrb[8].mxu0 %vm191_vm0, %v164_v52  ;;  %4909 = vmatprep.subr.bf16.mxu1 %v6388_v48  ;;  %v6763_v52 = vsub.s32 0, %v6748_v36 }
  0xa9   :  { %4890 = vmatpush1.bf16.msra.mxu0 %v6645_v53  ;;  %310 = vmatprep.mubr.f32.mxu0 %v6387_v0 }
  0xaa   :  { %4892 = vmatprep.subr.bf16.mxu0 %v6648_v56  ;;  %4219 = vmatmul.mubr.msk.f32.gmra.mrb[4].mxu1 %vm191_vm0, %v165_v62  ;;  %v6771_v59 = vrot.slane %v174_v38, %v6763_v52 }
  0xab   :  { %4911 = vmatpush3.bf16.msra.mxu1 %v6654_v61  ;;  %4221 = vmatprep.mubr.msk.f32.mxu1 %vm191_vm0, %v166_v9 }
  0xac   :  { %3803 = vmatmul.mubr.msk.f32.gmra.mrb[10].mxu0 %vm191_vm0, %v165_v62  ;;  %4912 = vmatprep.subr.bf16.mxu1 %v6388_v48 }
  0xad   :  { %4894 = vmatpush1.bf16.msra.mxu0 %v6658_v63  ;;  %316 = vmatprep.mubr.f32.mxu0 %v6387_v0 }
  0xae   :  { %4896 = vmatprep.subr.bf16.mxu0 %v6661_v3  ;;  %4222 = vmatmul.mubr.msk.f32.gmra.mrb[6].mxu1 %vm191_vm0, %v167_v20 }
  0xaf   :  { %4914 = vmatpush3.bf16.msra.mxu1 %v6667_v8  ;;  %4256 = vmatprep.mubr.msk.f32.mxu1 %vm6389_vm1, %v6387_v0 }
  0xb0   :  { %3804 = vmatmul.mubr.msk.f32.gmra.mrb[12].mxu0 %vm191_vm0, %v166_v9  ;;  %4915 = vmatprep.subr.bf16.mxu1 %v6388_v48 }
  0xb1   :  { %4898 = vmatpush1.bf16.msra.mxu0 %v6671_v10  ;;  %322 = vmatprep.mubr.f32.mxu0 %v6387_v0 }
  0xb2   :  { %4900 = vmatprep.subr.bf16.mxu0 %v6674_v14 }
  0xb3   :  { %4917 = vmatpush3.bf16.msra.mxu1 %v6680_v19 }
  0xb4   :  { %3805 = vmatmul.mubr.msk.f32.gmra.mrb[14].mxu0 %vm191_vm0, %v167_v20  ;;  %4918 = vmatprep.subr.bf16.mxu1 %v6388_v48 }
  0xb5   :  { %4902 = vmatpush1.bf16.msra.mxu0 %v6684_v21  ;;  %553 = vmatprep.mubr.f32.mxu0 %v6387_v0 }
  0xb6   :  { %4928 = vmatprep.subr.bf16.mxu0 %v6604_v12 }
  0xb7   :  { %4920 = vmatpush3.bf16.msra.mxu1 %v6691_v26 }
  0xb8   :  { %554 = vmatmul.mubr.f32.vlgmr.msra.gmra.mrb[0].mxu0 %v6387_v0  ;;  %4921 = vmatprep.subr.bf16.mxu1 %v6388_v48 }
  0xb9   :  { %4930 = vmatpush1.bf16.msra.mxu0 %v6606_v15  ;;  %717 = vmatprep.mubr.f32.mxu0 %v6387_v0 }
  0xba   :  { %4932 = vmatprep.subr.bf16.mxu0 %v6609_v16 }
  0xbb   :  { %4923 = vmatpush3.bf16.msra.mxu1 %v6701_v29 }
  0xbc   :  { %4924 = vmatprep.subr.bf16.mxu1 %v6388_v48 }
  0xbd   :  { %4934 = vmatpush1.bf16.msra.mxu0 %v6614_v22 }
  0xbe   :  { %4936 = vmatprep.subr.bf16.mxu0 %v6617_v23 }
  0xbf   :  { %4926 = vmatpush3.bf16.msra.mxu1 %v6710_v34 }
  0xc0   :  { %4959 = vmatprep.subr.bf16.mxu1 %v6388_v48 }
  0xc1   :  { %4938 = vmatpush1.bf16.msra.mxu0 %v6622_v31 }
  0xc2   :  { %4257 = vmatmul.mubr.f32.vlgmr.msra.gmra.mrb[8].mxu1 %v6387_v0  ;;  %4940 = vmatprep.subr.bf16.mxu0 %v6625_v33 }
  0xc3   :  { %4961 = vmatpush3.bf16.msra.mxu1 %v6628_v40  ;;  %4291 = vmatprep.mubr.msk.f32.mxu1 %vm6389_vm1, %v6387_v0 }
  0xc4   :  { %4962 = vmatprep.subr.bf16.mxu1 %v6388_v48 }
  0xc5   :  { %4942 = vmatpush1.bf16.msra.mxu0 %v6632_v42 }
  0xc6   :  { %4944 = vmatprep.subr.bf16.mxu0 %v6635_v45 }
  0xc7   :  { %4964 = vmatpush3.bf16.msra.mxu1 %v6641_v51 }
  0xc8   :  { %4965 = vmatprep.subr.bf16.mxu1 %v6388_v48 }
  0xc9   :  { %4946 = vmatpush1.bf16.msra.mxu0 %v6645_v53 }
  0xca   :  { %4948 = vmatprep.subr.bf16.mxu0 %v6648_v56 }
  0xcb   :  { %4967 = vmatpush3.bf16.msra.mxu1 %v6654_v61 }
  0xcc   :  { %4968 = vmatprep.subr.bf16.mxu1 %v6388_v48 }
  0xcd   :  { %4950 = vmatpush1.bf16.msra.mxu0 %v6658_v63 }
  0xce   :  { %4952 = vmatprep.subr.bf16.mxu0 %v6661_v3 }
  0xcf   :  { %4970 = vmatpush3.bf16.msra.mxu1 %v6667_v8 }
  0xd0   :  { %4971 = vmatprep.subr.bf16.mxu1 %v6388_v48 }
  0xd1   :  { %4954 = vmatpush1.bf16.msra.mxu0 %v6671_v10 }
  0xd2   :  { %4956 = vmatprep.subr.bf16.mxu0 %v6674_v14 }
  0xd3   :  { %4973 = vmatpush3.bf16.msra.mxu1 %v6680_v19 }
  0xd4   :  { %4974 = vmatprep.subr.bf16.mxu1 %v6388_v48 }
  0xd5   :  { %4958 = vmatpush1.bf16.msra.mxu0 %v6684_v21 }
  0xd6   :  { %4984 = vmatprep.subr.bf16.mxu0 %v6604_v12 }
  0xd7   :  { %4976 = vmatpush3.bf16.msra.mxu1 %v6691_v26 }
  0xd8   :  { %4977 = vmatprep.subr.bf16.mxu1 %v6388_v48 }
  0xdb   :  { %4979 = vmatpush3.bf16.msra.mxu1 %v6701_v29 }
  0xdc   :  { %4980 = vmatprep.subr.bf16.mxu1 %v6388_v48 }
  0xdf   :  { %4982 = vmatpush3.bf16.msra.mxu1 %v6710_v34 }
  0xe0   :  { %5015 = vmatprep.subr.bf16.mxu1 %v6388_v48 }
 0x175   :  { %v4214_v41 = vpop.f32.mrb[0].mxu1 }
 0x176   :  { %v6756_v43 = vadd.f32 %v4214_v41, %v187_v39  ;;  %v395_v44 = vpop.f32.mrb[1].mxu1 }
 0x177   :  { %v396_v38 = vadd.f32 %v395_v44, %v187_v39 }
 0x179   :  { %v4217_v46 = vpop.f32.mrb[2].mxu1 }
 0x17a   :  { %v6758_v47 = vadd.f32 %v4217_v46, %v187_v39  ;;  %v405_v49 = vpop.f32.mrb[3].mxu1 }
 0x17b   :  { %v6760_v50 = vadd.f32 %v405_v49, %v187_v39 }
 0x17d   :  { %v4220_v54 = vpop.f32.mrb[4].mxu1 }
 0x17e   :  { %v6768_v57 = vadd.f32 %v4220_v54, %v187_v39  ;;  %v415_v58 = vpop.f32.mrb[5].mxu1 }
 0x17f   :  { %v6773_v60 = vadd.f32 %v415_v58, %v187_v39 }
 0x181   :  { %v4223_v62 = vpop.f32.mrb[6].mxu1 }
 0x182   :  { %v6778_v4 = vadd.f32 %v4223_v62, %v187_v39  ;;  %v425_v5 = vpop.f32.mrb[7].mxu1 }
 0x183   :  { %v6781_v9 = vadd.f32 %v425_v5, %v187_v39 }
 0x18b   :  { %v555_v1 = vpop.f32.mrb[0].mxu0 }
 0x18c   :  { %v5919_v6 = vadd.f32 %v555_v1, %v6771_v59  ;;  %v557_v7 = vpop.f32.mrb[1].mxu0 }
 0x18d   :  { %v5920_v13 = vadd.f32 %v557_v7, %v6776_v2 }
 0x18e   :  { %v3815_v11 = vmul.f32 -1.442695, %v5919_v6 }
 0x18f   :  { %v3816_v17 = vmul.f32 -1.442695, %v5920_v13 }
 0x190   :  { %6001 = vpow2.f32 %v3815_v11 }
 0x191   :  { %6003 = vpow2.f32 %v3816_v17 }
 0x195   :  { %v626_v18 = vpop.f32.mrb[8].mxu1 }
 0x196   :  { %v4258_v20 = vpop.f32.mrb[9].mxu1  ;;  %v644_v32 = vadd.f32 %v6787_v28, %v626_v18 }
 0x19a   :  { %v6002_v24 = vpop.eup %6001 }
 0x19b   :  { %v638_v25 = vadd.f32 1.0, %v6002_v24  ;;  %v6004_v27 = vpop.eup %6003 }
 0x19c   :  { %v639_v30 = vadd.f32 1.0, %v6004_v27 }
 0x19d   :  { %6005 = vrcp.f32 %v638_v25 }
 0x19e   :  { %6007 = vrcp.f32 %v639_v30 }
 0x1a7   :  { %v6006_v35 = vpop.eup %6005 }
 0x1a8   :  { %v645_v41 = vmul.f32 %v6006_v35, %v644_v32  ;;  %v6008_v49 = vpop.eup %6007 }
 0x1a9   :  { %v648_v54 = vsub.f32 1.0, %v6008_v49  ;;  %v650_v1 = vmul.f32 0.0, %v6008_v49 }
 0x1aa   :  { %v646_v46 = vadd.f32 %v645_v41, %v396_v38 }
 0x1ac   :  { %6009 = vtanh.f32 %v646_v46 }
 0x1b6   :  { %v6010_v58 = vpop.eup %6009 }
 0x1b7   :  { %v649_v62 = vmul.f32 %v6010_v58, %v648_v54 }
 0x1b9   :  { %v6790_v5 = vadd.f32 %v650_v1, %v649_v62 }
 0x1bb   :  { %718 = vmatmul.mubr.f32.vlgmr.msra.gmra.mrb[2].mxu0 %v6790_v5  ;;  %4292 = vmatmul.mubr.f32.vlgmr.msra.gmra.mrb[10].mxu1 %v6790_v5 }
 0x1bc   :  { %4986 = vmatpush1.bf16.msra.mxu0 %v6606_v15  ;;  %5017 = vmatpush3.bf16.msra.mxu1 %v6628_v40 }
 0x1bd   :  { %4988 = vmatprep.subr.bf16.mxu0 %v6609_v16  ;;  %5018 = vmatprep.subr.bf16.mxu1 %v6388_v48 }
 0x1be   :  { %882 = vmatprep.mubr.f32.mxu0 %v6387_v0  ;;  %4326 = vmatprep.mubr.msk.f32.mxu1 %vm6389_vm1, %v6387_v0 }
 0x1c0   :  { %4990 = vmatpush1.bf16.msra.mxu0 %v6614_v22  ;;  %5020 = vmatpush3.bf16.msra.mxu1 %v6641_v51 }
 0x1c1   :  { %4992 = vmatprep.subr.bf16.mxu0 %v6617_v23  ;;  %5021 = vmatprep.subr.bf16.mxu1 %v6388_v48 }
 0x1c4   :  { %4994 = vmatpush1.bf16.msra.mxu0 %v6622_v31  ;;  %5023 = vmatpush3.bf16.msra.mxu1 %v6654_v61 }
 0x1c5   :  { %4996 = vmatprep.subr.bf16.mxu0 %v6625_v33  ;;  %5024 = vmatprep.subr.bf16.mxu1 %v6388_v48 }
 0x1c8   :  { %4998 = vmatpush1.bf16.msra.mxu0 %v6632_v42  ;;  %5026 = vmatpush3.bf16.msra.mxu1 %v6667_v8 }
 0x1c9   :  { %5000 = vmatprep.subr.bf16.mxu0 %v6635_v45  ;;  %5027 = vmatprep.subr.bf16.mxu1 %v6388_v48 }
 0x1cc   :  { %5002 = vmatpush1.bf16.msra.mxu0 %v6645_v53  ;;  %5029 = vmatpush3.bf16.msra.mxu1 %v6680_v19 }
 0x1cd   :  { %5004 = vmatprep.subr.bf16.mxu0 %v6648_v56  ;;  %5030 = vmatprep.subr.bf16.mxu1 %v6388_v48 }
 0x1d0   :  { %5006 = vmatpush1.bf16.msra.mxu0 %v6658_v63  ;;  %5032 = vmatpush3.bf16.msra.mxu1 %v6691_v26 }
 0x1d1   :  { %5008 = vmatprep.subr.bf16.mxu0 %v6661_v3  ;;  %5033 = vmatprep.subr.bf16.mxu1 %v6388_v48 }
 0x1d4   :  { %5010 = vmatpush1.bf16.msra.mxu0 %v6671_v10  ;;  %5035 = vmatpush3.bf16.msra.mxu1 %v6701_v29 }
 0x1d5   :  { %5012 = vmatprep.subr.bf16.mxu0 %v6674_v14  ;;  %5036 = vmatprep.subr.bf16.mxu1 %v6388_v48 }
 0x1d8   :  { %5014 = vmatpush1.bf16.msra.mxu0 %v6684_v21  ;;  %5038 = vmatpush3.bf16.msra.mxu1 %v6710_v34 }
 0x1d9   :  { %5040 = vmatprep.subr.bf16.mxu0 %v6604_v12  ;;  %5071 = vmatprep.subr.bf16.mxu1 %v6388_v48 }
 0x28e   :  { %v719_v39 = vpop.f32.mrb[2].mxu0  ;;  %v790_v44 = vpop.f32.mrb[10].mxu1 }
 0x28f   :  { %v5921_v6 = vadd.f32 %v719_v39, %v6771_v59  ;;  %v721_v7 = vpop.f32.mrb[3].mxu0  ;;  %v4293_v11 = vpop.f32.mrb[11].mxu1  ;;  %v808_v30 = vadd.f32 %v6787_v28, %v790_v44 }
 0x290   :  { %v5922_v17 = vadd.f32 %v721_v7, %v6776_v2 }
 0x291   :  { %v3817_v13 = vmul.f32 -1.442695, %v5921_v6 }
 0x292   :  { %v3818_v18 = vmul.f32 -1.442695, %v5922_v17 }
 0x293   :  { %6011 = vpow2.f32 %v3817_v13 }
 0x294   :  { %6013 = vpow2.f32 %v3818_v18 }
 0x29d   :  { %v6012_v20 = vpop.eup %6011 }
 0x29e   :  { %v802_v24 = vadd.f32 1.0, %v6012_v20  ;;  %v6014_v25 = vpop.eup %6013 }
 0x29f   :  { %v803_v27 = vadd.f32 1.0, %v6014_v25 }
 0x2a0   :  { %6015 = vrcp.f32 %v802_v24 }
 0x2a1   :  { %6017 = vrcp.f32 %v803_v27 }
 0x2aa   :  { %v6016_v32 = vpop.eup %6015 }
 0x2ab   :  { %v809_v35 = vmul.f32 %v6016_v32, %v808_v30  ;;  %v6018_v41 = vpop.eup %6017 }
 0x2ac   :  { %v812_v46 = vsub.f32 1.0, %v6018_v41  ;;  %v814_v58 = vmul.f32 %v6018_v41, %v6790_v5 }
 0x2ad   :  { %v810_v38 = vadd.f32 %v809_v35, %v6756_v43 }
 0x2af   :  { %6019 = vtanh.f32 %v810_v38 }
 0x2b9   :  { %v6020_v49 = vpop.eup %6019 }
 0x2ba   :  { %v813_v54 = vmul.f32 %v6020_v49, %v812_v46 }
 0x2bc   :  { %v6834_v62 = vadd.f32 %v814_v58, %v813_v54 }
 0x2be   :  { %883 = vmatmul.mubr.f32.vlgmr.msra.gmra.mrb[4].mxu0 %v6834_v62  ;;  %4327 = vmatmul.mubr.f32.vlgmr.msra.gmra.mrb[12].mxu1 %v6834_v62 }
 0x2bf   :  { %5042 = vmatpush1.bf16.msra.mxu0 %v6606_v15  ;;  %5073 = vmatpush3.bf16.msra.mxu1 %v6628_v40 }
 0x2c0   :  { %5044 = vmatprep.subr.bf16.mxu0 %v6609_v16  ;;  %5074 = vmatprep.subr.bf16.mxu1 %v6388_v48 }
 0x2c1   :  { %1047 = vmatprep.mubr.f32.mxu0 %v6387_v0  ;;  %4361 = vmatprep.mubr.msk.f32.mxu1 %vm6389_vm1, %v6387_v0 }
 0x2c3   :  { %5046 = vmatpush1.bf16.msra.mxu0 %v6614_v22  ;;  %5076 = vmatpush3.bf16.msra.mxu1 %v6641_v51 }
 0x2c4   :  { %5048 = vmatprep.subr.bf16.mxu0 %v6617_v23  ;;  %5077 = vmatprep.subr.bf16.mxu1 %v6388_v48 }
 0x2c7   :  { %5050 = vmatpush1.bf16.msra.mxu0 %v6622_v31  ;;  %5079 = vmatpush3.bf16.msra.mxu1 %v6654_v61 }
 0x2c8   :  { %5052 = vmatprep.subr.bf16.mxu0 %v6625_v33  ;;  %5080 = vmatprep.subr.bf16.mxu1 %v6388_v48 }
 0x2cb   :  { %5054 = vmatpush1.bf16.msra.mxu0 %v6632_v42  ;;  %5082 = vmatpush3.bf16.msra.mxu1 %v6667_v8 }
 0x2cc   :  { %5056 = vmatprep.subr.bf16.mxu0 %v6635_v45  ;;  %5083 = vmatprep.subr.bf16.mxu1 %v6388_v48 }
 0x2cf   :  { %5058 = vmatpush1.bf16.msra.mxu0 %v6645_v53  ;;  %5085 = vmatpush3.bf16.msra.mxu1 %v6680_v19 }
 0x2d0   :  { %5060 = vmatprep.subr.bf16.mxu0 %v6648_v56  ;;  %5086 = vmatprep.subr.bf16.mxu1 %v6388_v48 }
 0x2d3   :  { %5062 = vmatpush1.bf16.msra.mxu0 %v6658_v63  ;;  %5088 = vmatpush3.bf16.msra.mxu1 %v6691_v26 }
 0x2d4   :  { %5064 = vmatprep.subr.bf16.mxu0 %v6661_v3  ;;  %5089 = vmatprep.subr.bf16.mxu1 %v6388_v48 }
 0x2d7   :  { %5066 = vmatpush1.bf16.msra.mxu0 %v6671_v10  ;;  %5091 = vmatpush3.bf16.msra.mxu1 %v6701_v29 }
 0x2d8   :  { %5068 = vmatprep.subr.bf16.mxu0 %v6674_v14  ;;  %5092 = vmatprep.subr.bf16.mxu1 %v6388_v48 }
 0x2db   :  { %5070 = vmatpush1.bf16.msra.mxu0 %v6684_v21  ;;  %5094 = vmatpush3.bf16.msra.mxu1 %v6710_v34 }
 0x2dc   :  { %5096 = vmatprep.subr.bf16.mxu0 %v6604_v12  ;;  %5127 = vmatprep.subr.bf16.mxu1 %v6388_v48 }
 0x391   :  { %v884_v43 = vpop.f32.mrb[4].mxu0  ;;  %v955_v1 = vpop.f32.mrb[12].mxu1 }
 0x392   :  { %v5923_v39 = vadd.f32 %v884_v43, %v6771_v59  ;;  %v886_v44 = vpop.f32.mrb[5].mxu0  ;;  %v4328_v6 = vpop.f32.mrb[13].mxu1  ;;  %v973_v25 = vadd.f32 %v6787_v28, %v955_v1 }
 0x393   :  { %v5924_v11 = vadd.f32 %v886_v44, %v6776_v2 }
 0x394   :  { %v3819_v7 = vmul.f32 -1.442695, %v5923_v39 }
 0x395   :  { %v3820_v13 = vmul.f32 -1.442695, %v5924_v11 }
 0x396   :  { %6021 = vpow2.f32 %v3819_v7 }
 0x397   :  { %6023 = vpow2.f32 %v3820_v13 }
 0x3a0   :  { %v6022_v17 = vpop.eup %6021 }
 0x3a1   :  { %v967_v18 = vadd.f32 1.0, %v6022_v17  ;;  %v6024_v20 = vpop.eup %6023 }
 0x3a2   :  { %v968_v24 = vadd.f32 1.0, %v6024_v20 }
 0x3a3   :  { %6025 = vrcp.f32 %v967_v18 }
 0x3a4   :  { %6027 = vrcp.f32 %v968_v24 }
 0x3ad   :  { %v6026_v27 = vpop.eup %6025 }
 0x3ae   :  { %v974_v30 = vmul.f32 %v6026_v27, %v973_v25  ;;  %v6028_v35 = vpop.eup %6027 }
 0x3af   :  { %v977_v38 = vsub.f32 1.0, %v6028_v35  ;;  %v979_v49 = vmul.f32 %v6028_v35, %v6834_v62 }
 0x3b0   :  { %v975_v32 = vadd.f32 %v974_v30, %v6760_v50 }
 0x3b2   :  { %6029 = vtanh.f32 %v975_v32 }
 0x3bc   :  { %v6030_v41 = vpop.eup %6029 }
 0x3bd   :  { %v978_v46 = vmul.f32 %v6030_v41, %v977_v38 }
 0x3bf   :  { %v6878_v54 = vadd.f32 %v979_v49, %v978_v46 }
 0x3c1   :  { %1048 = vmatmul.mubr.f32.vlgmr.msra.gmra.mrb[6].mxu0 %v6878_v54  ;;  %4362 = vmatmul.mubr.f32.vlgmr.msra.gmra.mrb[14].mxu1 %v6878_v54 }
 0x3c2   :  { %5098 = vmatpush1.bf16.msra.mxu0 %v6606_v15  ;;  %5129 = vmatpush3.bf16.msra.mxu1 %v6628_v40 }
 0x3c3   :  { %5100 = vmatprep.subr.bf16.mxu0 %v6609_v16  ;;  %5130 = vmatprep.subr.bf16.mxu1 %v6388_v48 }
 0x3c4   :  { %1212 = vmatprep.mubr.f32.mxu0 %v6387_v0  ;;  %4396 = vmatprep.mubr.msk.f32.mxu1 %vm6389_vm1, %v6387_v0 }
 0x3c6   :  { %5102 = vmatpush1.bf16.msra.mxu0 %v6614_v22  ;;  %5132 = vmatpush3.bf16.msra.mxu1 %v6641_v51 }
 0x3c7   :  { %5104 = vmatprep.subr.bf16.mxu0 %v6617_v23  ;;  %5133 = vmatprep.subr.bf16.mxu1 %v6388_v48 }
 0x3ca   :  { %5106 = vmatpush1.bf16.msra.mxu0 %v6622_v31  ;;  %5135 = vmatpush3.bf16.msra.mxu1 %v6654_v61 }
 0x3cb   :  { %5108 = vmatprep.subr.bf16.mxu0 %v6625_v33  ;;  %5136 = vmatprep.subr.bf16.mxu1 %v6388_v48 }
 0x3ce   :  { %5110 = vmatpush1.bf16.msra.mxu0 %v6632_v42  ;;  %5138 = vmatpush3.bf16.msra.mxu1 %v6667_v8 }
 0x3cf   :  { %5112 = vmatprep.subr.bf16.mxu0 %v6635_v45  ;;  %5139 = vmatprep.subr.bf16.mxu1 %v6388_v48 }
 0x3d2   :  { %5114 = vmatpush1.bf16.msra.mxu0 %v6645_v53  ;;  %5141 = vmatpush3.bf16.msra.mxu1 %v6680_v19 }
 0x3d3   :  { %5116 = vmatprep.subr.bf16.mxu0 %v6648_v56  ;;  %5142 = vmatprep.subr.bf16.mxu1 %v6388_v48 }
 0x3d6   :  { %5118 = vmatpush1.bf16.msra.mxu0 %v6658_v63  ;;  %5144 = vmatpush3.bf16.msra.mxu1 %v6691_v26 }
 0x3d7   :  { %5120 = vmatprep.subr.bf16.mxu0 %v6661_v3  ;;  %5145 = vmatprep.subr.bf16.mxu1 %v6388_v48 }
 0x3da   :  { %5122 = vmatpush1.bf16.msra.mxu0 %v6671_v10  ;;  %5147 = vmatpush3.bf16.msra.mxu1 %v6701_v29 }
 0x3db   :  { %5124 = vmatprep.subr.bf16.mxu0 %v6674_v14  ;;  %5148 = vmatprep.subr.bf16.mxu1 %v6388_v48 }
 0x3de   :  { %5126 = vmatpush1.bf16.msra.mxu0 %v6684_v21  ;;  %5150 = vmatpush3.bf16.msra.mxu1 %v6710_v34 }
 0x3df   :  { %5152 = vmatprep.subr.bf16.mxu0 %v6604_v12  ;;  %5183 = vmatprep.subr.bf16.mxu1 %v6388_v48 }
 0x494   :  { %v1049_v50 = vpop.f32.mrb[6].mxu0  ;;  %v1120_v58 = vpop.f32.mrb[14].mxu1 }
 0x495   :  { %v5925_v43 = vadd.f32 %v1049_v50, %v6771_v59  ;;  %v1051_v1 = vpop.f32.mrb[7].mxu0  ;;  %v4363_v39 = vpop.f32.mrb[15].mxu1  ;;  %v1138_v20 = vadd.f32 %v6787_v28, %v1120_v58 }
 0x496   :  { %v5926_v6 = vadd.f32 %v1051_v1, %v6776_v2 }
 0x497   :  { %v3821_v44 = vmul.f32 -1.442695, %v5925_v43 }
 0x498   :  { %v3822_v7 = vmul.f32 -1.442695, %v5926_v6 }
 0x499   :  { %6031 = vpow2.f32 %v3821_v44 }
 0x49a   :  { %6033 = vpow2.f32 %v3822_v7 }
 0x4a3   :  { %v6032_v11 = vpop.eup %6031 }
 0x4a4   :  { %v1132_v13 = vadd.f32 1.0, %v6032_v11  ;;  %v6034_v17 = vpop.eup %6033 }
 0x4a5   :  { %v1133_v18 = vadd.f32 1.0, %v6034_v17 }
 0x4a6   :  { %6035 = vrcp.f32 %v1132_v13 }
 0x4a7   :  { %6037 = vrcp.f32 %v1133_v18 }
 0x4b0   :  { %v6036_v24 = vpop.eup %6035 }
 0x4b1   :  { %v1139_v25 = vmul.f32 %v6036_v24, %v1138_v20  ;;  %v6038_v30 = vpop.eup %6037 }
 0x4b2   :  { %v1142_v32 = vsub.f32 1.0, %v6038_v30  ;;  %v1144_v41 = vmul.f32 %v6038_v30, %v6878_v54 }
 0x4b3   :  { %v1140_v27 = vadd.f32 %v1139_v25, %v6758_v47 }
 0x4b5   :  { %6039 = vtanh.f32 %v1140_v27 }
 0x4bf   :  { %v6040_v35 = vpop.eup %6039 }
 0x4c0   :  { %v1143_v38 = vmul.f32 %v6040_v35, %v1142_v32 }
 0x4c2   :  { %v6922_v46 = vadd.f32 %v1144_v41, %v1143_v38 }
 0x4c4   :  { %1213 = vmatmul.mubr.f32.vlgmr.msra.gmra.mrb[8].mxu0 %v6922_v46  ;;  %4397 = vmatmul.mubr.f32.vlgmr.msra.gmra.mrb[16].mxu1 %v6922_v46 }
 0x4c5   :  { %5154 = vmatpush1.bf16.msra.mxu0 %v6606_v15  ;;  %5185 = vmatpush3.bf16.msra.mxu1 %v6628_v40 }
 0x4c6   :  { %5156 = vmatprep.subr.bf16.mxu0 %v6609_v16  ;;  %5186 = vmatprep.subr.bf16.mxu1 %v6388_v48 }
 0x4c7   :  { %1377 = vmatprep.mubr.f32.mxu0 %v6387_v0  ;;  %4431 = vmatprep.mubr.msk.f32.mxu1 %vm6389_vm1, %v6387_v0 }
 0x4c9   :  { %5158 = vmatpush1.bf16.msra.mxu0 %v6614_v22  ;;  %5188 = vmatpush3.bf16.msra.mxu1 %v6641_v51 }
 0x4ca   :  { %5160 = vmatprep.subr.bf16.mxu0 %v6617_v23  ;;  %5189 = vmatprep.subr.bf16.mxu1 %v6388_v48 }
 0x4cd   :  { %5162 = vmatpush1.bf16.msra.mxu0 %v6622_v31  ;;  %5191 = vmatpush3.bf16.msra.mxu1 %v6654_v61 }
 0x4ce   :  { %5164 = vmatprep.subr.bf16.mxu0 %v6625_v33  ;;  %5192 = vmatprep.subr.bf16.mxu1 %v6388_v48 }
 0x4d1   :  { %5166 = vmatpush1.bf16.msra.mxu0 %v6632_v42  ;;  %5194 = vmatpush3.bf16.msra.mxu1 %v6667_v8 }
 0x4d2   :  { %5168 = vmatprep.subr.bf16.mxu0 %v6635_v45  ;;  %5195 = vmatprep.subr.bf16.mxu1 %v6388_v48 }
 0x4d5   :  { %5170 = vmatpush1.bf16.msra.mxu0 %v6645_v53  ;;  %5197 = vmatpush3.bf16.msra.mxu1 %v6680_v19 }
 0x4d6   :  { %5172 = vmatprep.subr.bf16.mxu0 %v6648_v56  ;;  %5198 = vmatprep.subr.bf16.mxu1 %v6388_v48 }
 0x4d9   :  { %5174 = vmatpush1.bf16.msra.mxu0 %v6658_v63  ;;  %5200 = vmatpush3.bf16.msra.mxu1 %v6691_v26 }
 0x4da   :  { %5176 = vmatprep.subr.bf16.mxu0 %v6661_v3  ;;  %5201 = vmatprep.subr.bf16.mxu1 %v6388_v48 }
 0x4dd   :  { %5178 = vmatpush1.bf16.msra.mxu0 %v6671_v10  ;;  %5203 = vmatpush3.bf16.msra.mxu1 %v6701_v29 }
 0x4de   :  { %5180 = vmatprep.subr.bf16.mxu0 %v6674_v14  ;;  %5204 = vmatprep.subr.bf16.mxu1 %v6388_v48 }
 0x4e1   :  { %5182 = vmatpush1.bf16.msra.mxu0 %v6684_v21  ;;  %5206 = vmatpush3.bf16.msra.mxu1 %v6710_v34 }
 0x4e2   :  { %5208 = vmatprep.subr.bf16.mxu0 %v6604_v12  ;;  %5239 = vmatprep.subr.bf16.mxu1 %v6388_v48 }
 0x597   :  { %v1214_v47 = vpop.f32.mrb[8].mxu0  ;;  %v1285_v49 = vpop.f32.mrb[16].mxu1 }
 0x598   :  { %v5927_v50 = vadd.f32 %v1214_v47, %v6771_v59  ;;  %v1216_v58 = vpop.f32.mrb[9].mxu0  ;;  %v4398_v43 = vpop.f32.mrb[17].mxu1  ;;  %v1303_v17 = vadd.f32 %v6787_v28, %v1285_v49 }
 0x599   :  { %v5928_v39 = vadd.f32 %v1216_v58, %v6776_v2 }
 0x59a   :  { %v3823_v1 = vmul.f32 -1.442695, %v5927_v50 }
 0x59b   :  { %v3824_v44 = vmul.f32 -1.442695, %v5928_v39 }
 0x59c   :  { %6041 = vpow2.f32 %v3823_v1 }
 0x59d   :  { %6043 = vpow2.f32 %v3824_v44 }
 0x5a6   :  { %v6042_v6 = vpop.eup %6041 }
 0x5a7   :  { %v1297_v7 = vadd.f32 1.0, %v6042_v6  ;;  %v6044_v11 = vpop.eup %6043 }
 0x5a8   :  { %v1298_v13 = vadd.f32 1.0, %v6044_v11 }
 0x5a9   :  { %6045 = vrcp.f32 %v1297_v7 }
 0x5aa   :  { %6047 = vrcp.f32 %v1298_v13 }
 0x5b3   :  { %v6046_v18 = vpop.eup %6045 }
 0x5b4   :  { %v1304_v20 = vmul.f32 %v6046_v18, %v1303_v17  ;;  %v6048_v25 = vpop.eup %6047 }
 0x5b5   :  { %v1307_v27 = vsub.f32 1.0, %v6048_v25  ;;  %v1309_v35 = vmul.f32 %v6048_v25, %v6922_v46 }
 0x5b6   :  { %v1305_v24 = vadd.f32 %v1304_v20, %v6773_v60 }
 0x5b8   :  { %6049 = vtanh.f32 %v1305_v24 }
 0x5c2   :  { %v6050_v30 = vpop.eup %6049 }
 0x5c3   :  { %v1308_v32 = vmul.f32 %v6050_v30, %v1307_v27 }
 0x5c5   :  { %v6966_v38 = vadd.f32 %v1309_v35, %v1308_v32  ;;  %v1816_v32 = vld [vmem:[#allocation9] sm:$0xff]  ;;  %v1819_v35 = vld [vmem:[#allocation9 + $0x18] sm:$0xff] }
 0x5c7   :  { %1378 = vmatmul.mubr.f32.vlgmr.msra.gmra.mrb[10].mxu0 %v6966_v38  ;;  %4432 = vmatmul.mubr.f32.vlgmr.msra.gmra.mrb[18].mxu1 %v6966_v38 }
 0x5c8   :  { %5210 = vmatpush1.bf16.msra.mxu0 %v6606_v15  ;;  %5241 = vmatpush3.bf16.msra.mxu1 %v6628_v40 }
 0x5c9   :  { %5212 = vmatprep.subr.bf16.mxu0 %v6609_v16  ;;  %5242 = vmatprep.subr.bf16.mxu1 %v6388_v48 }
 0x5ca   :  { %1542 = vmatprep.mubr.f32.mxu0 %v6387_v0  ;;  %4466 = vmatprep.mubr.msk.f32.mxu1 %vm6389_vm1, %v6387_v0 }
 0x5cc   :  { %5214 = vmatpush1.bf16.msra.mxu0 %v6614_v22  ;;  %5244 = vmatpush3.bf16.msra.mxu1 %v6641_v51 }
 0x5cd   :  { %5216 = vmatprep.subr.bf16.mxu0 %v6617_v23  ;;  %5245 = vmatprep.subr.bf16.mxu1 %v6388_v48 }
 0x5d0   :  { %5218 = vmatpush1.bf16.msra.mxu0 %v6622_v31  ;;  %5247 = vmatpush3.bf16.msra.mxu1 %v6654_v61 }
 0x5d1   :  { %5220 = vmatprep.subr.bf16.mxu0 %v6625_v33  ;;  %5248 = vmatprep.subr.bf16.mxu1 %v6388_v48 }
 0x5d4   :  { %5222 = vmatpush1.bf16.msra.mxu0 %v6632_v42  ;;  %5250 = vmatpush3.bf16.msra.mxu1 %v6667_v8 }
 0x5d5   :  { %5224 = vmatprep.subr.bf16.mxu0 %v6635_v45  ;;  %5251 = vmatprep.subr.bf16.mxu1 %v6388_v48 }
 0x5d8   :  { %5226 = vmatpush1.bf16.msra.mxu0 %v6645_v53  ;;  %5253 = vmatpush3.bf16.msra.mxu1 %v6680_v19 }
 0x5d9   :  { %5228 = vmatprep.subr.bf16.mxu0 %v6648_v56  ;;  %5254 = vmatprep.subr.bf16.mxu1 %v6388_v48 }
 0x5dc   :  { %5230 = vmatpush1.bf16.msra.mxu0 %v6658_v63  ;;  %5256 = vmatpush3.bf16.msra.mxu1 %v6691_v26 }
 0x5dd   :  { %5232 = vmatprep.subr.bf16.mxu0 %v6661_v3  ;;  %5257 = vmatprep.subr.bf16.mxu1 %v6388_v48 }
 0x5e0   :  { %5234 = vmatpush1.bf16.msra.mxu0 %v6671_v10  ;;  %5259 = vmatpush3.bf16.msra.mxu1 %v6701_v29 }
 0x5e1   :  { %5236 = vmatprep.subr.bf16.mxu0 %v6674_v14  ;;  %5260 = vmatprep.subr.bf16.mxu1 %v6388_v48 }
 0x5e4   :  { %5238 = vmatpush1.bf16.msra.mxu0 %v6684_v21  ;;  %5262 = vmatpush3.bf16.msra.mxu1 %v6710_v34 }
 0x5e5   :  { %5264 = vmatprep.subr.bf16.mxu0 %v6604_v12  ;;  %5295 = vmatprep.subr.bf16.mxu1 %v6388_v48 }
 0x69a   :  { %v1379_v60 = vpop.f32.mrb[10].mxu0  ;;  %v1450_v41 = vpop.f32.mrb[18].mxu1 }
 0x69b   :  { %v5929_v47 = vadd.f32 %v1379_v60, %v6771_v59  ;;  %v1381_v49 = vpop.f32.mrb[11].mxu0  ;;  %v4433_v50 = vpop.f32.mrb[19].mxu1  ;;  %v1468_v12 = vadd.f32 %v6787_v28, %v1450_v41  ;;  %v1823_v41 = vld [vmem:[#allocation9 + $0x38] sm:$0xff] }
 0x69c   :  { %v5930_v43 = vadd.f32 %v1381_v49, %v6776_v2 }
 0x69d   :  { %v3825_v58 = vmul.f32 -1.442695, %v5929_v47  ;;  %v1826_v47 = vld [vmem:[#allocation9 + $0x50] sm:$0xff] }
 0x69e   :  { %v3826_v1 = vmul.f32 -1.442695, %v5930_v43  ;;  %v1827_v43 = vld [vmem:[#allocation9 + $0x58] sm:$0xff] }
 0x69f   :  { %6051 = vpow2.f32 %v3825_v58  ;;  %v1824_v58 = vld [vmem:[#allocation9 + $0x40] sm:$0xff] }
 0x6a0   :  { %6053 = vpow2.f32 %v3826_v1  ;;  %v5321_v1 = vpack.c.bf16 %v1819_v35, %v1816_v32  ;;  %v1846_v32 = vld [vmem:[#allocation9 + $0xf0] sm:$0xff]  ;;  %v1849_v35 = vld [vmem:[#allocation9 + $0x108] sm:$0xff] }
 0x6a9   :  { %v6052_v39 = vpop.eup %6051 }
 0x6aa   :  { %v1462_v44 = vadd.f32 1.0, %v6052_v39  ;;  %v6054_v6 = vpop.eup %6053  ;;  %v5323_v39 = vpack.c.bf16 %v1826_v47, %v1823_v41  ;;  %v1856_v41 = vld [vmem:[#allocation9 + $0x140] sm:$0xff]  ;;  %v1854_v47 = vld [vmem:[#allocation9 + $0x130] sm:$0xff] }
 0x6ab   :  { %v1463_v7 = vadd.f32 1.0, %v6054_v6  ;;  %v1825_v6 = vld [vmem:[#allocation9 + $0x48] sm:$0xff] }
 0x6ac   :  { %6055 = vrcp.f32 %v1462_v44  ;;  %v1822_v44 = vld [vmem:[#allocation9 + $0x30] sm:$0xff] }
 0x6ad   :  { %6057 = vrcp.f32 %v1463_v7  ;;  %v5355_v7 = vpack.c.bf16 %v1827_v43, %v1824_v58 }
 0x6b6   :  { %v6056_v11 = vpop.eup %6055 }
 0x6b7   :  { %v1469_v13 = vmul.f32 %v6056_v11, %v1468_v12  ;;  %v6058_v18 = vpop.eup %6057  ;;  %v1832_v12 = vld [vmem:[#allocation9 + $0x80] sm:$0xff]  ;;  %v1830_v11 = vld [vmem:[#allocation9 + $0x70] sm:$0xff] }
 0x6b8   :  { %v1472_v20 = vsub.f32 1.0, %v6058_v18  ;;  %v1474_v27 = vmul.f32 %v6058_v18, %v6966_v38 }
 0x6b9   :  { %v1470_v17 = vadd.f32 %v1469_v13, %v6768_v57  ;;  %v1833_v13 = vld [vmem:[#allocation9 + $0x88] sm:$0xff] }
 0x6bb   :  { %6059 = vtanh.f32 %v1470_v17  ;;  %v5325_v17 = vpack.c.bf16 %v1825_v6, %v1822_v44  ;;  %v1859_v44 = vld [vmem:[#allocation9 + $0x158] sm:$0xff]  ;;  %v1862_v6 = vld [vmem:[#allocation9 + $0x170] sm:$0xff] }
 0x6c5   :  { %v6060_v24 = vpop.eup %6059 }
 0x6c6   :  { %v1473_v25 = vmul.f32 %v6060_v24, %v1472_v20  ;;  %v5359_v20 = vpack.c.bf16 %v1833_v13, %v1830_v11  ;;  %v1828_v24 = vld [vmem:[#allocation9 + $0x60] sm:$0xff]  ;;  %v5347_v11 = vpack.c.bf16 %v1862_v6, %v1859_v44  ;;  %v2142_v6 = vld [vmem:[#allocation11 + $0x158] sm:$0xff] }
 0x6c8   :  { %v7010_v30 = vadd.f32 %v1474_v27, %v1473_v25  ;;  %v1831_v25 = vld [vmem:[#allocation9 + $0x78] sm:$0xff] }
 0x6c9   :  { %v1835_v27 = vld [vmem:[#allocation9 + $0x98] sm:$0xff] }
 0x6ca   :  { %1543 = vmatmul.mubr.f32.vlgmr.msra.gmra.mrb[12].mxu0 %v7010_v30  ;;  %4467 = vmatmul.mubr.f32.vlgmr.msra.gmra.mrb[20].mxu1 %v7010_v30 }
 0x6cb   :  { %5266 = vmatpush1.bf16.msra.mxu0 %v6606_v15  ;;  %5297 = vmatpush3.bf16.msra.mxu1 %v6628_v40  ;;  %v1817_v15 = vld [vmem:[#allocation9 + $0x8] sm:$0xff] }
 0x6cc   :  { %5268 = vmatprep.subr.bf16.mxu0 %v6609_v16  ;;  %5298 = vmatprep.subr.bf16.mxu1 %v6388_v48  ;;  %v1820_v16 = vld [vmem:[#allocation9 + $0x20] sm:$0xff] }
 0x6cd   :  { %1707 = vmatprep.mubr.f32.mxu0 %v6387_v0  ;;  %4501 = vmatprep.mubr.msk.f32.mxu1 %vm6389_vm1, %v6387_v0 }
 0x6cf   :  { %5270 = vmatpush1.bf16.msra.mxu0 %v6614_v22  ;;  %5300 = vmatpush3.bf16.msra.mxu1 %v6641_v51  ;;  %v1818_v22 = vld [vmem:[#allocation9 + $0x10] sm:$0xff] }
 0x6d0   :  { %5272 = vmatprep.subr.bf16.mxu0 %v6617_v23  ;;  %5301 = vmatprep.subr.bf16.mxu1 %v6388_v48  ;;  %v5319_v23 = vpack.c.bf16 %v1820_v16, %v1817_v15  ;;  %v1838_v15 = vld [vmem:[#allocation9 + $0xb0] sm:$0xff]  ;;  %v1836_v16 = vld [vmem:[#allocation9 + $0xa0] sm:$0xff] }
 0x6d3   :  { %5274 = vmatpush1.bf16.msra.mxu0 %v6622_v31  ;;  %5303 = vmatpush3.bf16.msra.mxu1 %v6654_v61  ;;  %v1821_v31 = vld [vmem:[#allocation9 + $0x28] sm:$0xff] }
 0x6d4   :  { %5276 = vmatprep.subr.bf16.mxu0 %v6625_v33  ;;  %5304 = vmatprep.subr.bf16.mxu1 %v6388_v48  ;;  %v5351_v33 = vpack.c.bf16 %v1821_v31, %v1818_v22  ;;  %v1839_v22 = vld [vmem:[#allocation9 + $0xb8] sm:$0xff]  ;;  %v5331_v31 = vpack.c.bf16 %v1838_v15, %v1835_v27  ;;  %v2105_v15 = vld [vmem:[#allocation11 + $0x30] sm:$0xff] }
 0x6d7   :  { %5278 = vmatpush1.bf16.msra.mxu0 %v6632_v42  ;;  %5306 = vmatpush3.bf16.msra.mxu1 %v6667_v8 }
 0x6d8   :  { %5280 = vmatprep.subr.bf16.mxu0 %v6635_v45  ;;  %5307 = vmatprep.subr.bf16.mxu1 %v6388_v48 }
 0x6db   :  { %5282 = vmatpush1.bf16.msra.mxu0 %v6645_v53  ;;  %5309 = vmatpush3.bf16.msra.mxu1 %v6680_v19 }
 0x6dc   :  { %5284 = vmatprep.subr.bf16.mxu0 %v6648_v56  ;;  %5310 = vmatprep.subr.bf16.mxu1 %v6388_v48 }
 0x6df   :  { %5286 = vmatpush1.bf16.msra.mxu0 %v6658_v63  ;;  %5312 = vmatpush3.bf16.msra.mxu1 %v6691_v26 }
 0x6e0   :  { %5288 = vmatprep.subr.bf16.mxu0 %v6661_v3  ;;  %5313 = vmatprep.subr.bf16.mxu1 %v6388_v48 }
 0x6e3   :  { %5290 = vmatpush1.bf16.msra.mxu0 %v6671_v10  ;;  %5315 = vmatpush3.bf16.msra.mxu1 %v6701_v29 }
 0x6e4   :  { %5292 = vmatprep.subr.bf16.mxu0 %v6674_v14  ;;  %5316 = vmatprep.subr.bf16.mxu1 %v6388_v48 }
 0x6e7   :  { %5294 = vmatpush1.bf16.msra.mxu0 %v6684_v21  ;;  %5318 = vmatpush3.bf16.msra.mxu1 %v6710_v34 }
 0x6e8   :  { %5320 = vmatprep.subr.bf16.mxu0 %v5319_v23  ;;  %5352 = vmatprep.subr.bf16.mxu1 %v5351_v33  ;;  %v5329_v23 = vpack.c.bf16 %v1831_v25, %v1828_v24  ;;  %v2099_v24 = vld [vmem:[#allocation11] sm:$0xff] }
 0x79d   :  { %v1544_v40 = vpop.f32.mrb[12].mxu0  ;;  %v1615_v42 = vpop.f32.mrb[20].mxu1 }
 0x79e   :  { %v5931_v45 = vadd.f32 %v1544_v40, %v6771_v59  ;;  %v1546_v51 = vpop.f32.mrb[13].mxu0  ;;  %v4468_v53 = vpop.f32.mrb[21].mxu1  ;;  %v1633_v19 = vadd.f32 %v6787_v28, %v1615_v42  ;;  %v1834_v40 = vld [vmem:[#allocation9 + $0x90] sm:$0xff]  ;;  %v1837_v42 = vld [vmem:[#allocation9 + $0xa8] sm:$0xff] }
 0x79f   :  { %v5932_v61 = vadd.f32 %v1546_v51, %v6776_v2  ;;  %v1844_v51 = vld [vmem:[#allocation9 + $0xe0] sm:$0xff]  ;;  %v1842_v53 = vld [vmem:[#allocation9 + $0xd0] sm:$0xff] }
 0x7a0   :  { %v3827_v56 = vmul.f32 -1.442695, %v5931_v45  ;;  %v1841_v45 = vld [vmem:[#allocation9 + $0xc8] sm:$0xff] }
 0x7a1   :  { %v3828_v63 = vmul.f32 -1.442695, %v5932_v61  ;;  %v5333_v61 = vpack.c.bf16 %v1837_v42, %v1834_v40  ;;  %v2111_v40 = vld [vmem:[#allocation11 + $0x60] sm:$0xff]  ;;  %v2114_v42 = vld [vmem:[#allocation11 + $0x78] sm:$0xff] }
 0x7a2   :  { %6061 = vpow2.f32 %v3827_v56  ;;  %v1845_v56 = vld [vmem:[#allocation9 + $0xe8] sm:$0xff] }
 0x7a3   :  { %6063 = vpow2.f32 %v3828_v63  ;;  %v5335_v63 = vpack.c.bf16 %v1844_v51, %v1841_v45  ;;  %v7093_v45 = vpack.c.bf16 %v2114_v42, %v2111_v40  ;;  %v2118_v51 = vld [vmem:[#allocation11 + $0x98] sm:$0xff] }
 0x7a4   :  { %v2134_v40 = vld [vmem:[#allocation11 + $0x118] sm:$0xff] }
 0x7ac   :  { %v6062_v3 = vpop.eup %6061 }
 0x7ad   :  { %v1627_v8 = vadd.f32 1.0, %v6062_v3  ;;  %v6064_v10 = vpop.eup %6063  ;;  %v5367_v3 = vpack.c.bf16 %v1845_v56, %v1842_v53  ;;  %v2121_v53 = vld [vmem:[#allocation11 + $0xb0] sm:$0xff] }
 0x7ae   :  { %v1628_v14 = vadd.f32 1.0, %v6064_v10  ;;  %v1843_v10 = vld [vmem:[#allocation9 + $0xd8] sm:$0xff]  ;;  %v7097_v56 = vpack.c.bf16 %v2121_v53, %v2118_v51  ;;  %v2137_v51 = vld [vmem:[#allocation11 + $0x130] sm:$0xff]  ;;  %v2140_v53 = vld [vmem:[#allocation11 + $0x148] sm:$0xff] }
 0x7af   :  { %6065 = vrcp.f32 %v1627_v8  ;;  %v1840_v8 = vld [vmem:[#allocation9 + $0xc0] sm:$0xff] }
 0x7b0   :  { %6067 = vrcp.f32 %v1628_v14  ;;  %v1847_v14 = vld [vmem:[#allocation9 + $0xf8] sm:$0xff] }
 0x7b9   :  { %v6066_v21 = vpop.eup %6065 }
 0x7ba   :  { %v1634_v26 = vmul.f32 %v6066_v21, %v1633_v19  ;;  %v6068_v34 = vpop.eup %6067  ;;  %v1850_v19 = vld [vmem:[#allocation9 + $0x110] sm:$0xff]  ;;  %v1848_v21 = vld [vmem:[#allocation9 + $0x100] sm:$0xff] }
 0x7bb   :  { %v1637_v57 = vsub.f32 1.0, %v6068_v34  ;;  %v1639_v50 = vmul.f32 %v6068_v34, %v7010_v30  ;;  %v5339_v34 = vpack.c.bf16 %v1850_v19, %v1847_v14  ;;  %v2123_v19 = vld [vmem:[#allocation11 + $0xc0] sm:$0xff] }
 0x7bc   :  { %v1635_v29 = vadd.f32 %v1634_v26, %v6781_v9  ;;  %v1829_v9 = vld [vmem:[#allocation9 + $0x68] sm:$0xff]  ;;  %v1851_v26 = vld [vmem:[#allocation9 + $0x118] sm:$0xff] }
 0x7bd   :  { %v5327_v18 = vpack.c.bf16 %v1832_v12, %v1829_v9  ;;  %v1860_v9 = vld [vmem:[#allocation9 + $0x160] sm:$0xff] }
 0x7be   :  { %6069 = vtanh.f32 %v1635_v29  ;;  %v5337_v29 = vpack.c.bf16 %v1843_v10, %v1840_v8  ;;  %v2124_v8 = vld [vmem:[#allocation11 + $0xc8] sm:$0xff]  ;;  %v2127_v10 = vld [vmem:[#allocation11 + $0xe0] sm:$0xff] }
 0x7bf   :  { %v7103_v14 = vpack.c.bf16 %v2127_v10, %v2124_v8  ;;  %v2146_v8 = vld [vmem:[#allocation11 + $0x178] sm:$0xff] }
 0x7c8   :  { %v6070_v60 = vpop.eup %6069 }
 0x7c9   :  { %v1638_v49 = vmul.f32 %v6070_v60, %v1637_v57  ;;  %v5371_v57 = vpack.c.bf16 %v1851_v26, %v1848_v21  ;;  %v1853_v60 = vld [vmem:[#allocation9 + $0x128] sm:$0xff]  ;;  %v2126_v21 = vld [vmem:[#allocation11 + $0xd8] sm:$0xff] }
 0x7ca   :  { %v5343_v58 = vpack.c.bf16 %v1856_v41, %v1853_v60  ;;  %v7105_v26 = vpack.c.bf16 %v2126_v21, %v2123_v19  ;;  %v2136_v41 = vld [vmem:[#allocation11 + $0x128] sm:$0xff] }
 0x7cb   :  { %v7052_v28 = vadd.f32 %v1639_v50, %v1638_v49  ;;  %v1857_v49 = vld [vmem:[#allocation9 + $0x148] sm:$0xff]  ;;  %v5341_v50 = vpack.c.bf16 %v1849_v35, %v1846_v32  ;;  %v2129_v32 = vld [vmem:[#allocation11 + $0xf0] sm:$0xff] }
 0x7cc   :  { %v5375_v43 = vpack.c.bf16 %v1857_v49, %v1854_v47  ;;  %v2132_v35 = vld [vmem:[#allocation11 + $0x108] sm:$0xff]  ;;  %v2139_v47 = vld [vmem:[#allocation11 + $0x140] sm:$0xff] }
 0x7cd   :  { %1708 = vmatmul.mubr.f32.vlgmr.msra.gmra.mrb[14].mxu0 %v7052_v28  ;;  %4502 = vmatmul.mubr.f32.vlgmr.msra.gmra.mrb[22].mxu1 %v7052_v28  ;;  %v7111_v60 = vpack.c.bf16 %v2132_v35, %v2129_v32  ;;  %v2135_v49 = vld [vmem:[#allocation11 + $0x120] sm:$0xff] }
 0x7ce   :  { %5322 = vmatpush1.bf16.msra.mxu0 %v5321_v1  ;;  %5354 = vmatpush3.bf16.msra.mxu1 %v5351_v33  ;;  %v5363_v33 = vpack.c.bf16 %v1839_v22, %v1836_v16  ;;  %v1852_v1 = vld [vmem:[#allocation9 + $0x120] sm:$0xff]  ;;  %v2108_v16 = vld [vmem:[#allocation11 + $0x48] sm:$0xff] }
 0x7cf   :  { %4536 = vmatprep.mubr.f32.mxu1 %v6790_v5  ;;  %5324 = vmatprep.subr.bf16.mxu0 %v5323_v39  ;;  %v1855_v39 = vld [vmem:[#allocation9 + $0x138] sm:$0xff]  ;;  %v7087_v22 = vpack.c.bf16 %v2108_v16, %v2105_v15  ;;  %v2125_v15 = vld [vmem:[#allocation11 + $0xd0] sm:$0xff]  ;;  %v2128_v16 = vld [vmem:[#allocation11 + $0xe8] sm:$0xff] }
 0x7d0   :  { %5356 = vmatprep.subr.bf16.mxu1 %v5355_v7  ;;  %1945 = vmatprep.mubr.f32.mxu0 %v6387_v0  ;;  %v5345_v12 = vpack.c.bf16 %v1855_v39, %v1852_v1  ;;  %v2104_v1 = vld [vmem:[#allocation11 + $0x28] sm:$0xff] }
 0x7d2   :  { %5326 = vmatpush1.bf16.msra.mxu0 %v5325_v17  ;;  %5358 = vmatpush3.bf16.msra.mxu1 %v5355_v7  ;;  %v1863_v7 = vld [vmem:[#allocation9 + $0x178] sm:$0xff]  ;;  %v1858_v17 = vld [vmem:[#allocation9 + $0x150] sm:$0xff] }
 0x7d3   :  { %5328 = vmatprep.subr.bf16.mxu0 %v5327_v18  ;;  %5360 = vmatprep.subr.bf16.mxu1 %v5359_v20  ;;  %v5379_v13 = vpack.c.bf16 %v1863_v7, %v1860_v9  ;;  %v1861_v18 = vld [vmem:[#allocation9 + $0x168] sm:$0xff]  ;;  %v2145_v9 = vld [vmem:[#allocation11 + $0x170] sm:$0xff] }
 0x7d4   :  { %v7124_v7 = vpack.c.bf16 %v2145_v9, %v2142_v6  ;;  %v6161_v6 = vld [vmem:[%s7559_s4] ss:$0 sm:$0xff] }
 0x7d6   :  { %5330 = vmatpush1.bf16.msra.mxu0 %v5329_v23  ;;  %5362 = vmatpush3.bf16.msra.mxu1 %v5359_v20  ;;  %v5349_v20 = vpack.c.bf16 %v1861_v18, %v1858_v17  ;;  %v2112_v23 = vld [vmem:[#allocation11 + $0x68] sm:$0xff]  ;;  %v2107_v17 = vld [vmem:[#allocation11 + $0x40] sm:$0xff]  ;;  %v2110_v18 = vld [vmem:[#allocation11 + $0x58] sm:$0xff] }
 0x7d7   :  { %5332 = vmatprep.subr.bf16.mxu0 %v5331_v31  ;;  %5364 = vmatprep.subr.bf16.mxu1 %v5363_v33  ;;  %v2115_v31 = vld [vmem:[#allocation11 + $0x80] sm:$0xff] }
 0x7da   :  { %5334 = vmatpush1.bf16.msra.mxu0 %v5333_v61  ;;  %5366 = vmatpush3.bf16.msra.mxu1 %v5363_v33  ;;  %v7091_v33 = vpack.c.bf16 %v2115_v31, %v2112_v23  ;;  %v2117_v61 = vld [vmem:[#allocation11 + $0x90] sm:$0xff]  ;;  %v7143_v23 = vpack.c.bf16 %v2128_v16, %v2125_v15  ;;  %v2131_v31 = vld [vmem:[#allocation11 + $0x100] sm:$0xff] }
 0x7db   :  { %5336 = vmatprep.subr.bf16.mxu0 %v5335_v63  ;;  %5368 = vmatprep.subr.bf16.mxu1 %v5367_v3  ;;  %v2120_v63 = vld [vmem:[#allocation11 + $0xa8] sm:$0xff]  ;;  %v7147_v42 = vpack.c.bf16 %v2134_v40, %v2131_v31 }
 0x7de   :  { %5338 = vmatpush1.bf16.msra.mxu0 %v5337_v29  ;;  %5370 = vmatpush3.bf16.msra.mxu1 %v5367_v3  ;;  %v7099_v3 = vpack.c.bf16 %v2120_v63, %v2117_v61  ;;  %v2130_v29 = vld [vmem:[#allocation11 + $0xf8] sm:$0xff]  ;;  %v7151_v61 = vpack.c.bf16 %v2140_v53, %v2137_v51  ;;  %v2143_v63 = vld [vmem:[#allocation11 + $0x160] sm:$0xff] }
 0x7df   :  { %5340 = vmatprep.subr.bf16.mxu0 %v5339_v34  ;;  %5372 = vmatprep.subr.bf16.mxu1 %v5371_v57  ;;  %v2133_v34 = vld [vmem:[#allocation11 + $0x110] sm:$0xff]  ;;  %v7155_v10 = vpack.c.bf16 %v2146_v8, %v2143_v63 }
 0x7e2   :  { %5342 = vmatpush1.bf16.msra.mxu0 %v5341_v50  ;;  %5374 = vmatpush3.bf16.msra.mxu1 %v5371_v57  ;;  %v7109_v57 = vpack.c.bf16 %v2133_v34, %v2130_v29  ;;  %v7115_v50 = vpack.c.bf16 %v2139_v47, %v2136_v41 }
 0x7e3   :  { %5344 = vmatprep.subr.bf16.mxu0 %v5343_v58  ;;  %5376 = vmatprep.subr.bf16.mxu1 %v5375_v43  ;;  %v2138_v58 = vld [vmem:[#allocation11 + $0x138] sm:$0xff] }
 0x7e4   :  { %v7117_v39 = vpack.c.bf16 %v2138_v58, %v2135_v49 }
 0x7e6   :  { %5346 = vmatpush1.bf16.msra.mxu0 %v5345_v12  ;;  %5378 = vmatpush3.bf16.msra.mxu1 %v5375_v43  ;;  %v2101_v43 = vld [vmem:[#allocation11 + $0x10] sm:$0xff] }
 0x7e7   :  { %5348 = vmatprep.subr.bf16.mxu0 %v5347_v11  ;;  %5380 = vmatprep.subr.bf16.mxu1 %v5379_v13  ;;  %v7119_v44 = vpack.c.bf16 %v2104_v1, %v2101_v43  ;;  %v2141_v12 = vld [vmem:[#allocation11 + $0x150] sm:$0xff]  ;;  %v2144_v11 = vld [vmem:[#allocation11 + $0x168] sm:$0xff] }
 0x7ea   :  { %5350 = vmatpush1.bf16.msra.mxu0 %v5349_v20  ;;  %5382 = vmatpush3.bf16.msra.mxu1 %v5379_v13  ;;  %v7127_v13 = vpack.c.bf16 %v2144_v11, %v2141_v12  ;;  %v7130_v20 = vpack.c.bf16 %v2110_v18, %v2107_v17 }
 0x7eb   :  { %5415 = vmatprep.subr.bf16.mxu1 %v6388_v48 }
 0x7ed   :  { %1946 = vmatmul.mubr.f32.vlgmr.msra.gmra.mrb[16].mxu0 %v6790_v5  ;;  %4537 = vmatmul.mubr.f32.vlgmr.msra.gmra.mrb[24].mxu1 %v6834_v62  ;;  %v2100_v5 = vld [vmem:[#allocation11 + $0x8] sm:$0xff] }
 0x7ee   :  { %4539 = vmatprep.mubr.f32.mxu1 %v6878_v54  ;;  %1951 = vmatprep.mubr.f32.mxu0 %v6387_v0 }
 0x7ef   :  { %5417 = vmatpush3.bf16.msra.mxu1 %v7119_v44 }
 0x7f0   :  { %5418 = vmatprep.subr.bf16.mxu1 %v6388_v48 }
 0x7f1   :  { %1952 = vmatmul.mubr.f32.gmra.mrb[18].mxu0 %v6834_v62  ;;  %4540 = vmatmul.mubr.f32.gmra.mrb[26].mxu1 %v6922_v46  ;;  %v2103_v62 = vld [vmem:[#allocation11 + $0x20] sm:$0xff] }
 0x7f2   :  { %4542 = vmatprep.mubr.f32.mxu1 %v6966_v38  ;;  %1957 = vmatprep.mubr.f32.mxu0 %v6387_v0 }
 0x7f3   :  { %5420 = vmatpush3.bf16.msra.mxu1 %v7130_v20 }
 0x7f4   :  { %5421 = vmatprep.subr.bf16.mxu1 %v6388_v48 }
 0x7f5   :  { %1958 = vmatmul.mubr.f32.gmra.mrb[20].mxu0 %v6878_v54  ;;  %4543 = vmatmul.mubr.f32.gmra.mrb[28].mxu1 %v7010_v30  ;;  %v7079_v54 = vpack.c.bf16 %v2103_v62, %v2100_v5  ;;  %v2113_v5 = vld [vmem:[#allocation11 + $0x70] sm:$0xff]  ;;  %v2116_v62 = vld [vmem:[#allocation11 + $0x88] sm:$0xff] }
 0x7f6   :  { %4545 = vmatprep.mubr.f32.mxu1 %v7052_v28  ;;  %1963 = vmatprep.mubr.f32.mxu0 %v6387_v0 }
 0x7f7   :  { %5384 = vmatprep.subr.bf16.mxu0 %v7079_v54 }
 0x7f9   :  { %1964 = vmatmul.mubr.f32.gmra.mrb[22].mxu0 %v6922_v46  ;;  %v2102_v46 = vld [vmem:[#allocation11 + $0x18] sm:$0xff] }
 0x7fa   :  { %1969 = vmatprep.mubr.f32.mxu0 %v6387_v0  ;;  %v7081_v25 = vpack.c.bf16 %v2102_v46, %v2099_v24  ;;  %v2119_v24 = vld [vmem:[#allocation11 + $0xa0] sm:$0xff]  ;;  %v7136_v46 = vpack.c.bf16 %v2116_v62, %v2113_v5 }
 0x7fc   :  { %5386 = vmatpush1.bf16.msra.mxu0 %v7081_v25  ;;  %5423 = vmatpush3.bf16.msra.mxu1 %v7136_v46 }
 0x7fd   :  { %1970 = vmatmul.mubr.f32.gmra.mrb[24].mxu0 %v6966_v38  ;;  %v2106_v38 = vld [vmem:[#allocation11 + $0x38] sm:$0xff]  ;;  %5424 = vmatprep.subr.bf16.mxu1 %v6388_v48 }
 0x7fe   :  { %1975 = vmatprep.mubr.f32.mxu0 %v6387_v0 }
 0x801   :  { %1976 = vmatmul.mubr.f32.gmra.mrb[26].mxu0 %v7010_v30  ;;  %v2109_v30 = vld [vmem:[#allocation11 + $0x50] sm:$0xff] }
 0x802   :  { %1981 = vmatprep.mubr.f32.mxu0 %v6387_v0  ;;  %v7085_v27 = vpack.c.bf16 %v2109_v30, %v2106_v38  ;;  %v2122_v38 = vld [vmem:[#allocation11 + $0xb8] sm:$0xff] }
 0x803   :  { %v7139_v30 = vpack.c.bf16 %v2122_v38, %v2119_v24 }
 0x804   :  { %5388 = vmatprep.subr.bf16.mxu0 %v7085_v27 }
 0x805   :  { %1982 = vmatmul.mubr.f32.gmra.mrb[28].mxu0 %v7052_v28  ;;  %5426 = vmatpush3.bf16.msra.mxu1 %v7139_v30 }
 0x806   :  { %1987 = vmatprep.mubr.f32.mxu0 %v6387_v0  ;;  %5390 = vmatpush1.bf16.msra.mxu0 %v7087_v22 }
 0x807   :  { %5392 = vmatprep.subr.bf16.mxu0 %v7091_v33  ;;  %5427 = vmatprep.subr.bf16.mxu1 %v6388_v48 }
 0x809   :  { %5429 = vmatpush3.bf16.msra.mxu1 %v7143_v23 }
 0x80a   :  { %5394 = vmatpush1.bf16.msra.mxu0 %v7093_v45  ;;  %5430 = vmatprep.subr.bf16.mxu1 %v6388_v48 }
 0x80b   :  { %5396 = vmatprep.subr.bf16.mxu0 %v7097_v56 }
 0x80d   :  { %5432 = vmatpush3.bf16.msra.mxu1 %v7147_v42 }
 0x80e   :  { %5398 = vmatpush1.bf16.msra.mxu0 %v7099_v3  ;;  %5433 = vmatprep.subr.bf16.mxu1 %v6388_v48 }
 0x80f   :  { %5400 = vmatprep.subr.bf16.mxu0 %v7103_v14 }
 0x811   :  { %5435 = vmatpush3.bf16.msra.mxu1 %v7151_v61 }
 0x812   :  { %5402 = vmatpush1.bf16.msra.mxu0 %v7105_v26  ;;  %5436 = vmatprep.subr.bf16.mxu1 %v6388_v48 }
 0x813   :  { %5404 = vmatprep.subr.bf16.mxu0 %v7109_v57 }
 0x815   :  { %5438 = vmatpush3.bf16.msra.mxu1 %v7155_v10 }
 0x816   :  { %5406 = vmatpush1.bf16.msra.mxu0 %v7111_v60  ;;  %5471 = vmatprep.subr.bf16.mxu1 %v6388_v48 }
 0x817   :  { %5408 = vmatprep.subr.bf16.mxu0 %v7115_v50 }
 0x81a   :  { %5410 = vmatpush1.bf16.msra.mxu0 %v7117_v39 }
 0x81b   :  { %5412 = vmatprep.subr.bf16.mxu0 %v7124_v7 }
 0x81e   :  { %5414 = vmatpush1.bf16.msra.mxu0 %v7127_v13 }
 0x81f   :  { %5440 = vmatprep.subr.bf16.mxu0 %v7079_v54 }
 0x8a0   :  { %v1709_v19 = vpop.f32.mrb[14].mxu0  ;;  %v1780_v21 = vpop.f32.mrb[22].mxu1 }
 0x8a1   :  { %v5933_v29 = vadd.f32 %v1709_v19, %v6771_v59  ;;  %v1711_v34 = vpop.f32.mrb[15].mxu0  ;;  %v4503_v32 = vpop.f32.mrb[23].mxu1  ;;  %v1798_v9 = vadd.f32 %v6161_v6, %v1780_v21 }
 0x8a2   :  { %v5934_v41 = vadd.f32 %v1711_v34, %v6776_v2 }
 0x8a3   :  { %v3829_v35 = vmul.f32 -1.442695, %v5933_v29 }
 0x8a4   :  { %v3830_v47 = vmul.f32 -1.442695, %v5934_v41 }
 0x8a5   :  { %6071 = vpow2.f32 %v3829_v35 }
 0x8a6   :  { %6073 = vpow2.f32 %v3830_v47 }
 0x8af   :  { %v6072_v49 = vpop.eup %6071 }
 0x8b0   :  { %v1792_v58 = vadd.f32 1.0, %v6072_v49  ;;  %v6074_v43 = vpop.eup %6073 }
 0x8b1   :  { %v1793_v1 = vadd.f32 1.0, %v6074_v43 }
 0x8b2   :  { %6075 = vrcp.f32 %v1792_v58 }
 0x8b3   :  { %6077 = vrcp.f32 %v1793_v1  ;;  %v7237_v1 = vld [vmem:[%s7563_s8] ss:$0 sm:$0xff] }
 0x8bc   :  { %v6076_v12 = vpop.eup %6075 }
 0x8bd   :  { %v1799_v59 = vmul.f32 %v6076_v12, %v1798_v9  ;;  %v6078_v62 = vpop.eup %6077 }
 0x8be   :  { %v1802_v15 = vsub.f32 1.0, %v6078_v62  ;;  %v1804_v40 = vmul.f32 %v6078_v62, %v7052_v28  ;;  %v1864_v28 = vld [vmem:[%s7561_s6] sm:$0x7] }
 0x8bf   :  { %v1800_v11 = vadd.f32 %v1799_v59, %v6778_v4  ;;  %v7227_v63 = vrot.slane %v1864_v28, %v6763_v52  ;;  %v7230_v19 = vrot.slane %v1864_v28, %v6766_v55  ;;  %v7241_v6 = vrot.slane %v1864_v28, %v186_v37 }
 0x8c0   :  { %v7166_v17 = vpop.f32.mrb[24].mxu1 }
 0x8c1   :  { %6079 = vtanh.f32 %v1800_v11  ;;  %v7168_v2 = vpop.f32.mrb[25].mxu1 }
 0x8c2   :  { %v2061_v11 = vadd.f32 %v7168_v2, %v7241_v6 }
 0x8c4   :  { %v7170_v18 = vpop.f32.mrb[26].mxu1 }
 0x8c5   :  { %v7172_v5 = vpop.f32.mrb[27].mxu1 }
 0x8c8   :  { %v7174_v24 = vpop.f32.mrb[28].mxu1 }
 0x8c9   :  { %v7176_v38 = vpop.f32.mrb[29].mxu1 }
 0x8cb   :  { %v6080_v16 = vpop.eup %6079 }
 0x8cc   :  { %v1803_v31 = vmul.f32 %v6080_v16, %v1802_v15 }
 0x8ce   :  { %v1805_v4 = vadd.f32 %v1804_v40, %v1803_v31 }
 0x8d0   :  { %1988 = vmatmul.mubr.f32.gmra.mrb[30].mxu0 %v1805_v4  ;;  %4546 = vmatmul.mubr.f32.gmra.mrb[30].mxu1 %v1805_v4 }
 0x8d1   :  { %2218 = vmatprep.mubr.f32.mxu0 %v6387_v0  ;;  %4580 = vmatprep.mubr.msk.f32.mxu1 %vm6389_vm1, %v6387_v0 }
 0x8d4   :  { %2219 = vmatmul.mubr.f32.vlgmr.msra.gmra.mrb[16].mxu0 %v6387_v0  ;;  %4581 = vmatmul.mubr.f32.vlgmr.msra.gmra.mrb[32].mxu1 %v6387_v0 }
 0x8d5   :  { %5442 = vmatpush1.bf16.msra.mxu0 %v7081_v25  ;;  %5473 = vmatpush3.bf16.msra.mxu1 %v7119_v44 }
 0x8d6   :  { %5444 = vmatprep.subr.bf16.mxu0 %v7085_v27  ;;  %5474 = vmatprep.subr.bf16.mxu1 %v6388_v48 }
 0x8d7   :  { %2381 = vmatprep.mubr.f32.mxu0 %v6387_v0  ;;  %4615 = vmatprep.mubr.msk.f32.mxu1 %vm6389_vm1, %v6387_v0 }
 0x8d9   :  { %5446 = vmatpush1.bf16.msra.mxu0 %v7087_v22  ;;  %5476 = vmatpush3.bf16.msra.mxu1 %v7130_v20 }
 0x8da   :  { %5448 = vmatprep.subr.bf16.mxu0 %v7091_v33  ;;  %5477 = vmatprep.subr.bf16.mxu1 %v6388_v48 }
 0x8dd   :  { %5450 = vmatpush1.bf16.msra.mxu0 %v7093_v45  ;;  %5479 = vmatpush3.bf16.msra.mxu1 %v7136_v46 }
 0x8de   :  { %5452 = vmatprep.subr.bf16.mxu0 %v7097_v56  ;;  %5480 = vmatprep.subr.bf16.mxu1 %v6388_v48 }
 0x8e1   :  { %5454 = vmatpush1.bf16.msra.mxu0 %v7099_v3  ;;  %5482 = vmatpush3.bf16.msra.mxu1 %v7139_v30 }
 0x8e2   :  { %5456 = vmatprep.subr.bf16.mxu0 %v7103_v14  ;;  %5483 = vmatprep.subr.bf16.mxu1 %v6388_v48 }
 0x8e5   :  { %5458 = vmatpush1.bf16.msra.mxu0 %v7105_v26  ;;  %5485 = vmatpush3.bf16.msra.mxu1 %v7143_v23 }
 0x8e6   :  { %5460 = vmatprep.subr.bf16.mxu0 %v7109_v57  ;;  %5486 = vmatprep.subr.bf16.mxu1 %v6388_v48 }
 0x8e9   :  { %5462 = vmatpush1.bf16.msra.mxu0 %v7111_v60  ;;  %5488 = vmatpush3.bf16.msra.mxu1 %v7147_v42 }
 0x8ea   :  { %5464 = vmatprep.subr.bf16.mxu0 %v7115_v50  ;;  %5489 = vmatprep.subr.bf16.mxu1 %v6388_v48 }
 0x8ed   :  { %5466 = vmatpush1.bf16.msra.mxu0 %v7117_v39  ;;  %5491 = vmatpush3.bf16.msra.mxu1 %v7151_v61 }
 0x8ee   :  { %5468 = vmatprep.subr.bf16.mxu0 %v7124_v7  ;;  %5492 = vmatprep.subr.bf16.mxu1 %v6388_v48 }
 0x8f1   :  { %5470 = vmatpush1.bf16.msra.mxu0 %v7127_v13  ;;  %5494 = vmatpush3.bf16.msra.mxu1 %v7155_v10 }
 0x8f2   :  { %5496 = vmatprep.subr.bf16.mxu0 %v7079_v54  ;;  %5527 = vmatprep.subr.bf16.mxu1 %v6388_v48 }
 0x9a3   :  { %v7222_v51 = vpop.f32.mrb[30].mxu1 }
 0x9a4   :  { %v7224_v53 = vpop.f32.mrb[31].mxu1 }
 0x9a7   :  { %v2220_v8 = vpop.f32.mrb[16].mxu0  ;;  %v2291_v21 = vpop.f32.mrb[32].mxu1 }
 0x9a8   :  { %v5935_v29 = vadd.f32 %v2220_v8, %v7227_v63  ;;  %v2222_v34 = vpop.f32.mrb[17].mxu0  ;;  %v4582_v32 = vpop.f32.mrb[33].mxu1  ;;  %v2309_v12 = vadd.f32 %v7237_v1, %v2291_v21 }
 0x9a9   :  { %v5936_v41 = vadd.f32 %v2222_v34, %v7230_v19 }
 0x9aa   :  { %v3832_v35 = vmul.f32 -1.442695, %v5935_v29 }
 0x9ab   :  { %v3833_v47 = vmul.f32 -1.442695, %v5936_v41 }
 0x9ac   :  { %6081 = vpow2.f32 %v3832_v35 }
 0x9ad   :  { %6083 = vpow2.f32 %v3833_v47 }
 0x9b6   :  { %v6082_v49 = vpop.eup %6081 }
 0x9b7   :  { %v2303_v58 = vadd.f32 1.0, %v6082_v49  ;;  %v6084_v43 = vpop.eup %6083 }
 0x9b8   :  { %v2304_v9 = vadd.f32 1.0, %v6084_v43 }
 0x9b9   :  { %6085 = vrcp.f32 %v2303_v58 }
 0x9ba   :  { %6087 = vrcp.f32 %v2304_v9 }
 0x9c3   :  { %v6086_v59 = vpop.eup %6085 }
 0x9c4   :  { %v2310_v62 = vmul.f32 %v6086_v59, %v2309_v12  ;;  %v6088_v16 = vpop.eup %6087  ;;  %v2066_v12 = vadd.f32 %v7166_v17, %v7241_v6 }
 0x9c5   :  { %v2313_v31 = vsub.f32 1.0, %v6088_v16  ;;  %v2315_v8 = vmul.f32 0.0, %v6088_v16 }
 0x9c6   :  { %v2311_v15 = vadd.f32 %v2310_v62, %v2061_v11 }
 0x9c8   :  { %6089 = vtanh.f32 %v2311_v15 }
 0x9d2   :  { %v6090_v40 = vpop.eup %6089 }
 0x9d3   :  { %v2314_v4 = vmul.f32 %v6090_v40, %v2313_v31 }
 0x9d5   :  { %v7246_v29 = vadd.f32 %v2315_v8, %v2314_v4 }
 0x9d7   :  { %2382 = vmatmul.mubr.f32.vlgmr.msra.gmra.mrb[18].mxu0 %v7246_v29  ;;  %4616 = vmatmul.mubr.f32.vlgmr.msra.gmra.mrb[34].mxu1 %v7246_v29 }
 0x9d8   :  { %5498 = vmatpush1.bf16.msra.mxu0 %v7081_v25  ;;  %5529 = vmatpush3.bf16.msra.mxu1 %v7119_v44 }
 0x9d9   :  { %5500 = vmatprep.subr.bf16.mxu0 %v7085_v27  ;;  %5530 = vmatprep.subr.bf16.mxu1 %v6388_v48 }
 0x9da   :  { %2544 = vmatprep.mubr.f32.mxu0 %v6387_v0  ;;  %4650 = vmatprep.mubr.msk.f32.mxu1 %vm6389_vm1, %v6387_v0 }
 0x9dc   :  { %5502 = vmatpush1.bf16.msra.mxu0 %v7087_v22  ;;  %5532 = vmatpush3.bf16.msra.mxu1 %v7130_v20 }
 0x9dd   :  { %5504 = vmatprep.subr.bf16.mxu0 %v7091_v33  ;;  %5533 = vmatprep.subr.bf16.mxu1 %v6388_v48 }
 0x9e0   :  { %5506 = vmatpush1.bf16.msra.mxu0 %v7093_v45  ;;  %5535 = vmatpush3.bf16.msra.mxu1 %v7136_v46 }
 0x9e1   :  { %5508 = vmatprep.subr.bf16.mxu0 %v7097_v56  ;;  %5536 = vmatprep.subr.bf16.mxu1 %v6388_v48 }
 0x9e4   :  { %5510 = vmatpush1.bf16.msra.mxu0 %v7099_v3  ;;  %5538 = vmatpush3.bf16.msra.mxu1 %v7139_v30 }
 0x9e5   :  { %5512 = vmatprep.subr.bf16.mxu0 %v7103_v14  ;;  %5539 = vmatprep.subr.bf16.mxu1 %v6388_v48 }
 0x9e8   :  { %5514 = vmatpush1.bf16.msra.mxu0 %v7105_v26  ;;  %5541 = vmatpush3.bf16.msra.mxu1 %v7143_v23 }
 0x9e9   :  { %5516 = vmatprep.subr.bf16.mxu0 %v7109_v57  ;;  %5542 = vmatprep.subr.bf16.mxu1 %v6388_v48 }
 0x9ec   :  { %5518 = vmatpush1.bf16.msra.mxu0 %v7111_v60  ;;  %5544 = vmatpush3.bf16.msra.mxu1 %v7147_v42 }
 0x9ed   :  { %5520 = vmatprep.subr.bf16.mxu0 %v7115_v50  ;;  %5545 = vmatprep.subr.bf16.mxu1 %v6388_v48 }
 0x9f0   :  { %5522 = vmatpush1.bf16.msra.mxu0 %v7117_v39  ;;  %5547 = vmatpush3.bf16.msra.mxu1 %v7151_v61 }
 0x9f1   :  { %5524 = vmatprep.subr.bf16.mxu0 %v7124_v7  ;;  %5548 = vmatprep.subr.bf16.mxu1 %v6388_v48 }
 0x9f4   :  { %5526 = vmatpush1.bf16.msra.mxu0 %v7127_v13  ;;  %5550 = vmatpush3.bf16.msra.mxu1 %v7155_v10 }
 0x9f5   :  { %5552 = vmatprep.subr.bf16.mxu0 %v7079_v54  ;;  %5583 = vmatprep.subr.bf16.mxu1 %v6388_v48 }
 0xaaa   :  { %v2383_v36 = vpop.f32.mrb[18].mxu0  ;;  %v2454_v37 = vpop.f32.mrb[34].mxu1 }
 0xaab   :  { %v5937_v2 = vadd.f32 %v2383_v36, %v7227_v63  ;;  %v2385_v28 = vpop.f32.mrb[19].mxu0  ;;  %v4617_v21 = vpop.f32.mrb[35].mxu1  ;;  %v2472_v43 = vadd.f32 %v7237_v1, %v2454_v37 }
 0xaac   :  { %v5938_v32 = vadd.f32 %v2385_v28, %v7230_v19 }
 0xaad   :  { %v3834_v34 = vmul.f32 -1.442695, %v5937_v2 }
 0xaae   :  { %v3835_v35 = vmul.f32 -1.442695, %v5938_v32 }
 0xaaf   :  { %6091 = vpow2.f32 %v3834_v34 }
 0xab0   :  { %6093 = vpow2.f32 %v3835_v35 }
 0xab9   :  { %v6092_v41 = vpop.eup %6091 }
 0xaba   :  { %v2466_v47 = vadd.f32 1.0, %v6092_v41  ;;  %v6094_v49 = vpop.eup %6093 }
 0xabb   :  { %v2467_v58 = vadd.f32 1.0, %v6094_v49 }
 0xabc   :  { %6095 = vrcp.f32 %v2466_v47 }
 0xabd   :  { %6097 = vrcp.f32 %v2467_v58  ;;  %v2071_v58 = vadd.f32 %v7172_v5, %v7241_v6 }
 0xac6   :  { %v6096_v9 = vpop.eup %6095 }
 0xac7   :  { %v2473_v59 = vmul.f32 %v6096_v9, %v2472_v43  ;;  %v6098_v62 = vpop.eup %6097 }
 0xac8   :  { %v2476_v15 = vsub.f32 1.0, %v6098_v62  ;;  %v2478_v40 = vmul.f32 %v6098_v62, %v7246_v29 }
 0xac9   :  { %v2474_v11 = vadd.f32 %v2473_v59, %v2066_v12 }
 0xacb   :  { %6099 = vtanh.f32 %v2474_v11 }
 0xad5   :  { %v6100_v16 = vpop.eup %6099 }
 0xad6   :  { %v2477_v31 = vmul.f32 %v6100_v16, %v2476_v15 }
 0xad8   :  { %v7291_v4 = vadd.f32 %v2478_v40, %v2477_v31 }
 0xada   :  { %2545 = vmatmul.mubr.f32.vlgmr.msra.gmra.mrb[20].mxu0 %v7291_v4  ;;  %4651 = vmatmul.mubr.f32.vlgmr.msra.gmra.mrb[36].mxu1 %v7291_v4 }
 0xadb   :  { %5554 = vmatpush1.bf16.msra.mxu0 %v7081_v25  ;;  %5585 = vmatpush3.bf16.msra.mxu1 %v7119_v44 }
 0xadc   :  { %5556 = vmatprep.subr.bf16.mxu0 %v7085_v27  ;;  %5586 = vmatprep.subr.bf16.mxu1 %v6388_v48 }
 0xadd   :  { %2707 = vmatprep.mubr.f32.mxu0 %v6387_v0  ;;  %4685 = vmatprep.mubr.msk.f32.mxu1 %vm6389_vm1, %v6387_v0 }
 0xadf   :  { %5558 = vmatpush1.bf16.msra.mxu0 %v7087_v22  ;;  %5588 = vmatpush3.bf16.msra.mxu1 %v7130_v20 }
 0xae0   :  { %5560 = vmatprep.subr.bf16.mxu0 %v7091_v33  ;;  %5589 = vmatprep.subr.bf16.mxu1 %v6388_v48 }
 0xae3   :  { %5562 = vmatpush1.bf16.msra.mxu0 %v7093_v45  ;;  %5591 = vmatpush3.bf16.msra.mxu1 %v7136_v46 }
 0xae4   :  { %5564 = vmatprep.subr.bf16.mxu0 %v7097_v56  ;;  %5592 = vmatprep.subr.bf16.mxu1 %v6388_v48 }
 0xae7   :  { %5566 = vmatpush1.bf16.msra.mxu0 %v7099_v3  ;;  %5594 = vmatpush3.bf16.msra.mxu1 %v7139_v30 }
 0xae8   :  { %5568 = vmatprep.subr.bf16.mxu0 %v7103_v14  ;;  %5595 = vmatprep.subr.bf16.mxu1 %v6388_v48 }
 0xaeb   :  { %5570 = vmatpush1.bf16.msra.mxu0 %v7105_v26  ;;  %5597 = vmatpush3.bf16.msra.mxu1 %v7143_v23 }
 0xaec   :  { %5572 = vmatprep.subr.bf16.mxu0 %v7109_v57  ;;  %5598 = vmatprep.subr.bf16.mxu1 %v6388_v48 }
 0xaef   :  { %5574 = vmatpush1.bf16.msra.mxu0 %v7111_v60  ;;  %5600 = vmatpush3.bf16.msra.mxu1 %v7147_v42 }
 0xaf0   :  { %5576 = vmatprep.subr.bf16.mxu0 %v7115_v50  ;;  %5601 = vmatprep.subr.bf16.mxu1 %v6388_v48 }
 0xaf3   :  { %5578 = vmatpush1.bf16.msra.mxu0 %v7117_v39  ;;  %5603 = vmatpush3.bf16.msra.mxu1 %v7151_v61 }
 0xaf4   :  { %5580 = vmatprep.subr.bf16.mxu0 %v7124_v7  ;;  %5604 = vmatprep.subr.bf16.mxu1 %v6388_v48 }
 0xaf7   :  { %5582 = vmatpush1.bf16.msra.mxu0 %v7127_v13  ;;  %5606 = vmatpush3.bf16.msra.mxu1 %v7155_v10 }
 0xaf8   :  { %5608 = vmatprep.subr.bf16.mxu0 %v7079_v54  ;;  %5639 = vmatprep.subr.bf16.mxu1 %v6388_v48 }
 0xbad   :  { %v2546_v17 = vpop.f32.mrb[20].mxu0  ;;  %v2617_v8 = vpop.f32.mrb[36].mxu1 }
 0xbae   :  { %v5939_v29 = vadd.f32 %v2546_v17, %v7227_v63  ;;  %v2548_v36 = vpop.f32.mrb[21].mxu0  ;;  %v4652_v37 = vpop.f32.mrb[37].mxu1  ;;  %v2635_v47 = vadd.f32 %v7237_v1, %v2617_v8 }
 0xbaf   :  { %v5940_v28 = vadd.f32 %v2548_v36, %v7230_v19 }
 0xbb0   :  { %v3836_v2 = vmul.f32 -1.442695, %v5939_v29 }
 0xbb1   :  { %v3837_v21 = vmul.f32 -1.442695, %v5940_v28 }
 0xbb2   :  { %6101 = vpow2.f32 %v3836_v2 }
 0xbb3   :  { %6103 = vpow2.f32 %v3837_v21 }
 0xbbc   :  { %v6102_v34 = vpop.eup %6101 }
 0xbbd   :  { %v2629_v32 = vadd.f32 1.0, %v6102_v34  ;;  %v6104_v35 = vpop.eup %6103 }
 0xbbe   :  { %v2630_v41 = vadd.f32 1.0, %v6104_v35  ;;  %v2076_v35 = vadd.f32 %v7170_v18, %v7241_v6 }
 0xbbf   :  { %6105 = vrcp.f32 %v2629_v32 }
 0xbc0   :  { %6107 = vrcp.f32 %v2630_v41 }
 0xbc9   :  { %v6106_v49 = vpop.eup %6105 }
 0xbca   :  { %v2636_v43 = vmul.f32 %v6106_v49, %v2635_v47  ;;  %v6108_v12 = vpop.eup %6107 }
 0xbcb   :  { %v2639_v59 = vsub.f32 1.0, %v6108_v12  ;;  %v2641_v15 = vmul.f32 %v6108_v12, %v7291_v4 }
 0xbcc   :  { %v2637_v9 = vadd.f32 %v2636_v43, %v2071_v58 }
 0xbce   :  { %6109 = vtanh.f32 %v2637_v9 }
 0xbd8   :  { %v6110_v11 = vpop.eup %6109 }
 0xbd9   :  { %v2640_v62 = vmul.f32 %v6110_v11, %v2639_v59 }
 0xbdb   :  { %v7336_v16 = vadd.f32 %v2641_v15, %v2640_v62 }
 0xbdd   :  { %2708 = vmatmul.mubr.f32.vlgmr.msra.gmra.mrb[22].mxu0 %v7336_v16  ;;  %4686 = vmatmul.mubr.f32.vlgmr.msra.gmra.mrb[38].mxu1 %v7336_v16 }
 0xbde   :  { %5610 = vmatpush1.bf16.msra.mxu0 %v7081_v25  ;;  %5641 = vmatpush3.bf16.msra.mxu1 %v7119_v44 }
 0xbdf   :  { %5612 = vmatprep.subr.bf16.mxu0 %v7085_v27  ;;  %5642 = vmatprep.subr.bf16.mxu1 %v6388_v48 }
 0xbe0   :  { %2870 = vmatprep.mubr.f32.mxu0 %v6387_v0  ;;  %4720 = vmatprep.mubr.msk.f32.mxu1 %vm6389_vm1, %v6387_v0 }
 0xbe2   :  { %5614 = vmatpush1.bf16.msra.mxu0 %v7087_v22  ;;  %5644 = vmatpush3.bf16.msra.mxu1 %v7130_v20 }
 0xbe3   :  { %5616 = vmatprep.subr.bf16.mxu0 %v7091_v33  ;;  %5645 = vmatprep.subr.bf16.mxu1 %v6388_v48 }
 0xbe6   :  { %5618 = vmatpush1.bf16.msra.mxu0 %v7093_v45  ;;  %5647 = vmatpush3.bf16.msra.mxu1 %v7136_v46 }
 0xbe7   :  { %5620 = vmatprep.subr.bf16.mxu0 %v7097_v56  ;;  %5648 = vmatprep.subr.bf16.mxu1 %v6388_v48 }
 0xbea   :  { %5622 = vmatpush1.bf16.msra.mxu0 %v7099_v3  ;;  %5650 = vmatpush3.bf16.msra.mxu1 %v7139_v30 }
 0xbeb   :  { %5624 = vmatprep.subr.bf16.mxu0 %v7103_v14  ;;  %5651 = vmatprep.subr.bf16.mxu1 %v6388_v48 }
 0xbee   :  { %5626 = vmatpush1.bf16.msra.mxu0 %v7105_v26  ;;  %5653 = vmatpush3.bf16.msra.mxu1 %v7143_v23 }
 0xbef   :  { %5628 = vmatprep.subr.bf16.mxu0 %v7109_v57  ;;  %5654 = vmatprep.subr.bf16.mxu1 %v6388_v48 }
 0xbf2   :  { %5630 = vmatpush1.bf16.msra.mxu0 %v7111_v60  ;;  %5656 = vmatpush3.bf16.msra.mxu1 %v7147_v42 }
 0xbf3   :  { %5632 = vmatprep.subr.bf16.mxu0 %v7115_v50  ;;  %5657 = vmatprep.subr.bf16.mxu1 %v6388_v48 }
 0xbf6   :  { %5634 = vmatpush1.bf16.msra.mxu0 %v7117_v39  ;;  %5659 = vmatpush3.bf16.msra.mxu1 %v7151_v61 }
 0xbf7   :  { %5636 = vmatprep.subr.bf16.mxu0 %v7124_v7  ;;  %5660 = vmatprep.subr.bf16.mxu1 %v6388_v48 }
 0xbfa   :  { %5638 = vmatpush1.bf16.msra.mxu0 %v7127_v13  ;;  %5662 = vmatpush3.bf16.msra.mxu1 %v7155_v10 }
 0xbfb   :  { %5664 = vmatprep.subr.bf16.mxu0 %v7079_v54  ;;  %5695 = vmatprep.subr.bf16.mxu1 %v6388_v48 }
 0xcb0   :  { %v2709_v5 = vpop.f32.mrb[22].mxu0  ;;  %v2780_v31 = vpop.f32.mrb[38].mxu1 }
 0xcb1   :  { %v5941_v40 = vadd.f32 %v2709_v5, %v7227_v63  ;;  %v2711_v4 = vpop.f32.mrb[23].mxu0  ;;  %v4687_v17 = vpop.f32.mrb[39].mxu1  ;;  %v2798_v34 = vadd.f32 %v7237_v1, %v2780_v31 }
 0xcb2   :  { %v5942_v29 = vadd.f32 %v2711_v4, %v7230_v19 }
 0xcb3   :  { %v3838_v8 = vmul.f32 -1.442695, %v5941_v40 }
 0xcb4   :  { %v3839_v36 = vmul.f32 -1.442695, %v5942_v29 }
 0xcb5   :  { %6111 = vpow2.f32 %v3838_v8 }
 0xcb6   :  { %6113 = vpow2.f32 %v3839_v36 }
 0xcbf   :  { %v6112_v37 = vpop.eup %6111 }
 0xcc0   :  { %v2792_v2 = vadd.f32 1.0, %v6112_v37  ;;  %v6114_v28 = vpop.eup %6113 }
 0xcc1   :  { %v2793_v21 = vadd.f32 1.0, %v6114_v28 }
 0xcc2   :  { %6115 = vrcp.f32 %v2792_v2  ;;  %v2081_v2 = vadd.f32 %v7176_v38, %v7241_v6 }
 0xcc3   :  { %6117 = vrcp.f32 %v2793_v21 }
 0xccc   :  { %v6116_v32 = vpop.eup %6115 }
 0xccd   :  { %v2799_v41 = vmul.f32 %v6116_v32, %v2798_v34  ;;  %v6118_v49 = vpop.eup %6117 }
 0xcce   :  { %v2802_v58 = vsub.f32 1.0, %v6118_v49  ;;  %v2804_v12 = vmul.f32 %v6118_v49, %v7336_v16 }
 0xccf   :  { %v2800_v47 = vadd.f32 %v2799_v41, %v2076_v35 }
 0xcd1   :  { %6119 = vtanh.f32 %v2800_v47 }
 0xcdb   :  { %v6120_v43 = vpop.eup %6119 }
 0xcdc   :  { %v2803_v9 = vmul.f32 %v6120_v43, %v2802_v58 }
 0xcde   :  { %v7381_v59 = vadd.f32 %v2804_v12, %v2803_v9 }
 0xce0   :  { %2871 = vmatmul.mubr.f32.vlgmr.msra.gmra.mrb[24].mxu0 %v7381_v59  ;;  %4721 = vmatmul.mubr.f32.vlgmr.msra.gmra.mrb[40].mxu1 %v7381_v59 }
 0xce1   :  { %5666 = vmatpush1.bf16.msra.mxu0 %v7081_v25  ;;  %5697 = vmatpush3.bf16.msra.mxu1 %v7119_v44 }
 0xce2   :  { %5668 = vmatprep.subr.bf16.mxu0 %v7085_v27  ;;  %5698 = vmatprep.subr.bf16.mxu1 %v6388_v48 }
 0xce3   :  { %3033 = vmatprep.mubr.f32.mxu0 %v6387_v0  ;;  %4755 = vmatprep.mubr.msk.f32.mxu1 %vm6389_vm1, %v6387_v0 }
 0xce5   :  { %5670 = vmatpush1.bf16.msra.mxu0 %v7087_v22  ;;  %5700 = vmatpush3.bf16.msra.mxu1 %v7130_v20 }
 0xce6   :  { %5672 = vmatprep.subr.bf16.mxu0 %v7091_v33  ;;  %5701 = vmatprep.subr.bf16.mxu1 %v6388_v48 }
 0xce9   :  { %5674 = vmatpush1.bf16.msra.mxu0 %v7093_v45  ;;  %5703 = vmatpush3.bf16.msra.mxu1 %v7136_v46 }
 0xcea   :  { %5676 = vmatprep.subr.bf16.mxu0 %v7097_v56  ;;  %5704 = vmatprep.subr.bf16.mxu1 %v6388_v48 }
 0xced   :  { %5678 = vmatpush1.bf16.msra.mxu0 %v7099_v3  ;;  %5706 = vmatpush3.bf16.msra.mxu1 %v7139_v30 }
 0xcee   :  { %5680 = vmatprep.subr.bf16.mxu0 %v7103_v14  ;;  %5707 = vmatprep.subr.bf16.mxu1 %v6388_v48 }
 0xcf1   :  { %5682 = vmatpush1.bf16.msra.mxu0 %v7105_v26  ;;  %5709 = vmatpush3.bf16.msra.mxu1 %v7143_v23 }
 0xcf2   :  { %5684 = vmatprep.subr.bf16.mxu0 %v7109_v57  ;;  %5710 = vmatprep.subr.bf16.mxu1 %v6388_v48 }
 0xcf5   :  { %5686 = vmatpush1.bf16.msra.mxu0 %v7111_v60  ;;  %5712 = vmatpush3.bf16.msra.mxu1 %v7147_v42 }
 0xcf6   :  { %5688 = vmatprep.subr.bf16.mxu0 %v7115_v50  ;;  %5713 = vmatprep.subr.bf16.mxu1 %v6388_v48 }
 0xcf9   :  { %5690 = vmatpush1.bf16.msra.mxu0 %v7117_v39  ;;  %5715 = vmatpush3.bf16.msra.mxu1 %v7151_v61 }
 0xcfa   :  { %5692 = vmatprep.subr.bf16.mxu0 %v7124_v7  ;;  %5716 = vmatprep.subr.bf16.mxu1 %v6388_v48 }
 0xcfd   :  { %5694 = vmatpush1.bf16.msra.mxu0 %v7127_v13  ;;  %5718 = vmatpush3.bf16.msra.mxu1 %v7155_v10 }
 0xcfe   :  { %5720 = vmatprep.subr.bf16.mxu0 %v7079_v54  ;;  %5751 = vmatprep.subr.bf16.mxu1 %v6388_v48 }
 0xdb3   :  { %v2872_v18 = vpop.f32.mrb[24].mxu0  ;;  %v2943_v11 = vpop.f32.mrb[40].mxu1 }
 0xdb4   :  { %v5943_v62 = vadd.f32 %v2872_v18, %v7227_v63  ;;  %v2874_v15 = vpop.f32.mrb[25].mxu0  ;;  %v4722_v16 = vpop.f32.mrb[41].mxu1  ;;  %v2961_v36 = vadd.f32 %v7237_v1, %v2943_v11 }
 0xdb5   :  { %v5944_v31 = vadd.f32 %v2874_v15, %v7230_v19 }
 0xdb6   :  { %v3840_v5 = vmul.f32 -1.442695, %v5943_v62 }
 0xdb7   :  { %v3841_v40 = vmul.f32 -1.442695, %v5944_v31 }
 0xdb8   :  { %6121 = vpow2.f32 %v3840_v5 }
 0xdb9   :  { %6123 = vpow2.f32 %v3841_v40  ;;  %v2086_v40 = vadd.f32 %v7174_v24, %v7241_v6  ;;  %v3458_v24 = vld [vmem:[#allocation12] sm:$0xff] }
 0xdc2   :  { %v6122_v4 = vpop.eup %6121 }
 0xdc3   :  { %v2955_v17 = vadd.f32 1.0, %v6122_v4  ;;  %v6124_v8 = vpop.eup %6123 }
 0xdc4   :  { %v2956_v29 = vadd.f32 1.0, %v6124_v8 }
 0xdc5   :  { %6125 = vrcp.f32 %v2955_v17 }
 0xdc6   :  { %6127 = vrcp.f32 %v2956_v29 }
 0xdcf   :  { %v6126_v37 = vpop.eup %6125 }
 0xdd0   :  { %v2962_v28 = vmul.f32 %v6126_v37, %v2961_v36  ;;  %v6128_v34 = vpop.eup %6127 }
 0xdd1   :  { %v2965_v32 = vsub.f32 1.0, %v6128_v34  ;;  %v2967_v47 = vmul.f32 %v6128_v34, %v7381_v59  ;;  %v3461_v34 = vld [vmem:[#allocation12 + $0x18] sm:$0xff] }
 0xdd2   :  { %v2963_v21 = vadd.f32 %v2962_v28, %v2081_v2 }
 0xdd4   :  { %6129 = vtanh.f32 %v2963_v21  ;;  %v3460_v21 = vld [vmem:[#allocation12 + $0x10] sm:$0xff] }
 0xdde   :  { %v6130_v35 = vpop.eup %6129 }
 0xddf   :  { %v2966_v41 = vmul.f32 %v6130_v35, %v2965_v32  ;;  %v5835_v32 = vpack.c.bf16 %v3461_v34, %v3460_v21  ;;  %v3462_v35 = vld [vmem:[#allocation12 + $0x20] sm:$0xff]  ;;  %v3579_v21 = vld [vmem:[#allocation14 + $0xd8] sm:$0xff] }
 0xde1   :  { %v7426_v49 = vadd.f32 %v2967_v47, %v2966_v41  ;;  %v3463_v41 = vld [vmem:[#allocation12 + $0x28] sm:$0xff] }
 0xde2   :  { %v5838_v47 = vpack.c.bf16 %v3463_v41, %v3462_v35  ;;  %v3576_v35 = vld [vmem:[#allocation14 + $0xc0] sm:$0xff]  ;;  %v3578_v41 = vld [vmem:[#allocation14 + $0xd0] sm:$0xff] }
 0xde3   :  { %3034 = vmatmul.mubr.f32.vlgmr.msra.gmra.mrb[26].mxu0 %v7426_v49  ;;  %4756 = vmatmul.mubr.f32.vlgmr.msra.gmra.mrb[42].mxu1 %v7426_v49 }
 0xde4   :  { %5722 = vmatpush1.bf16.msra.mxu0 %v7081_v25  ;;  %5753 = vmatpush3.bf16.msra.mxu1 %v7119_v44 }
 0xde5   :  { %5724 = vmatprep.subr.bf16.mxu0 %v7085_v27  ;;  %5754 = vmatprep.subr.bf16.mxu1 %v6388_v48 }
 0xde6   :  { %3196 = vmatprep.mubr.f32.mxu0 %v6387_v0  ;;  %4790 = vmatprep.mubr.msk.f32.mxu1 %vm6389_vm1, %v6387_v0 }
 0xde8   :  { %5726 = vmatpush1.bf16.msra.mxu0 %v7087_v22  ;;  %5756 = vmatpush3.bf16.msra.mxu1 %v7130_v20 }
 0xde9   :  { %5728 = vmatprep.subr.bf16.mxu0 %v7091_v33  ;;  %5757 = vmatprep.subr.bf16.mxu1 %v6388_v48 }
 0xdec   :  { %5730 = vmatpush1.bf16.msra.mxu0 %v7093_v45  ;;  %5759 = vmatpush3.bf16.msra.mxu1 %v7136_v46 }
 0xded   :  { %5732 = vmatprep.subr.bf16.mxu0 %v7097_v56  ;;  %5760 = vmatprep.subr.bf16.mxu1 %v6388_v48 }
 0xdf0   :  { %5734 = vmatpush1.bf16.msra.mxu0 %v7099_v3  ;;  %5762 = vmatpush3.bf16.msra.mxu1 %v7139_v30 }
 0xdf1   :  { %5736 = vmatprep.subr.bf16.mxu0 %v7103_v14  ;;  %5763 = vmatprep.subr.bf16.mxu1 %v6388_v48 }
 0xdf4   :  { %5738 = vmatpush1.bf16.msra.mxu0 %v7105_v26  ;;  %5765 = vmatpush3.bf16.msra.mxu1 %v7143_v23 }
 0xdf5   :  { %5740 = vmatprep.subr.bf16.mxu0 %v7109_v57  ;;  %5766 = vmatprep.subr.bf16.mxu1 %v6388_v48 }
 0xdf8   :  { %5742 = vmatpush1.bf16.msra.mxu0 %v7111_v60  ;;  %5768 = vmatpush3.bf16.msra.mxu1 %v7147_v42 }
 0xdf9   :  { %5744 = vmatprep.subr.bf16.mxu0 %v7115_v50  ;;  %5769 = vmatprep.subr.bf16.mxu1 %v6388_v48 }
 0xdfc   :  { %5746 = vmatpush1.bf16.msra.mxu0 %v7117_v39  ;;  %5771 = vmatpush3.bf16.msra.mxu1 %v7151_v61 }
 0xdfd   :  { %5748 = vmatprep.subr.bf16.mxu0 %v7124_v7  ;;  %5772 = vmatprep.subr.bf16.mxu1 %v6388_v48 }
 0xe00   :  { %5750 = vmatpush1.bf16.msra.mxu0 %v7127_v13  ;;  %5774 = vmatpush3.bf16.msra.mxu1 %v7155_v10 }
 0xe01   :  { %5776 = vmatprep.subr.bf16.mxu0 %v7079_v54  ;;  %5807 = vmatprep.subr.bf16.mxu1 %v6388_v48 }
 0xeb6   :  { %v3035_v38 = vpop.f32.mrb[26].mxu0  ;;  %v3106_v58 = vpop.f32.mrb[42].mxu1 }
 0xeb7   :  { %v5945_v43 = vadd.f32 %v3035_v38, %v7227_v63  ;;  %v3037_v9 = vpop.f32.mrb[27].mxu0  ;;  %v4757_v12 = vpop.f32.mrb[43].mxu1  ;;  %v3124_v54 = vadd.f32 %v7237_v1, %v3106_v58  ;;  %v3466_v58 = vld [vmem:[#allocation12 + $0x40] sm:$0xff] }
 0xeb8   :  { %v5946_v18 = vadd.f32 %v3037_v9, %v7230_v19  ;;  %v3468_v12 = vld [vmem:[#allocation12 + $0x50] sm:$0xff] }
 0xeb9   :  { %v3842_v59 = vmul.f32 -1.442695, %v5945_v43  ;;  %v3467_v43 = vld [vmem:[#allocation12 + $0x48] sm:$0xff] }
 0xeba   :  { %v3843_v11 = vmul.f32 -1.442695, %v5946_v18  ;;  %v5844_v9 = vpack.c.bf16 %v3467_v43, %v3466_v58 }
 0xebb   :  { %6131 = vpow2.f32 %v3842_v59  ;;  %v3469_v59 = vld [vmem:[#allocation12 + $0x58] sm:$0xff] }
 0xebc   :  { %6133 = vpow2.f32 %v3843_v11  ;;  %v5847_v18 = vpack.c.bf16 %v3469_v59, %v3468_v12  ;;  %v3470_v11 = vld [vmem:[#allocation12 + $0x60] sm:$0xff] }
 0xec5   :  { %v6132_v62 = vpop.eup %6131 }
 0xec6   :  { %v3118_v15 = vadd.f32 1.0, %v6132_v62  ;;  %v6134_v16 = vpop.eup %6133  ;;  %v3471_v62 = vld [vmem:[#allocation12 + $0x68] sm:$0xff] }
 0xec7   :  { %v3119_v5 = vadd.f32 1.0, %v6134_v16  ;;  %v3472_v16 = vld [vmem:[#allocation12 + $0x70] sm:$0xff] }
 0xec8   :  { %6135 = vrcp.f32 %v3118_v15  ;;  %v5850_v15 = vpack.c.bf16 %v3471_v62, %v3470_v11 }
 0xec9   :  { %6137 = vrcp.f32 %v3119_v5  ;;  %v3473_v5 = vld [vmem:[#allocation12 + $0x78] sm:$0xff] }
 0xed2   :  { %v6136_v31 = vpop.eup %6135 }
 0xed3   :  { %v3125_v4 = vmul.f32 %v6136_v31, %v3124_v54  ;;  %v6138_v8 = vpop.eup %6137  ;;  %v5853_v54 = vpack.c.bf16 %v3473_v5, %v3472_v16  ;;  %v3553_v31 = vld [vmem:[#allocation14 + $0x8] sm:$0xff]  ;;  %v6162_v16 = vld [vmem:[%s7563_s8] ss:$0 sm:$0xff] }
 0xed4   :  { %v3128_v29 = vsub.f32 1.0, %v6138_v8  ;;  %v3130_v2 = vmul.f32 %v6138_v8, %v7426_v49  ;;  %v3464_v49 = vld [vmem:[#allocation12 + $0x30] sm:$0xff] }
 0xed5   :  { %v3126_v17 = vadd.f32 %v3125_v4, %v2086_v40  ;;  %v3555_v40 = vld [vmem:[#allocation14 + $0x18] sm:$0xff]  ;;  %v3552_v4 = vld [vmem:[#allocation14] sm:$0xff]  ;;  %v3554_v8 = vld [vmem:[#allocation14 + $0x10] sm:$0xff] }
 0xed7   :  { %6139 = vtanh.f32 %v3126_v17  ;;  %v5855_v17 = vpack.c.bf16 %v3555_v40, %v3553_v31 }
 0xee1   :  { %v6140_v36 = vpop.eup %6139 }
 0xee2   :  { %v3129_v37 = vmul.f32 %v6140_v36, %v3128_v29  ;;  %v3557_v29 = vld [vmem:[#allocation14 + $0x28] sm:$0xff]  ;;  %v3559_v36 = vld [vmem:[#allocation14 + $0x38] sm:$0xff] }
 0xee4   :  { %v3131_v28 = vadd.f32 %v3130_v2, %v3129_v37  ;;  %v5857_v37 = vpack.c.bf16 %v3554_v8, %v3552_v4  ;;  %v5859_v2 = vpack.c.bf16 %v3559_v36, %v3557_v29 }
 0xee6   :  { %3197 = vmatmul.mubr.f32.vlgmr.msra.gmra.mrb[28].mxu0 %v3131_v28  ;;  %4791 = vmatmul.mubr.f32.vlgmr.msra.gmra.mrb[44].mxu1 %v3131_v28 }
 0xee7   :  { %5778 = vmatpush1.bf16.msra.mxu0 %v7081_v25  ;;  %5809 = vmatpush3.bf16.msra.mxu1 %v7119_v44 }
 0xee8   :  { %5780 = vmatprep.subr.bf16.mxu0 %v7085_v27  ;;  %5810 = vmatprep.subr.bf16.mxu1 %v6388_v48 }
 0xee9   :  { %3359 = vmatprep.mubr.f32.mxu0 %v6387_v0  ;;  %4825 = vmatprep.mubr.msk.f32.mxu1 %vm6389_vm1, %v6387_v0 }
 0xeeb   :  { %5782 = vmatpush1.bf16.msra.mxu0 %v7087_v22  ;;  %5812 = vmatpush3.bf16.msra.mxu1 %v7130_v20 }
 0xeec   :  { %5784 = vmatprep.subr.bf16.mxu0 %v7091_v33  ;;  %5813 = vmatprep.subr.bf16.mxu1 %v6388_v48 }
 0xeef   :  { %5786 = vmatpush1.bf16.msra.mxu0 %v7093_v45  ;;  %5815 = vmatpush3.bf16.msra.mxu1 %v7136_v46 }
 0xef0   :  { %5788 = vmatprep.subr.bf16.mxu0 %v7097_v56  ;;  %5816 = vmatprep.subr.bf16.mxu1 %v6388_v48 }
 0xef3   :  { %5790 = vmatpush1.bf16.msra.mxu0 %v7099_v3  ;;  %5818 = vmatpush3.bf16.msra.mxu1 %v7139_v30 }
 0xef4   :  { %5792 = vmatprep.subr.bf16.mxu0 %v7103_v14  ;;  %5819 = vmatprep.subr.bf16.mxu1 %v6388_v48 }
 0xef7   :  { %5794 = vmatpush1.bf16.msra.mxu0 %v7105_v26  ;;  %5821 = vmatpush3.bf16.msra.mxu1 %v7143_v23 }
 0xef8   :  { %5796 = vmatprep.subr.bf16.mxu0 %v7109_v57  ;;  %5822 = vmatprep.subr.bf16.mxu1 %v6388_v48 }
 0xefb   :  { %5798 = vmatpush1.bf16.msra.mxu0 %v7111_v60  ;;  %5824 = vmatpush3.bf16.msra.mxu1 %v7147_v42 }
 0xefc   :  { %5800 = vmatprep.subr.bf16.mxu0 %v7115_v50  ;;  %5825 = vmatprep.subr.bf16.mxu1 %v6388_v48 }
 0xeff   :  { %5802 = vmatpush1.bf16.msra.mxu0 %v7117_v39  ;;  %5827 = vmatpush3.bf16.msra.mxu1 %v7151_v61 }
 0xf00   :  { %5804 = vmatprep.subr.bf16.mxu0 %v7124_v7  ;;  %5828 = vmatprep.subr.bf16.mxu1 %v6388_v48  ;;  %v2091_v7 = vadd.f32 %v7224_v53, %v7241_v6  ;;  %v3459_v53 = vld [vmem:[#allocation12 + $0x8] sm:$0xff] }
 0xf03   :  { %5806 = vmatpush1.bf16.msra.mxu0 %v7127_v13  ;;  %5830 = vmatpush3.bf16.msra.mxu1 %v7155_v10 }
 0xf04   :  { %5831 = vmatprep.subr.bf16.mxu0 %v6388_v48  ;;  %5856 = vmatprep.subr.bf16.mxu1 %v5855_v17 }
 0xfb9   :  { %v3198_v25 = vpop.f32.mrb[28].mxu0  ;;  %v3269_v27 = vpop.f32.mrb[44].mxu1 }
 0xfba   :  { %v5947_v22 = vadd.f32 %v3198_v25, %v7227_v63  ;;  %v3200_v33 = vpop.f32.mrb[29].mxu0  ;;  %v4792_v45 = vpop.f32.mrb[45].mxu1  ;;  %v3287_v39 = vadd.f32 %v7237_v1, %v3269_v27  ;;  %v5832_v1 = vpack.c.bf16 %v3459_v53, %v3458_v24  ;;  %v3558_v25 = vld [vmem:[#allocation14 + $0x30] sm:$0xff]  ;;  %v3561_v27 = vld [vmem:[#allocation14 + $0x48] sm:$0xff]  ;;  %v3572_v24 = vld [vmem:[#allocation14 + $0xa0] sm:$0xff] }
 0xfbb   :  { %v5948_v3 = vadd.f32 %v3200_v33, %v7230_v19  ;;  %v3574_v53 = vld [vmem:[#allocation14 + $0xb0] sm:$0xff] }
 0xfbc   :  { %v3844_v56 = vmul.f32 -1.442695, %v5947_v22  ;;  %v3563_v22 = vld [vmem:[#allocation14 + $0x58] sm:$0xff]  ;;  %v5877_v34 = vpack.c.bf16 %v3574_v53, %v3572_v24  ;;  %v3693_v24 = vld [vmem:[#allocation15 + $0xc0] sm:$0xff]  ;;  %v3694_v53 = vld [vmem:[#allocation15 + $0xc8] sm:$0xff] }
 0xfbd   :  { %v3845_v14 = vmul.f32 -1.442695, %v5948_v3  ;;  %v5863_v45 = vpack.c.bf16 %v3563_v22, %v3561_v27  ;;  %v3565_v3 = vld [vmem:[#allocation14 + $0x68] sm:$0xff]  ;;  %v3582_v27 = vld [vmem:[#allocation14 + $0xf0] sm:$0xff] }
 0xfbe   :  { %6141 = vpow2.f32 %v3844_v56  ;;  %v3562_v56 = vld [vmem:[#allocation14 + $0x50] sm:$0xff] }
 0xfbf   :  { %6143 = vpow2.f32 %v3845_v14  ;;  %v3567_v14 = vld [vmem:[#allocation14 + $0x78] sm:$0xff] }
 0xfc8   :  { %v6142_v26 = vpop.eup %6141 }
 0xfc9   :  { %v3281_v57 = vadd.f32 1.0, %v6142_v26  ;;  %v6144_v60 = vpop.eup %6143 }
 0xfca   :  { %v3282_v50 = vadd.f32 1.0, %v6144_v60  ;;  %v3564_v60 = vld [vmem:[#allocation14 + $0x60] sm:$0xff] }
 0xfcb   :  { %6145 = vrcp.f32 %v3281_v57  ;;  %v5867_v57 = vpack.c.bf16 %v3567_v14, %v3565_v3  ;;  %v3688_v3 = vld [vmem:[#allocation15 + $0x98] sm:$0xff] }
 0xfcc   :  { %6147 = vrcp.f32 %v3282_v50  ;;  %v3566_v50 = vld [vmem:[#allocation14 + $0x70] sm:$0xff] }
 0xfd5   :  { %v6146_v44 = vpop.eup %6145 }
 0xfd6   :  { %v3288_v13 = vmul.f32 %v6146_v44, %v3287_v39  ;;  %v6148_v46 = vpop.eup %6147  ;;  %v3569_v39 = vld [vmem:[#allocation14 + $0x88] sm:$0xff]  ;;  %v3571_v44 = vld [vmem:[#allocation14 + $0x98] sm:$0xff] }
 0xfd7   :  { %v3291_v30 = vsub.f32 1.0, %v6148_v46  ;;  %v3293_v61 = vmul.f32 %v6148_v46, %v3131_v28  ;;  %v3556_v28 = vld [vmem:[#allocation14 + $0x20] sm:$0xff]  ;;  %v3570_v46 = vld [vmem:[#allocation14 + $0x90] sm:$0xff] }
 0xfd8   :  { %v3289_v20 = vadd.f32 %v3288_v13, %v2091_v7  ;;  %v5861_v33 = vpack.c.bf16 %v3558_v25, %v3556_v28  ;;  %v5869_v7 = vpack.c.bf16 %v3566_v50, %v3564_v60  ;;  %v5871_v13 = vpack.c.bf16 %v3571_v44, %v3569_v39  ;;  %v3580_v25 = vld [vmem:[#allocation14 + $0xe0] sm:$0xff]  ;;  %v3690_v50 = vld [vmem:[#allocation15 + $0xa8] sm:$0xff] }
 0xfd9   :  { %v5885_v22 = vpack.c.bf16 %v3582_v27, %v3580_v25  ;;  %v3689_v60 = vld [vmem:[#allocation15 + $0xa0] sm:$0xff] }
 0xfda   :  { %6149 = vtanh.f32 %v3289_v20  ;;  %v3568_v20 = vld [vmem:[#allocation14 + $0x80] sm:$0xff]  ;;  %v5895_v44 = vpack.c.bf16 %v3690_v50, %v3689_v60 }
 0xfe4   :  { %v6150_v23 = vpop.eup %6149 }
 0xfe5   :  { %v3292_v42 = vmul.f32 %v6150_v23, %v3291_v30  ;;  %v3573_v30 = vld [vmem:[#allocation14 + $0xa8] sm:$0xff]  ;;  %v3575_v23 = vld [vmem:[#allocation14 + $0xb8] sm:$0xff] }
 0xfe7   :  { %v7510_v10 = vadd.f32 %v3293_v61, %v3292_v42  ;;  %v5873_v42 = vpack.c.bf16 %v3570_v46, %v3568_v20  ;;  %v5875_v61 = vpack.c.bf16 %v3575_v23, %v3573_v30  ;;  %v3691_v20 = vld [vmem:[#allocation15 + $0xb0] sm:$0xff]  ;;  %v3692_v46 = vld [vmem:[#allocation15 + $0xb8] sm:$0xff] }
 0xfe8   :  { %v5899_v23 = vpack.c.bf16 %v3692_v46, %v3691_v20 }
 0xfe9   :  { %3360 = vmatmul.mubr.f32.vlgmr.msra.gmra.mrb[30].mxu0 %v7510_v10  ;;  %4826 = vmatmul.mubr.f32.vlgmr.msra.gmra.mrb[46].mxu1 %v7510_v10 }
 0xfea   :  { %4860 = vmatprep.mubr.msk.f32.mxu0 %vm6389_vm1, %v6387_v0  ;;  %3660 = vmatprep.mubr.f32.mxu1 %v6387_v0  ;;  %v3465_v0 = vld [vmem:[#allocation12 + $0x38] sm:$0xff] }
 0xfeb   :  { %5833 = vmatpush3.bf16.msra.mxu0 %v5832_v1  ;;  %v5841_v38 = vpack.c.bf16 %v3465_v0, %v3464_v49  ;;  %5858 = vmatpush1.bf16.msra.mxu1 %v5857_v37  ;;  %v3577_v1 = vld [vmem:[#allocation14 + $0xc8] sm:$0xff] }
 0xfec   :  { %5834 = vmatprep.subr.bf16.mxu0 %v6388_v48  ;;  %5860 = vmatprep.subr.bf16.mxu1 %v5859_v2  ;;  %v3581_v37 = vld [vmem:[#allocation14 + $0xe8] sm:$0xff]  ;;  %v3583_v2 = vld [vmem:[#allocation14 + $0xf8] sm:$0xff] }
 0xfed   :  { %v5883_v28 = vpack.c.bf16 %v3583_v2, %v3581_v37 }
 0xfef   :  { %5836 = vmatpush3.bf16.msra.mxu0 %v5835_v32  ;;  %5862 = vmatpush1.bf16.msra.mxu1 %v5861_v33  ;;  %v5879_v32 = vpack.c.bf16 %v3579_v21, %v3577_v1  ;;  %v3669_v33 = vld [vmem:[#allocation15] sm:$0xff]  ;;  %v5903_v21 = vpack.c.bf16 %v3694_v53, %v3693_v24 }
 0xff0   :  { %5837 = vmatprep.subr.bf16.mxu0 %v6388_v48  ;;  %5864 = vmatprep.subr.bf16.mxu1 %v5863_v45 }
 0xff3   :  { %5839 = vmatpush3.bf16.msra.mxu0 %v5838_v47  ;;  %v5881_v47 = vpack.c.bf16 %v3578_v41, %v3576_v35  ;;  %v3695_v35 = vld [vmem:[#allocation15 + $0xd0] sm:$0xff]  ;;  %v3696_v41 = vld [vmem:[#allocation15 + $0xd8] sm:$0xff] }
 0xff4   :  { %5840 = vmatprep.subr.bf16.mxu0 %v6388_v48 }
 0xff7   :  { %5842 = vmatpush3.bf16.msra.mxu0 %v5841_v38 }
 0xff8   :  { %5843 = vmatprep.subr.bf16.mxu0 %v6388_v48 }
 0xffb   :  { %5845 = vmatpush3.bf16.msra.mxu0 %v5844_v9 }
 0xffc   :  { %5846 = vmatprep.subr.bf16.mxu0 %v6388_v48 }
 0xfff   :  { %5848 = vmatpush3.bf16.msra.mxu0 %v5847_v18 }
0x1000   :  { %5849 = vmatprep.subr.bf16.mxu0 %v6388_v48 }
0x1003   :  { %5851 = vmatpush3.bf16.msra.mxu0 %v5850_v15 }
0x1004   :  { %5852 = vmatprep.subr.bf16.mxu0 %v6388_v48  ;;  %v3560_v48 = vld [vmem:[#allocation14 + $0x40] sm:$0xff] }
0x1005   :  { %v5865_v26 = vpack.c.bf16 %v3562_v56, %v3560_v48  ;;  %v3670_v48 = vld [vmem:[#allocation15 + $0x8] sm:$0xff]  ;;  %v3687_v56 = vld [vmem:[#allocation15 + $0x90] sm:$0xff] }
0x1006   :  { %v5889_v14 = vpack.c.bf16 %v3670_v48, %v3669_v33 }
0x1007   :  { %5854 = vmatpush3.bf16.msra.mxu0 %v5853_v54  ;;  %5866 = vmatpush1.bf16.msra.mxu1 %v5865_v26  ;;  %v5891_v26 = vpack.c.bf16 %v3688_v3, %v3687_v56 }
0x1008   :  { %5868 = vmatprep.subr.bf16.mxu1 %v5867_v57  ;;  %v3672_v57 = vld [vmem:[#allocation15 + $0x18] sm:$0xff] }
0x100b   :  { %5870 = vmatpush1.bf16.msra.mxu1 %v5869_v7  ;;  %v3673_v7 = vld [vmem:[#allocation15 + $0x20] sm:$0xff] }
0x100c   :  { %5872 = vmatprep.subr.bf16.mxu1 %v5871_v13  ;;  %v3674_v13 = vld [vmem:[#allocation15 + $0x28] sm:$0xff] }
0x100d   :  { %v5897_v30 = vpack.c.bf16 %v3674_v13, %v3673_v7 }
0x100f   :  { %5874 = vmatpush1.bf16.msra.mxu1 %v5873_v42  ;;  %v3675_v42 = vld [vmem:[#allocation15 + $0x30] sm:$0xff] }
0x1010   :  { %5876 = vmatprep.subr.bf16.mxu1 %v5875_v61  ;;  %v3676_v61 = vld [vmem:[#allocation15 + $0x38] sm:$0xff] }
0x1011   :  { %v5901_v1 = vpack.c.bf16 %v3676_v61, %v3675_v42 }
0x1013   :  { %5878 = vmatpush1.bf16.msra.mxu1 %v5877_v34  ;;  %v3677_v34 = vld [vmem:[#allocation15 + $0x40] sm:$0xff] }
0x1014   :  { %5880 = vmatprep.subr.bf16.mxu1 %v5879_v32  ;;  %v3678_v32 = vld [vmem:[#allocation15 + $0x48] sm:$0xff] }
0x1017   :  { %5882 = vmatpush1.bf16.msra.mxu1 %v5881_v47  ;;  %v5905_v47 = vpack.c.bf16 %v3678_v32, %v3677_v34 }
0x1018   :  { %5884 = vmatprep.subr.bf16.mxu1 %v5883_v28 }
0x101b   :  { %5886 = vmatpush1.bf16.msra.mxu1 %v5885_v22 }
0x10bc   :  { %v3361_v49 = vpop.f32.mrb[30].mxu0  ;;  %v3432_v0 = vpop.f32.mrb[46].mxu1 }
0x10bd   :  { %v5949_v38 = vadd.f32 %v3361_v49, %v7227_v63  ;;  %v3363_v58 = vpop.f32.mrb[31].mxu0  ;;  %v4827_v43 = vpop.f32.mrb[47].mxu1  ;;  %v3450_v5 = vadd.f32 %v6162_v16, %v3432_v0  ;;  %v2096_v63 = vadd.f32 %v7222_v51, %v7241_v6  ;;  %v3685_v51 = vld [vmem:[#allocation15 + $0x80] sm:$0xff]  ;;  %v3686_v6 = vld [vmem:[#allocation15 + $0x88] sm:$0xff]  ;;  %v5907_v49 = vpack.c.bf16 %v3696_v41, %v3695_v35  ;;  %v3679_v0 = vld [vmem:[#allocation15 + $0x50] sm:$0xff] }
0x10be   :  { %v5950_v12 = vadd.f32 %v3363_v58, %v7230_v19  ;;  %v5887_v45 = vpack.c.bf16 %v3686_v6, %v3685_v51  ;;  %v3697_v58 = vld [vmem:[#allocation15 + $0xe0] sm:$0xff]  ;;  %v3698_v43 = vld [vmem:[#allocation15 + $0xe8] sm:$0xff]  ;;  %v3849_v6 = vld [vmem:[%s7569_s14] ss:$0 sm:$0xff] }
0x10bf   :  { %v3846_v9 = vmul.f32 -1.442695, %v5949_v38  ;;  %v3680_v38 = vld [vmem:[#allocation15 + $0x58] sm:$0xff]  ;;  %v3681_v16 = vld [vmem:[#allocation15 + $0x60] sm:$0xff] }
0x10c0   :  { %v3847_v59 = vmul.f32 -1.442695, %v5950_v12  ;;  %5888 = vmatprep.subr.bf16.mxu0 %v5887_v45  ;;  %v5911_v12 = vpack.c.bf16 %v3698_v43, %v3697_v58 }
0x10c1   :  { %6151 = vpow2.f32 %v3846_v9  ;;  %v5909_v9 = vpack.c.bf16 %v3680_v38, %v3679_v0 }
0x10c2   :  { %6153 = vpow2.f32 %v3847_v59  ;;  %v3848_v59 = vld [vmem:[%s7565_s10] ss:$0 sm:$0xff] }
0x10cb   :  { %v6152_v18 = vpop.eup %6151 }
0x10cc   :  { %v3444_v11 = vadd.f32 1.0, %v6152_v18  ;;  %v6154_v62 = vpop.eup %6153 }
0x10cd   :  { %v3445_v15 = vadd.f32 1.0, %v6154_v62 }
0x10ce   :  { %6155 = vrcp.f32 %v3444_v11 }
0x10cf   :  { %6157 = vrcp.f32 %v3445_v15 }
0x10d8   :  { %v6156_v54 = vpop.eup %6155 }
0x10d9   :  { %v3451_v31 = vmul.f32 %v6156_v54, %v3450_v5  ;;  %v6158_v40 = vpop.eup %6157  ;;  %v3682_v5 = vld [vmem:[#allocation15 + $0x68] sm:$0xff] }
0x10da   :  { %v3454_v4 = vsub.f32 1.0, %v6158_v40  ;;  %v3456_v29 = vmul.f32 %v6158_v40, %v7510_v10  ;;  %v3671_v10 = vld [vmem:[#allocation15 + $0x10] sm:$0xff]  ;;  %v5913_v54 = vpack.c.bf16 %v3682_v5, %v3681_v16 }
0x10db   :  { %v3452_v19 = vadd.f32 %v3451_v31, %v2096_v63  ;;  %v5893_v39 = vpack.c.bf16 %v3672_v57, %v3671_v10  ;;  %v3699_v63 = vld [vmem:[#allocation15 + $0xf0] sm:$0xff]  ;;  %v3700_v31 = vld [vmem:[#allocation15 + $0xf8] sm:$0xff] }
0x10dc   :  { %v3683_v40 = vld [vmem:[#allocation15 + $0x70] sm:$0xff] }
0x10dd   :  { %6159 = vtanh.f32 %v3452_v19  ;;  %v5915_v19 = vpack.c.bf16 %v3700_v31, %v3699_v63 }
0x10e7   :  { %v6160_v17 = vpop.eup %6159 }
0x10e8   :  { %v3455_v8 = vmul.f32 %v6160_v17, %v3454_v4  ;;  %v3684_v4 = vld [vmem:[#allocation15 + $0x78] sm:$0xff] }
0x10e9   :  { %v5917_v17 = vpack.c.bf16 %v3684_v4, %v3683_v40 }
0x10ea   :  { %v3457_v36 = vadd.f32 %v3456_v29, %v3455_v8  ;;  %v3584_v8 = vld [vmem:[%s7567_s12] sm:$0x3]  ;;  %s3785_s12 = sshll.u32 %s6390_s25, 4  ;;  %s3786_s12 = int_to_ptr.vmem [resolvable:$true] %s3785_s12 }
0x10eb   :  { %v3589_v29 = vrot.slane %v3584_v8, %v6763_v52  ;;  %s6339_s3 = scalar_lea.vmem %s3786_s12, 128  ;;  %p6344_p9 = scmp.lt.s32.totalorder %s3786_s12, %s3786_s12 }
0x10ec   :  { %4861 = vmatmul.mubr.f32.vlgmr.msra.gmra.mrb[32].mxu0 %v3457_v36  ;;  %v3593_v36 = vrot.slane %v3584_v8, %v6766_v55  ;;  %p6340_p8 = scmp.ne.s32.totalorder %s3786_s12, %s6339_s3  ;;  %p6345_p10 = scmp.lt.s32.totalorder %s6339_s3, %s6339_s3 }
0x10ed   :  { %5890 = vmatpush3.bf16.msra.mxu0 %v5889_v14 }
0x10ee   :  { %5892 = vmatprep.subr.bf16.mxu0 %v5891_v26  ;;  %p6346_p11 = por %p6345_p10, %p6344_p9 }
0x10f0   :  { %p6347_p12 = pnand %p6346_p11, %p6340_p8 }
0x10f1   :  { %5894 = vmatpush3.bf16.msra.mxu0 %v5893_v39 }
0x10f2   :  { %5896 = vmatprep.subr.bf16.mxu0 %v5895_v44 }
0x10f5   :  { %5898 = vmatpush3.bf16.msra.mxu0 %v5897_v30 }
0x10f6   :  { %5900 = vmatprep.subr.bf16.mxu0 %v5899_v23 }
0x10f9   :  { %5902 = vmatpush3.bf16.msra.mxu0 %v5901_v1 }
0x10fa   :  { %5904 = vmatprep.subr.bf16.mxu0 %v5903_v21 }
0x10fd   :  { %5906 = vmatpush3.bf16.msra.mxu0 %v5905_v47 }
0x10fe   :  { %5908 = vmatprep.subr.bf16.mxu0 %v5907_v49 }
0x1101   :  { %5910 = vmatpush3.bf16.msra.mxu0 %v5909_v9 }
0x1102   :  { %5912 = vmatprep.subr.bf16.mxu0 %v5911_v12 }
0x1105   :  { %5914 = vmatpush3.bf16.msra.mxu0 %v5913_v54 }
0x1106   :  { %5916 = vmatprep.subr.bf16.mxu0 %v5915_v19 }
0x1109   :  { %5918 = vmatpush3.bf16.msra.mxu0 %v5917_v17 }
0x11bf   :  { %v3547_v18 = vpop.f32.mrb[32].mxu0 }
0x11c0   :  { %v3548_v11 = vadd.f32 %v3848_v59, %v3547_v18  ;;  %v4862_v62 = vpop.f32.mrb[33].mxu0 }
0x11c2   :  { %v3551_v15 = vmax.f32 %v3548_v11, 0.0 }
0x11c4   :  { %3661 = vmatmul.mubr.f32.vlgmr.msra.gmra.mrb[48].mxu1 %v3551_v15 }
0x1297   :  { %v3662_v37 = vpop.f32.mrb[48].mxu1 }
0x1298   :  { %v3663_v2 = vadd.f32 %v3662_v37, %v3589_v29  ;;  %v3664_v28 = vpop.f32.mrb[49].mxu1 }
0x1299   :  { %v3665_v25 = vadd.f32 %v3664_v28, %v3593_v36 }
0x129a   :  { %v3667_v22 = vmax.f32 %v3663_v2, 0.0 }
0x129b   :  { %v3668_v27 = vmax.f32 %v3665_v25, 0.0 }
0x129d   :  { %3772 = vmatprep.mubr.f32.mxu0 %v3668_v27 }
0x129e   :  { %3773 = vmatmul.mubr.f32.vlgmr.msra.gmra.mrb[34].mxu0 %v3667_v22 }
0x1371   :  { %v4205_v51 = vpop.f32.mrb[34].mxu0 }
0x1372   :  { %v4206_v33 = vpop.f32.mrb[35].mxu0 }
0x1373   :  { %v4207_v45 = vadd.f32 %v4206_v33, %v4205_v51 }
0x1375   :  { %v3775_v52 = vadd.f32 %v4207_v45, %v3849_v6 }
0x1377   :  { %3778 = vst [vmem:[#allocation17] sm:$0xff] %v3775_v52 }
0x1378   :  { %6350 = shalt.err (!%p6347_p12)
}
0x1379   :  { %s6351_s0 = scalar_lea.hbm %s7570_s15, 128 }
0x137a   :  { %p6352_p13 = scmp.ne.s32.totalorder %s7570_s15, %s6351_s0  ;;  %p6355_p0 = scmp.lt.u32.totalorder %s6351_s0, %s7570_s15 }
0x137c   :  { %p6357_p1 = pnand %p6355_p0, %p6352_p13 }
0x137e   :  { %6360 = shalt.err (!%p6357_p1)
}
0x137f   :  { %3788 = dma.vmem_to_hbm [thread:$0]  %s3786_s12, 128, %s7570_s15, [#allocation5]  }
0x1380   :  { %6371 = dma.done.wait [#allocation5], 128  }
0x1381   :  { %6372 = vsyncadd [#allocation5], 4294967168 }
0x1382   :  { %3792 = vsyncpa [#allocation4], 1 }
0x1383   :  { %3793 = vsyncpa [#allocation7], 1 }
0x1384   :  { %3794 = vsyncpa [#allocation10], 1 }
0x1385   :  { %3795 = vsyncpa [#allocation13], 1 }
0x1386   :  { %3796 = vsyncpa [#allocation16], 1 }
0x1387   :  { %3797 = vsyncpa [#allocation5], 1 }

</bundles_post_ra>
